<compile_context>
chip_gen: v7x
topology: tpu7x:2x2x1
jax: 0.10.0
libtpu: 0.0.40
codegen_flags: <defaults>
</compile_context>

<pallas_src>
import functools

import jax
import jax.numpy as jnp
from jax.experimental import pallas as pl
from jax.experimental.pallas import tpu as pltpu

_WPAD = 8  # sublane-aligned horizontal halo inside the VMEM scratch


def adjust_channel(channel, width_coefficient, channel_min=None, divisor=8):
    if channel_min is None:
        channel_min = divisor
    channel_adjust = max(channel_min, int(channel * width_coefficient + divisor / 2) // divisor * divisor)
    if channel_adjust < 0.9 * channel * width_coefficient:
        channel_adjust += divisor
    return channel_adjust


def _fold_bn(gamma, beta, mean, var, eps=1e-5):
    scale = gamma / jnp.sqrt(var + eps)
    bias = beta - mean * scale
    return scale.astype(jnp.float32), bias.astype(jnp.float32)


def _stochastic_depth_scale(n, p, training, rng):
    """Per-sample drop-path multiplier; matches torch StochasticDepth.forward ('row' mode)."""
    if (not training) or p == 0.0:
        return jnp.ones((n,), jnp.float32)
    if rng is None:
        raise ValueError("StochasticDepth: rng key required when training=True and p>0")
    keep_prob = 1.0 - p
    u = jax.random.uniform(rng, (n,), jnp.float32)
    return jnp.floor(keep_prob + u) / keep_prob


def _vmem_limit_bytes():
    """Generation-aware scoped-VMEM limit: ~half of physical VMEM, capped at 96 MiB
    (~64-96 MiB on v5e/v6e which have 128 MiB, 32 MiB on v7x which has 64 MiB)."""
    default = 32 * 1024 * 1024
    try:
        cap = int(pltpu.get_tpu_info().vmem_capacity_bytes)
    except Exception:
        return default
    if cap <= 0:
        return default
    return max(default, min(cap // 2, 96 * 1024 * 1024))


# ----------------------------- Pallas kernels -----------------------------

def _expand_dw_kernel(x_ref, we_ref, s1_ref, b1_ref, wdw_ref, s2_ref, b2_ref,
                      act_ref, ssum_ref, xp_ref, *, H, W, K, stride, Ho, Wo, RB):
    pad = (K - 1) // 2
    Cexp = we_ref.shape[1]                                          # lane-padded Cexp
    Hp, Wp = H + 2 * pad, W + 2 * _WPAD

    # ---- 1x1 expand conv: bf16 operands, f32 MXU accumulation, + folded BN + SiLU ----
    x = x_ref[0].astype(jnp.bfloat16)                               # (Cin, H*W)
    y = jax.lax.dot_general(x, we_ref[...],
                            dimension_numbers=(((0,), (0,)), ((), ())),
                            preferred_element_type=jnp.float32)     # (H*W, Cexp) f32
    y = y * s1_ref[...] + b1_ref[...]
    y = y * jax.nn.sigmoid(y)

    # ---- zero ONLY the halo strips (interior is fully overwritten every grid step;
    #      halo re-zeroed each step so 'parallel' batch sharding across cores is safe) ----
    if pad > 0:
        xp_ref[0:pad, :, :] = jnp.zeros((pad, Wp, Cexp), jnp.float32)
        xp_ref[pad + H:Hp, :, :] = jnp.zeros((Hp - pad - H, Wp, Cexp), jnp.float32)
        xp_ref[pad:pad + H, _WPAD - pad:_WPAD, :] = jnp.zeros((H, pad, Cexp), jnp.float32)
        xp_ref[pad:pad + H, _WPAD + W:_WPAD + W + pad, :] = jnp.zeros((H, pad, Cexp), jnp.float32)
    xp_ref[pad:pad + H, _WPAD:_WPAD + W, :] = y.reshape(H, W, Cexp)

    # ---- depthwise KxK conv, row-blocked (RB output rows per chunk) so the f32
    #      accumulator stays in vregs instead of round-tripping VMEM K*K times ----
    wdw = wdw_ref[...]                                              # (K*K, Cexp) tiny, load once
    s2 = s2_ref[...]
    b2 = b2_ref[...]
    nrows = (RB - 1) * stride + 1
    ncols = (Wo - 1) * stride + 1
    ssum = jnp.zeros((1, Cexp), jnp.float32)
    for rb in range(Ho // RB):                                      # static, fully unrolled
        r0 = rb * RB * stride
        acc = jnp.zeros((RB, Wo, Cexp), jnp.float32)
        for i in range(K):
            if stride == 1:
                for j in range(K):
                    c0 = _WPAD + j - pad
                    tap = xp_ref[r0 + i:r0 + i + RB, c0:c0 + Wo, :]
                    acc = acc + tap * wdw[i * K + j, :]
            else:
                rows = xp_ref[r0 + i:r0 + i + nrows, :, :]
                rows = rows[::stride]
                for j in range(K):
                    c0 = _WPAD + j - pad
                    tap = rows[:, c0:c0 + ncols, :]
                    tap = tap[:, ::stride, :]
                    acc = acc + tap * wdw[i * K + j, :]
        y2 = acc * s2 + b2
        y2 = y2 * jax.nn.sigmoid(y2)                                # (RB, Wo, Cexp) f32
        y2f = y2.reshape(RB * Wo, Cexp)
        act_ref[0, rb * RB * Wo:(rb + 1) * RB * Wo, :] = y2f.astype(act_ref.dtype)
        ssum = ssum + jnp.sum(y2f, axis=0, keepdims=True)
    ssum_ref[0] = ssum                                              # SE per-channel spatial sum


def _project_shortcut_kernel(x_ref, w_ref, s3_ref, b3_ref, sd_ref, x0_ref, o_ref):
    # w_ref already carries the per-batch SE channel scale (folded in JAX, bf16)
    y = jax.lax.dot_general(w_ref[0], x_ref[0],
                            dimension_numbers=(((1,), (1,)), ((), ())),
                            preferred_element_type=jnp.float32)     # (Cout, THW) f32, lane-dense
    y = y * s3_ref[...] + b3_ref[...]                               # folded BatchNorm
    y = y * sd_ref[0]                                               # StochasticDepth per-sample scale
    o_ref[0] = (y + x0_ref[0]).astype(o_ref.dtype)                  # residual add, NC(HW) output


def _project_kernel(x_ref, w_ref, s3_ref, b3_ref, o_ref):
    y = jax.lax.dot_general(w_ref[0], x_ref[0],
                            dimension_numbers=(((1,), (1,)), ((), ())),
                            preferred_element_type=jnp.float32)
    o_ref[0] = (y * s3_ref[...] + b3_ref[...]).astype(o_ref.dtype)


# ----------------------------- module wrapper -----------------------------

class MBConvPallas:
    def __init__(self, kernel_size, channel_input, channel_output, expanded_ratio,
                 stride, drop_connect_rate, width_coefficient, key):
        if expanded_ratio <= 1:
            # TODO(synk): expanded_ratio == 1 variant (no expand conv) not implemented.
            raise NotImplementedError("expanded_ratio must be > 1")
        self.kernel_size = kernel_size
        self.channel_input_adj = adjust_channel(channel_input, width_coefficient)
        self.channel_expanded = self.channel_input_adj * expanded_ratio
        self.channel_output_adj = adjust_channel(channel_output, width_coefficient)
        self.channel_squeeze = self.channel_input_adj // 4
        self.stride = stride
        self.drop_connect_rate = drop_connect_rate
        self.use_shortcut = stride == 1 and channel_input == channel_output

        Cin, Cexp, Cout, Csq = (self.channel_input_adj, self.channel_expanded,
                                self.channel_output_adj, self.channel_squeeze)
        K = kernel_size
        ks = jax.random.split(key, 20)
        f32 = jnp.float32

        def bn_params(k0, k1, k2, k3, n):
            return (1.0 + 0.1 * jax.random.normal(ks[k0], (n,), f32),   # gamma
                    0.1 * jax.random.normal(ks[k1], (n,), f32),          # beta
                    0.1 * jax.random.normal(ks[k2], (n,), f32),          # running mean
                    0.5 + jax.random.uniform(ks[k3], (n,), f32))         # running var

        # expand 1x1 conv: torch weight (Cexp, Cin, 1, 1) -> stored as (Cin, Cexp)
        self.w_expand = 0.1 * jax.random.normal(ks[0], (Cin, Cexp), f32)
        self.bn1 = bn_params(1, 2, 3, 4, Cexp)
        # depthwise conv: torch weight (Cexp, 1, K, K) -> stored as (K*K, Cexp)
        self.w_dw = 0.2 * jax.random.normal(ks[5], (K * K, Cexp), f32)
        self.bn2 = bn_params(6, 7, 8, 9, Cexp)
        # SE: conv1 (Csq, Cexp, 1, 1) -> (Cexp, Csq); conv2 (Cexp, Csq, 1, 1) -> (Csq, Cexp)
        self.w_se1 = 0.2 * jax.random.normal(ks[10], (Cexp, Csq), f32)
        self.b_se1 = 0.1 * jax.random.normal(ks[11], (1, Csq), f32)
        self.w_se2 = 0.2 * jax.random.normal(ks[12], (Csq, Cexp), f32)
        self.b_se2 = 0.1 * jax.random.normal(ks[13], (1, Cexp), f32)
        # projection 1x1 conv: torch weight (Cout, Cexp, 1, 1) -> stored as (Cout, Cexp)
        self.w_down_t = 0.1 * jax.random.normal(ks[14], (Cout, Cexp), f32)
        self.bn3 = bn_params(15, 16, 17, 18, Cout)

        self._prepare_kernel_params()

    def _prepare_kernel_params(self):
        """Pad all Cexp-minor tensors to a multiple of 128 (lane-dense kernels) and
        pre-fold BatchNorm.  Padded channels carry zero weights/scales, so they
        contribute exactly 0.0 everywhere — numerics match the unpadded reference."""
        Cexp, Cout = self.channel_expanded, self.channel_output_adj
        Cexp_p = ((Cexp + 127) // 128) * 128
        self.channel_expanded_padded = Cexp_p
        pc = Cexp_p - Cexp

        def padc(a, axis):
            return jnp.pad(a, [(0, pc if ax == axis else 0) for ax in range(a.ndim)])

        s1, b1 = _fold_bn(*self.bn1)
        s2, b2 = _fold_bn(*self.bn2)
        s3, b3 = _fold_bn(*self.bn3)

        self._we_p = padc(self.w_expand, 1).astype(jnp.bfloat16)      # (Cin, Cexp_p) bf16
        self._s1_p = padc(s1.reshape(1, Cexp), 1)
        self._b1_p = padc(b1.reshape(1, Cexp), 1)
        self._wdw_p = padc(self.w_dw, 1)                              # (K*K, Cexp_p)
        self._s2_p = padc(s2.reshape(1, Cexp), 1)
        self._b2_p = padc(b2.reshape(1, Cexp), 1)
        self._wse1_p = padc(self.w_se1, 0)                            # (Cexp_p, Csq)
        self._wse2_p = padc(self.w_se2, 1)                            # (Csq, Cexp_p)
        self._bse2_p = padc(self.b_se2, 1)                            # (1, Cexp_p)
        self._wdown_p = padc(self.w_down_t, 1)                        # (Cout, Cexp_p)
        self._s3 = s3.reshape(Cout, 1)
        self._b3 = b3.reshape(Cout, 1)

    def __call__(self, x_nchw, training=False, rng=None):
        N, Cin, H, W = x_nchw.shape
        assert Cin == self.channel_input_adj
        Cexp_p, Cout = self.channel_expanded_padded, self.channel_output_adj
        K, S = self.kernel_size, self.stride
        pad = (K - 1) // 2
        Ho = (H + 2 * pad - K) // S + 1
        Wo = (W + 2 * pad - K) // S + 1
        HW, HWo = H * W, Ho * Wo

        vmem_limit = _vmem_limit_bytes()
        x2d = x_nchw.reshape(N, Cin, HW).astype(jnp.float32)         # NCHW -> (N, C, H*W), free

        # row-block size for the depthwise accumulator (must divide Ho)
        RB = 1
        for cand in (8, 7, 4, 2, 1):
            if Ho % cand == 0:
                RB = cand
                break

        # -------- fused expand + depthwise + SE-pool kernel (grid over batch) --------
        act, ssum = pl.pallas_call(
            functools.partial(_expand_dw_kernel, H=H, W=W, K=K, stride=S, Ho=Ho, Wo=Wo, RB=RB),
            grid=(N,),
            in_specs=[pl.BlockSpec((1, Cin, HW), lambda n: (n, 0, 0)),
                      pl.BlockSpec((Cin, Cexp_p), lambda n: (0, 0)),
                      pl.BlockSpec((1, Cexp_p), lambda n: (0, 0)),
                      pl.BlockSpec((1, Cexp_p), lambda n: (0, 0)),
                      pl.BlockSpec((K * K, Cexp_p), lambda n: (0, 0)),
                      pl.BlockSpec((1, Cexp_p), lambda n: (0, 0)),
                      pl.BlockSpec((1, Cexp_p), lambda n: (0, 0))],
            out_specs=(pl.BlockSpec((1, HWo, Cexp_p), lambda n: (n, 0, 0)),
                       pl.BlockSpec((1, 1, Cexp_p), lambda n: (n, 0, 0))),
            out_shape=(jax.ShapeDtypeStruct((N, HWo, Cexp_p), jnp.bfloat16),
                       jax.ShapeDtypeStruct((N, 1, Cexp_p), jnp.float32)),
            scratch_shapes=[pltpu.VMEM((H + 2 * pad, W + 2 * _WPAD, Cexp_p), jnp.float32)],
            compiler_params=pltpu.CompilerParams(dimension_semantics=("parallel",),
                                                 vmem_limit_bytes=vmem_limit),
        )(x2d, self._we_p, self._s1_p, self._b1_p, self._wdw_p, self._s2_p, self._b2_p)

        # -------- squeeze-excitation FC layers: tiny (N, Cexp) matvecs, plain JAX --------
        hi = jax.lax.Precision.HIGHEST
        pooled = ssum.reshape(N, Cexp_p) / float(HWo)
        mid = jnp.dot(pooled, self._wse1_p, precision=hi) + self.b_se1
        mid = mid * jax.nn.sigmoid(mid)
        se = jax.nn.sigmoid(jnp.dot(mid, self._wse2_p, precision=hi) + self._bse2_p)  # (N, Cexp_p)
        # fold the per-batch SE channel scale into the tiny projection weight (in JAX,
        # so the kernel issues its MXU matmul immediately with no per-tile VPU prelude)
        w_fold = (self._wdown_p[None, :, :] * se[:, None, :]).astype(jnp.bfloat16)    # (N, Cout, Cexp_p)

        # -------- projection + BN (+ StochasticDepth + residual), NC(HW) lane-dense out --------
        def proj_step_bytes(t):  # rough double-buffered per-step VMEM footprint
            return 2 * (t * Cexp_p * 2 + 2 * Cout * t * 4) + Cout * Cexp_p * 2

        THW = HWo
        for cand in (8192, 4096, 2048, 1024, 512, 256, 128):
            if HWo % cand == 0 and proj_step_bytes(cand) <= vmem_limit // 2:
                THW = cand
                break
        proj_params = pltpu.CompilerParams(dimension_semantics=("parallel", "parallel"),
                                           vmem_limit_bytes=vmem_limit)
        grid = (N, HWo // THW)

        if self.use_shortcut:
            sd = _stochastic_depth_scale(N, self.drop_connect_rate, training, rng)
            sd3 = jnp.broadcast_to(sd[:, None, None], (N, Cout, 1)).astype(jnp.float32)
            out = pl.pallas_call(
                _project_shortcut_kernel,
                grid=grid,
                in_specs=[pl.BlockSpec((1, THW, Cexp_p), lambda n, t: (n, t, 0)),
                          pl.BlockSpec((1, Cout, Cexp_p), lambda n, t: (n, 0, 0)),
                          pl.BlockSpec((Cout, 1), lambda n, t: (0, 0)),
                          pl.BlockSpec((Cout, 1), lambda n, t: (0, 0)),
                          pl.BlockSpec((1, Cout, 1), lambda n, t: (n, 0, 0)),
                          pl.BlockSpec((1, Cout, THW), lambda n, t: (n, 0, t))],
                out_specs=pl.BlockSpec((1, Cout, THW), lambda n, t: (n, 0, t)),
                out_shape=jax.ShapeDtypeStruct((N, Cout, HWo), jnp.float32),
                compiler_params=proj_params,
            )(act, w_fold, self._s3, self._b3, sd3, x2d)
        else:
            out = pl.pallas_call(
                _project_kernel,
                grid=grid,
                in_specs=[pl.BlockSpec((1, THW, Cexp_p), lambda n, t: (n, t, 0)),
                          pl.BlockSpec((1, Cout, Cexp_p), lambda n, t: (n, 0, 0)),
                          pl.BlockSpec((Cout, 1), lambda n, t: (0, 0)),
                          pl.BlockSpec((Cout, 1), lambda n, t: (0, 0))],
                out_specs=pl.BlockSpec((1, Cout, THW), lambda n, t: (n, 0, t)),
                out_shape=jax.ShapeDtypeStruct((N, Cout, HWo), jnp.float32),
                compiler_params=proj_params,
            )(act, w_fold, self._s3, self._b3)

        return out.reshape(N, Cout, Ho, Wo)                          # already NCHW; free reshape


# ----------------------------- pure-JAX reference -----------------------------

def mbconv_ref(m, x_nchw, training=False, rng=None):
    """Pure-JAX reference using the same operand roundings as the kernels
    (bf16 matmul operands, f32 accumulation and f32 elementwise math)."""
    f32, bf16 = jnp.float32, jnp.bfloat16
    hi = jax.lax.Precision.HIGHEST
    rd = lambda a: a.astype(bf16).astype(f32)
    silu = lambda v: v * jax.nn.sigmoid(v)

    N, Cin, H, W = x_nchw.shape
    Cexp, Cout = m.channel_expanded, m.channel_output_adj
    K, S = m.kernel_size, m.stride
    pad = (K - 1) // 2
    Ho = (H + 2 * pad - K) // S + 1
    Wo = (W + 2 * pad - K) // S + 1

    s1, b1 = _fold_bn(*m.bn1)
    s2, b2 = _fold_bn(*m.bn2)
    s3, b3 = _fold_bn(*m.bn3)

    x = jnp.transpose(x_nchw, (0, 2, 3, 1)).astype(f32)                     # NHWC
    y = jnp.einsum('nhwc,ce->nhwe', rd(x), rd(m.w_expand), precision=hi)
    y = silu(y * s1 + b1)

    xp = jnp.pad(y, ((0, 0), (pad, pad), (pad, pad), (0, 0)))
    acc = jnp.zeros((N, Ho, Wo, Cexp), f32)
    for i in range(K):
        for j in range(K):
            acc = acc + xp[:, i:i + (Ho - 1) * S + 1:S,
                              j:j + (Wo - 1) * S + 1:S, :] * m.w_dw[i * K + j]
    y2 = silu(acc * s2 + b2)                                                # (N, Ho, Wo, Cexp)

    pooled = jnp.sum(y2, axis=(1, 2)) / float(Ho * Wo)
    mid = silu(jnp.dot(pooled, m.w_se1, precision=hi) + m.b_se1)
    se = jax.nn.sigmoid(jnp.dot(mid, m.w_se2, precision=hi) + m.b_se2)      # (N, Cexp)

    w_s = rd(m.w_down_t[None, :, :] * se[:, None, :])                       # (N, Cout, Cexp)
    y3 = jnp.einsum('nhwe,nce->nchw', rd(y2), w_s, precision=hi)
    y3 = y3 * s3[None, :, None, None] + b3[None, :, None, None]
    if m.use_shortcut:
        sd = _stochastic_depth_scale(N, m.drop_connect_rate, training, rng)
        y3 = y3 * sd[:, None, None, None] + x_nchw.astype(f32)
    return y3


if __name__ == "__main__":
    key = jax.random.PRNGKey(0)
    k_param, k_x, k_sd = jax.random.split(key, 3)

    # channel_input=8, width_coefficient=1.0 -> Cin=8, Cexp=48 (padded to 128), Cout=8;
    # stride=1 & channel_input==channel_output -> residual shortcut path.
    m = MBConvPallas(kernel_size=3, channel_input=8, channel_output=8, expanded_ratio=6,
                     stride=1, drop_connect_rate=0.2, width_coefficient=1.0, key=k_param)

    x = jax.random.normal(k_x, (2, m.channel_input_adj, 16, 16), jnp.float32)  # NCHW input

    # eval mode: StochasticDepth is the identity (default torch module behaviour)
    out = jax.block_until_ready(m(x))
    assert out.shape == (2, m.channel_output_adj, 16, 16), out.shape
    ref = mbconv_ref(m, x)
    max_err = float(jnp.max(jnp.abs(out - ref)))
    assert max_err < 2e-3, f"eval-mode mismatch vs reference: {max_err}"

    # training mode: per-sample StochasticDepth drop-path on the residual branch
    out_tr = jax.block_until_ready(m(x, training=True, rng=k_sd))
    ref_tr = mbconv_ref(m, x, training=True, rng=k_sd)
    max_err_tr = float(jnp.max(jnp.abs(out_tr - ref_tr)))
    assert max_err_tr < 2e-3, f"training-mode mismatch vs reference: {max_err_tr}"

    print("KERNEL_OK")
</pallas_src>

<mosaic_0001>
module attributes {stable_mosaic.version = 11 : i64} {
  func.func @_expand_dw_kernel(%arg0: i32, %arg1: memref<1x8x256xf32, #tpu.memory_space<vmem>>, %arg2: memref<8x128xbf16, #tpu.memory_space<vmem>>, %arg3: memref<1x128xf32, #tpu.memory_space<vmem>>, %arg4: memref<1x128xf32, #tpu.memory_space<vmem>>, %arg5: memref<9x128xf32, #tpu.memory_space<vmem>>, %arg6: memref<1x128xf32, #tpu.memory_space<vmem>>, %arg7: memref<1x128xf32, #tpu.memory_space<vmem>>, %arg8: memref<1x256x128xbf16, #tpu.memory_space<vmem>>, %arg9: memref<1x1x128xf32, #tpu.memory_space<vmem>>, %arg10: memref<18x32x128xf32, #tpu.memory_space<vmem>>) attributes {dimension_semantics = [#tpu.dimension_semantics<parallel>], iteration_bounds = array<i64: 2>, scalar_prefetch = 0 : i64, scratch_operands = 1 : i64, tpu.core_type = #tpu.core_type<tc>, window_params = [{transform_indices = @transform_0, window_bounds = array<i64: 1, 8, 256>}, {pipeline_mode = #tpu.pipeline_mode<synchronous>, transform_indices = @transform_1, window_bounds = array<i64: 8, 128>}, {pipeline_mode = #tpu.pipeline_mode<synchronous>, transform_indices = @transform_2, window_bounds = array<i64: 1, 128>}, {pipeline_mode = #tpu.pipeline_mode<synchronous>, transform_indices = @transform_3, window_bounds = array<i64: 1, 128>}, {pipeline_mode = #tpu.pipeline_mode<synchronous>, transform_indices = @transform_4, window_bounds = array<i64: 9, 128>}, {pipeline_mode = #tpu.pipeline_mode<synchronous>, transform_indices = @transform_5, window_bounds = array<i64: 1, 128>}, {pipeline_mode = #tpu.pipeline_mode<synchronous>, transform_indices = @transform_6, window_bounds = array<i64: 1, 128>}, {transform_indices = @transform_7, window_bounds = array<i64: 1, 256, 128>}, {transform_indices = @transform_8, window_bounds = array<i64: 1, 1, 128>}]} {
    %c0 = arith.constant 0 : index
    %c0_0 = arith.constant 0 : index
    %c0_1 = arith.constant 0 : index
    %0 = vector.load %arg1[%c0, %c0_0, %c0_1] : memref<1x8x256xf32, #tpu.memory_space<vmem>>, vector<1x8x256xf32>
    %1 = vector.shape_cast %0 : vector<1x8x256xf32> to vector<8x256xf32>
    %2 = arith.truncf %1 : vector<8x256xf32> to vector<8x256xbf16>
    %c0_2 = arith.constant 0 : index
    %c0_3 = arith.constant 0 : index
    %3 = vector.load %arg2[%c0_2, %c0_3] : memref<8x128xbf16, #tpu.memory_space<vmem>>, vector<8x128xbf16>
    %cst = arith.constant dense<0.000000e+00> : vector<256x128xf32>
    %4 = tpu.matmul %2, %3, %cst {dimension_numbers = #tpu.dot_dimension_numbers<[0], [0], [1], [1], [0, 1, 1, 1], [], []>} : vector<8x256xbf16>, vector<8x128xbf16>, vector<256x128xf32> -> vector<256x128xf32>
    %c0_4 = arith.constant 0 : index
    %c0_5 = arith.constant 0 : index
    %5 = vector.load %arg3[%c0_4, %c0_5] : memref<1x128xf32, #tpu.memory_space<vmem>>, vector<1x128xf32>
    %6 = vector.broadcast %5 : vector<1x128xf32> to vector<256x128xf32>
    %7 = arith.mulf %4, %6 : vector<256x128xf32>
    %c0_6 = arith.constant 0 : index
    %c0_7 = arith.constant 0 : index
    %8 = vector.load %arg4[%c0_6, %c0_7] : memref<1x128xf32, #tpu.memory_space<vmem>>, vector<1x128xf32>
    %9 = vector.broadcast %8 : vector<1x128xf32> to vector<256x128xf32>
    %10 = arith.addf %7, %9 : vector<256x128xf32>
    %11 = arith.negf %10 : vector<256x128xf32>
    %12 = math.exp %11 : vector<256x128xf32>
    %cst_8 = arith.constant 1.000000e+00 : f32
    %13 = vector.broadcast %cst_8 : f32 to vector<256x128xf32>
    %14 = arith.addf %13, %12 : vector<256x128xf32>
    %15 = arith.divf %13, %14 : vector<256x128xf32>
    %16 = arith.mulf %10, %15 : vector<256x128xf32>
    %cst_9 = arith.constant 0.000000e+00 : f32
    %17 = vector.broadcast %cst_9 : f32 to vector<1x32x128xf32>
    %c0_10 = arith.constant 0 : index
    %c0_11 = arith.constant 0 : index
    %c0_12 = arith.constant 0 : index
    %18 = vector.load %arg10[%c0_10, %c0_11, %c0_12] : memref<18x32x128xf32, #tpu.memory_space<vmem>>, vector<1x32x128xf32>
    tpu.vector_store %arg10[%c0_10, %c0_11, %c0_12], %17 {strides = array<i32>} : memref<18x32x128xf32, #tpu.memory_space<vmem>>, vector<1x32x128xf32>,
    %cst_13 = arith.constant 0.000000e+00 : f32
    %19 = vector.broadcast %cst_13 : f32 to vector<1x32x128xf32>
    %c17 = arith.constant 17 : index
    %c0_14 = arith.constant 0 : index
    %c0_15 = arith.constant 0 : index
    %20 = vector.load %arg10[%c17, %c0_14, %c0_15] : memref<18x32x128xf32, #tpu.memory_space<vmem>>, vector<1x32x128xf32>
    tpu.vector_store %arg10[%c17, %c0_14, %c0_15], %19 {strides = array<i32>} : memref<18x32x128xf32, #tpu.memory_space<vmem>>, vector<1x32x128xf32>,
    %cst_16 = arith.constant 0.000000e+00 : f32
    %21 = vector.broadcast %cst_16 : f32 to vector<16x1x128xf32>
    %c1 = arith.constant 1 : index
    %c7 = arith.constant 7 : index
    %c0_17 = arith.constant 0 : index
    %22 = vector.load %arg10[%c1, %c7, %c0_17] : memref<18x32x128xf32, #tpu.memory_space<vmem>>, vector<16x1x128xf32>
    tpu.vector_store %arg10[%c1, %c7, %c0_17], %21 {strides = array<i32>} : memref<18x32x128xf32, #tpu.memory_space<vmem>>, vector<16x1x128xf32>,
    %cst_18 = arith.constant 0.000000e+00 : f32
    %23 = vector.broadcast %cst_18 : f32 to vector<16x1x128xf32>
    %c1_19 = arith.constant 1 : index
    %c24 = arith.constant 24 : index
    %c0_20 = arith.constant 0 : index
    %24 = vector.load %arg10[%c1_19, %c24, %c0_20] : memref<18x32x128xf32, #tpu.memory_space<vmem>>, vector<16x1x128xf32>
    tpu.vector_store %arg10[%c1_19, %c24, %c0_20], %23 {strides = array<i32>} : memref<18x32x128xf32, #tpu.memory_space<vmem>>, vector<16x1x128xf32>,
    %25 = vector.shape_cast %16 : vector<256x128xf32> to vector<16x16x128xf32>
    %c1_21 = arith.constant 1 : index
    %c8 = arith.constant 8 : index
    %c0_22 = arith.constant 0 : index
    %26 = vector.load %arg10[%c1_21, %c8, %c0_22] : memref<18x32x128xf32, #tpu.memory_space<vmem>>, vector<16x16x128xf32>
    tpu.vector_store %arg10[%c1_21, %c8, %c0_22], %25 {strides = array<i32>} : memref<18x32x128xf32, #tpu.memory_space<vmem>>, vector<16x16x128xf32>,
    %c0_23 = arith.constant 0 : index
    %c0_24 = arith.constant 0 : index
    %27 = vector.load %arg5[%c0_23, %c0_24] : memref<9x128xf32, #tpu.memory_space<vmem>>, vector<9x128xf32>
    %c0_25 = arith.constant 0 : index
    %c0_26 = arith.constant 0 : index
    %28 = vector.load %arg6[%c0_25, %c0_26] : memref<1x128xf32, #tpu.memory_space<vmem>>, vector<1x128xf32>
    %c0_27 = arith.constant 0 : index
    %c0_28 = arith.constant 0 : index
    %29 = vector.load %arg7[%c0_27, %c0_28] : memref<1x128xf32, #tpu.memory_space<vmem>>, vector<1x128xf32>
    %cst_29 = arith.constant 0.000000e+00 : f32
    %30 = vector.broadcast %cst_29 : f32 to vector<1x128xf32>
    %cst_30 = arith.constant 0.000000e+00 : f32
    %31 = vector.broadcast %cst_30 : f32 to vector<8x16x128xf32>
    %c0_31 = arith.constant 0 : index
    %c7_32 = arith.constant 7 : index
    %c0_33 = arith.constant 0 : index
    %32 = vector.load %arg10[%c0_31, %c7_32, %c0_33] : memref<18x32x128xf32, #tpu.memory_space<vmem>>, vector<8x16x128xf32>
    %33 = vector.extract_strided_slice %27 {offsets = [0, 0], sizes = [1, 128], strides = [1, 1]} : vector<9x128xf32> to vector<1x128xf32>
    %34 = vector.shape_cast %33 : vector<1x128xf32> to vector<128xf32>
    %35 = vector.shape_cast %34 : vector<128xf32> to vector<1x1x128xf32>
    %36 = vector.broadcast %35 : vector<1x1x128xf32> to vector<8x16x128xf32>
    %37 = arith.mulf %32, %36 : vector<8x16x128xf32>
    %38 = arith.addf %31, %37 : vector<8x16x128xf32>
    %c0_34 = arith.constant 0 : index
    %c8_35 = arith.constant 8 : index
    %c0_36 = arith.constant 0 : index
    %39 = vector.load %arg10[%c0_34, %c8_35, %c0_36] : memref<18x32x128xf32, #tpu.memory_space<vmem>>, vector<8x16x128xf32>
    %40 = vector.extract_strided_slice %27 {offsets = [1, 0], sizes = [1, 128], strides = [1, 1]} : vector<9x128xf32> to vector<1x128xf32>
    %41 = vector.shape_cast %40 : vector<1x128xf32> to vector<128xf32>
    %42 = vector.shape_cast %41 : vector<128xf32> to vector<1x1x128xf32>
    %43 = vector.broadcast %42 : vector<1x1x128xf32> to vector<8x16x128xf32>
    %44 = arith.mulf %39, %43 : vector<8x16x128xf32>
    %45 = arith.addf %38, %44 : vector<8x16x128xf32>
    %c0_37 = arith.constant 0 : index
    %c9 = arith.constant 9 : index
    %c0_38 = arith.constant 0 : index
    %46 = vector.load %arg10[%c0_37, %c9, %c0_38] : memref<18x32x128xf32, #tpu.memory_space<vmem>>, vector<8x16x128xf32>
    %47 = vector.extract_strided_slice %27 {offsets = [2, 0], sizes = [1, 128], strides = [1, 1]} : vector<9x128xf32> to vector<1x128xf32>
    %48 = vector.shape_cast %47 : vector<1x128xf32> to vector<128xf32>
    %49 = vector.shape_cast %48 : vector<128xf32> to vector<1x1x128xf32>
    %50 = vector.broadcast %49 : vector<1x1x128xf32> to vector<8x16x128xf32>
    %51 = arith.mulf %46, %50 : vector<8x16x128xf32>
    %52 = arith.addf %45, %51 : vector<8x16x128xf32>
    %c1_39 = arith.constant 1 : index
    %c7_40 = arith.constant 7 : index
    %c0_41 = arith.constant 0 : index
    %53 = vector.load %arg10[%c1_39, %c7_40, %c0_41] : memref<18x32x128xf32, #tpu.memory_space<vmem>>, vector<8x16x128xf32>
    %54 = vector.extract_strided_slice %27 {offsets = [3, 0], sizes = [1, 128], strides = [1, 1]} : vector<9x128xf32> to vector<1x128xf32>
    %55 = vector.shape_cast %54 : vector<1x128xf32> to vector<128xf32>
    %56 = vector.shape_cast %55 : vector<128xf32> to vector<1x1x128xf32>
    %57 = vector.broadcast %56 : vector<1x1x128xf32> to vector<8x16x128xf32>
    %58 = arith.mulf %53, %57 : vector<8x16x128xf32>
    %59 = arith.addf %52, %58 : vector<8x16x128xf32>
    %c1_42 = arith.constant 1 : index
    %c8_43 = arith.constant 8 : index
    %c0_44 = arith.constant 0 : index
    %60 = vector.load %arg10[%c1_42, %c8_43, %c0_44] : memref<18x32x128xf32, #tpu.memory_space<vmem>>, vector<8x16x128xf32>
    %61 = vector.extract_strided_slice %27 {offsets = [4, 0], sizes = [1, 128], strides = [1, 1]} : vector<9x128xf32> to vector<1x128xf32>
    %62 = vector.shape_cast %61 : vector<1x128xf32> to vector<128xf32>
    %63 = vector.shape_cast %62 : vector<128xf32> to vector<1x1x128xf32>
    %64 = vector.broadcast %63 : vector<1x1x128xf32> to vector<8x16x128xf32>
    %65 = arith.mulf %60, %64 : vector<8x16x128xf32>
    %66 = arith.addf %59, %65 : vector<8x16x128xf32>
    %c1_45 = arith.constant 1 : index
    %c9_46 = arith.constant 9 : index
    %c0_47 = arith.constant 0 : index
    %67 = vector.load %arg10[%c1_45, %c9_46, %c0_47] : memref<18x32x128xf32, #tpu.memory_space<vmem>>, vector<8x16x128xf32>
    %68 = vector.extract_strided_slice %27 {offsets = [5, 0], sizes = [1, 128], strides = [1, 1]} : vector<9x128xf32> to vector<1x128xf32>
    %69 = vector.shape_cast %68 : vector<1x128xf32> to vector<128xf32>
    %70 = vector.shape_cast %69 : vector<128xf32> to vector<1x1x128xf32>
    %71 = vector.broadcast %70 : vector<1x1x128xf32> to vector<8x16x128xf32>
    %72 = arith.mulf %67, %71 : vector<8x16x128xf32>
    %73 = arith.addf %66, %72 : vector<8x16x128xf32>
    %c2 = arith.constant 2 : index
    %c7_48 = arith.constant 7 : index
    %c0_49 = arith.constant 0 : index
    %74 = vector.load %arg10[%c2, %c7_48, %c0_49] : memref<18x32x128xf32, #tpu.memory_space<vmem>>, vector<8x16x128xf32>
    %75 = vector.extract_strided_slice %27 {offsets = [6, 0], sizes = [1, 128], strides = [1, 1]} : vector<9x128xf32> to vector<1x128xf32>
    %76 = vector.shape_cast %75 : vector<1x128xf32> to vector<128xf32>
    %77 = vector.shape_cast %76 : vector<128xf32> to vector<1x1x128xf32>
    %78 = vector.broadcast %77 : vector<1x1x128xf32> to vector<8x16x128xf32>
    %79 = arith.mulf %74, %78 : vector<8x16x128xf32>
    %80 = arith.addf %73, %79 : vector<8x16x128xf32>
    %c2_50 = arith.constant 2 : index
    %c8_51 = arith.constant 8 : index
    %c0_52 = arith.constant 0 : index
    %81 = vector.load %arg10[%c2_50, %c8_51, %c0_52] : memref<18x32x128xf32, #tpu.memory_space<vmem>>, vector<8x16x128xf32>
    %82 = vector.extract_strided_slice %27 {offsets = [7, 0], sizes = [1, 128], strides = [1, 1]} : vector<9x128xf32> to vector<1x128xf32>
    %83 = vector.shape_cast %82 : vector<1x128xf32> to vector<128xf32>
    %84 = vector.shape_cast %83 : vector<128xf32> to vector<1x1x128xf32>
    %85 = vector.broadcast %84 : vector<1x1x128xf32> to vector<8x16x128xf32>
    %86 = arith.mulf %81, %85 : vector<8x16x128xf32>
    %87 = arith.addf %80, %86 : vector<8x16x128xf32>
    %c2_53 = arith.constant 2 : index
    %c9_54 = arith.constant 9 : index
    %c0_55 = arith.constant 0 : index
    %88 = vector.load %arg10[%c2_53, %c9_54, %c0_55] : memref<18x32x128xf32, #tpu.memory_space<vmem>>, vector<8x16x128xf32>
    %89 = vector.extract_strided_slice %27 {offsets = [8, 0], sizes = [1, 128], strides = [1, 1]} : vector<9x128xf32> to vector<1x128xf32>
    %90 = vector.shape_cast %89 : vector<1x128xf32> to vector<128xf32>
    %91 = vector.shape_cast %90 : vector<128xf32> to vector<1x1x128xf32>
    %92 = vector.broadcast %91 : vector<1x1x128xf32> to vector<8x16x128xf32>
    %93 = arith.mulf %88, %92 : vector<8x16x128xf32>
    %94 = arith.addf %87, %93 : vector<8x16x128xf32>
    %95 = vector.shape_cast %28 : vector<1x128xf32> to vector<1x1x128xf32>
    %96 = vector.broadcast %95 : vector<1x1x128xf32> to vector<8x16x128xf32>
    %97 = arith.mulf %94, %96 : vector<8x16x128xf32>
    %98 = vector.shape_cast %29 : vector<1x128xf32> to vector<1x1x128xf32>
    %99 = vector.broadcast %98 : vector<1x1x128xf32> to vector<8x16x128xf32>
    %100 = arith.addf %97, %99 : vector<8x16x128xf32>
    %101 = arith.negf %100 : vector<8x16x128xf32>
    %102 = math.exp %101 : vector<8x16x128xf32>
    %cst_56 = arith.constant 1.000000e+00 : f32
    %103 = vector.broadcast %cst_56 : f32 to vector<8x16x128xf32>
    %104 = arith.addf %103, %102 : vector<8x16x128xf32>
    %105 = arith.divf %103, %104 : vector<8x16x128xf32>
    %106 = arith.mulf %100, %105 : vector<8x16x128xf32>
    %107 = vector.shape_cast %106 : vector<8x16x128xf32> to vector<128x128xf32>
    %108 = arith.truncf %107 : vector<128x128xf32> to vector<128x128xbf16>
    %c0_57 = arith.constant 0 : index
    %c0_58 = arith.constant 0 : index
    %c0_59 = arith.constant 0 : index
    %109 = vector.load %arg8[%c0_57, %c0_58, %c0_59] : memref<1x256x128xbf16, #tpu.memory_space<vmem>>, vector<1x128x128xbf16>
    %110 = vector.shape_cast %109 : vector<1x128x128xbf16> to vector<128x128xbf16>
    %111 = vector.shape_cast %108 : vector<128x128xbf16> to vector<1x128x128xbf16>
    tpu.vector_store %arg8[%c0_57, %c0_58, %c0_59], %111 {strides = array<i32>} : memref<1x256x128xbf16, #tpu.memory_space<vmem>>, vector<1x128x128xbf16>,
    %cst_60 = arith.constant dense<0.000000e+00> : vector<128xf32>
    %112 = vector.multi_reduction <add>, %107, %cst_60 [0] : vector<128x128xf32> to vector<128xf32>
    %113 = vector.shape_cast %112 : vector<128xf32> to vector<1x128xf32>
    %114 = arith.addf %30, %113 : vector<1x128xf32>
    %cst_61 = arith.constant 0.000000e+00 : f32
    %115 = vector.broadcast %cst_61 : f32 to vector<8x16x128xf32>
    %c8_62 = arith.constant 8 : index
    %c7_63 = arith.constant 7 : index
    %c0_64 = arith.constant 0 : index
    %116 = vector.load %arg10[%c8_62, %c7_63, %c0_64] : memref<18x32x128xf32, #tpu.memory_space<vmem>>, vector<8x16x128xf32>
    %117 = vector.extract_strided_slice %27 {offsets = [0, 0], sizes = [1, 128], strides = [1, 1]} : vector<9x128xf32> to vector<1x128xf32>
    %118 = vector.shape_cast %117 : vector<1x128xf32> to vector<128xf32>
    %119 = vector.shape_cast %118 : vector<128xf32> to vector<1x1x128xf32>
    %120 = vector.broadcast %119 : vector<1x1x128xf32> to vector<8x16x128xf32>
    %121 = arith.mulf %116, %120 : vector<8x16x128xf32>
    %122 = arith.addf %115, %121 : vector<8x16x128xf32>
    %c8_65 = arith.constant 8 : index
    %c8_66 = arith.constant 8 : index
    %c0_67 = arith.constant 0 : index
    %123 = vector.load %arg10[%c8_65, %c8_66, %c0_67] : memref<18x32x128xf32, #tpu.memory_space<vmem>>, vector<8x16x128xf32>
    %124 = vector.extract_strided_slice %27 {offsets = [1, 0], sizes = [1, 128], strides = [1, 1]} : vector<9x128xf32> to vector<1x128xf32>
    %125 = vector.shape_cast %124 : vector<1x128xf32> to vector<128xf32>
    %126 = vector.shape_cast %125 : vector<128xf32> to vector<1x1x128xf32>
    %127 = vector.broadcast %126 : vector<1x1x128xf32> to vector<8x16x128xf32>
    %128 = arith.mulf %123, %127 : vector<8x16x128xf32>
    %129 = arith.addf %122, %128 : vector<8x16x128xf32>
    %c8_68 = arith.constant 8 : index
    %c9_69 = arith.constant 9 : index
    %c0_70 = arith.constant 0 : index
    %130 = vector.load %arg10[%c8_68, %c9_69, %c0_70] : memref<18x32x128xf32, #tpu.memory_space<vmem>>, vector<8x16x128xf32>
    %131 = vector.extract_strided_slice %27 {offsets = [2, 0], sizes = [1, 128], strides = [1, 1]} : vector<9x128xf32> to vector<1x128xf32>
    %132 = vector.shape_cast %131 : vector<1x128xf32> to vector<128xf32>
    %133 = vector.shape_cast %132 : vector<128xf32> to vector<1x1x128xf32>
    %134 = vector.broadcast %133 : vector<1x1x128xf32> to vector<8x16x128xf32>
    %135 = arith.mulf %130, %134 : vector<8x16x128xf32>
    %136 = arith.addf %129, %135 : vector<8x16x128xf32>
    %c9_71 = arith.constant 9 : index
    %c7_72 = arith.constant 7 : index
    %c0_73 = arith.constant 0 : index
    %137 = vector.load %arg10[%c9_71, %c7_72, %c0_73] : memref<18x32x128xf32, #tpu.memory_space<vmem>>, vector<8x16x128xf32>
    %138 = vector.extract_strided_slice %27 {offsets = [3, 0], sizes = [1, 128], strides = [1, 1]} : vector<9x128xf32> to vector<1x128xf32>
    %139 = vector.shape_cast %138 : vector<1x128xf32> to vector<128xf32>
    %140 = vector.shape_cast %139 : vector<128xf32> to vector<1x1x128xf32>
    %141 = vector.broadcast %140 : vector<1x1x128xf32> to vector<8x16x128xf32>
    %142 = arith.mulf %137, %141 : vector<8x16x128xf32>
    %143 = arith.addf %136, %142 : vector<8x16x128xf32>
    %c9_74 = arith.constant 9 : index
    %c8_75 = arith.constant 8 : index
    %c0_76 = arith.constant 0 : index
    %144 = vector.load %arg10[%c9_74, %c8_75, %c0_76] : memref<18x32x128xf32, #tpu.memory_space<vmem>>, vector<8x16x128xf32>
    %145 = vector.extract_strided_slice %27 {offsets = [4, 0], sizes = [1, 128], strides = [1, 1]} : vector<9x128xf32> to vector<1x128xf32>
    %146 = vector.shape_cast %145 : vector<1x128xf32> to vector<128xf32>
    %147 = vector.shape_cast %146 : vector<128xf32> to vector<1x1x128xf32>
    %148 = vector.broadcast %147 : vector<1x1x128xf32> to vector<8x16x128xf32>
    %149 = arith.mulf %144, %148 : vector<8x16x128xf32>
    %150 = arith.addf %143, %149 : vector<8x16x128xf32>
    %c9_77 = arith.constant 9 : index
    %c9_78 = arith.constant 9 : index
    %c0_79 = arith.constant 0 : index
    %151 = vector.load %arg10[%c9_77, %c9_78, %c0_79] : memref<18x32x128xf32, #tpu.memory_space<vmem>>, vector<8x16x128xf32>
    %152 = vector.extract_strided_slice %27 {offsets = [5, 0], sizes = [1, 128], strides = [1, 1]} : vector<9x128xf32> to vector<1x128xf32>
    %153 = vector.shape_cast %152 : vector<1x128xf32> to vector<128xf32>
    %154 = vector.shape_cast %153 : vector<128xf32> to vector<1x1x128xf32>
    %155 = vector.broadcast %154 : vector<1x1x128xf32> to vector<8x16x128xf32>
    %156 = arith.mulf %151, %155 : vector<8x16x128xf32>
    %157 = arith.addf %150, %156 : vector<8x16x128xf32>
    %c10 = arith.constant 10 : index
    %c7_80 = arith.constant 7 : index
    %c0_81 = arith.constant 0 : index
    %158 = vector.load %arg10[%c10, %c7_80, %c0_81] : memref<18x32x128xf32, #tpu.memory_space<vmem>>, vector<8x16x128xf32>
    %159 = vector.extract_strided_slice %27 {offsets = [6, 0], sizes = [1, 128], strides = [1, 1]} : vector<9x128xf32> to vector<1x128xf32>
    %160 = vector.shape_cast %159 : vector<1x128xf32> to vector<128xf32>
    %161 = vector.shape_cast %160 : vector<128xf32> to vector<1x1x128xf32>
    %162 = vector.broadcast %161 : vector<1x1x128xf32> to vector<8x16x128xf32>
    %163 = arith.mulf %158, %162 : vector<8x16x128xf32>
    %164 = arith.addf %157, %163 : vector<8x16x128xf32>
    %c10_82 = arith.constant 10 : index
    %c8_83 = arith.constant 8 : index
    %c0_84 = arith.constant 0 : index
    %165 = vector.load %arg10[%c10_82, %c8_83, %c0_84] : memref<18x32x128xf32, #tpu.memory_space<vmem>>, vector<8x16x128xf32>
    %166 = vector.extract_strided_slice %27 {offsets = [7, 0], sizes = [1, 128], strides = [1, 1]} : vector<9x128xf32> to vector<1x128xf32>
    %167 = vector.shape_cast %166 : vector<1x128xf32> to vector<128xf32>
    %168 = vector.shape_cast %167 : vector<128xf32> to vector<1x1x128xf32>
    %169 = vector.broadcast %168 : vector<1x1x128xf32> to vector<8x16x128xf32>
    %170 = arith.mulf %165, %169 : vector<8x16x128xf32>
    %171 = arith.addf %164, %170 : vector<8x16x128xf32>
    %c10_85 = arith.constant 10 : index
    %c9_86 = arith.constant 9 : index
    %c0_87 = arith.constant 0 : index
    %172 = vector.load %arg10[%c10_85, %c9_86, %c0_87] : memref<18x32x128xf32, #tpu.memory_space<vmem>>, vector<8x16x128xf32>
    %173 = vector.extract_strided_slice %27 {offsets = [8, 0], sizes = [1, 128], strides = [1, 1]} : vector<9x128xf32> to vector<1x128xf32>
    %174 = vector.shape_cast %173 : vector<1x128xf32> to vector<128xf32>
    %175 = vector.shape_cast %174 : vector<128xf32> to vector<1x1x128xf32>
    %176 = vector.broadcast %175 : vector<1x1x128xf32> to vector<8x16x128xf32>
    %177 = arith.mulf %172, %176 : vector<8x16x128xf32>
    %178 = arith.addf %171, %177 : vector<8x16x128xf32>
    %179 = vector.shape_cast %28 : vector<1x128xf32> to vector<1x1x128xf32>
    %180 = vector.broadcast %179 : vector<1x1x128xf32> to vector<8x16x128xf32>
    %181 = arith.mulf %178, %180 : vector<8x16x128xf32>
    %182 = vector.shape_cast %29 : vector<1x128xf32> to vector<1x1x128xf32>
    %183 = vector.broadcast %182 : vector<1x1x128xf32> to vector<8x16x128xf32>
    %184 = arith.addf %181, %183 : vector<8x16x128xf32>
    %185 = arith.negf %184 : vector<8x16x128xf32>
    %186 = math.exp %185 : vector<8x16x128xf32>
    %cst_88 = arith.constant 1.000000e+00 : f32
    %187 = vector.broadcast %cst_88 : f32 to vector<8x16x128xf32>
    %188 = arith.addf %187, %186 : vector<8x16x128xf32>
    %189 = arith.divf %187, %188 : vector<8x16x128xf32>
    %190 = arith.mulf %184, %189 : vector<8x16x128xf32>
    %191 = vector.shape_cast %190 : vector<8x16x128xf32> to vector<128x128xf32>
    %192 = arith.truncf %191 : vector<128x128xf32> to vector<128x128xbf16>
    %c0_89 = arith.constant 0 : index
    %c128 = arith.constant 128 : index
    %c0_90 = arith.constant 0 : index
    %193 = vector.load %arg8[%c0_89, %c128, %c0_90] : memref<1x256x128xbf16, #tpu.memory_space<vmem>>, vector<1x128x128xbf16>
    %194 = vector.shape_cast %193 : vector<1x128x128xbf16> to vector<128x128xbf16>
    %195 = vector.shape_cast %192 : vector<128x128xbf16> to vector<1x128x128xbf16>
    tpu.vector_store %arg8[%c0_89, %c128, %c0_90], %195 {strides = array<i32>} : memref<1x256x128xbf16, #tpu.memory_space<vmem>>, vector<1x128x128xbf16>,
    %cst_91 = arith.constant dense<0.000000e+00> : vector<128xf32>
    %196 = vector.multi_reduction <add>, %191, %cst_91 [0] : vector<128x128xf32> to vector<128xf32>
    %197 = vector.shape_cast %196 : vector<128xf32> to vector<1x128xf32>
    %198 = arith.addf %114, %197 : vector<1x128xf32>
    %c0_92 = arith.constant 0 : index
    %c0_93 = arith.constant 0 : index
    %c0_94 = arith.constant 0 : index
    %199 = vector.load %arg9[%c0_92, %c0_93, %c0_94] : memref<1x1x128xf32, #tpu.memory_space<vmem>>, vector<1x1x128xf32>
    %200 = vector.shape_cast %199 : vector<1x1x128xf32> to vector<1x128xf32>
    %201 = vector.shape_cast %198 : vector<1x128xf32> to vector<1x1x128xf32>
    tpu.vector_store %arg9[%c0_92, %c0_93, %c0_94], %201 {strides = array<i32>} : memref<1x1x128xf32, #tpu.memory_space<vmem>>, vector<1x1x128xf32>,
    return
  }
  func.func @transform_0(%arg0: i32) -> (i32, i32, i32) {
    %c0_i32 = arith.constant 0 : i32
    %c0_i32_0 = arith.constant 0 : i32
    %c0_i32_1 = arith.constant 0 : i32
    return %arg0, %c0_i32, %c0_i32_0 : i32, i32, i32
  }
  func.func @transform_1(%arg0: i32) -> (i32, i32) {
    %c0_i32 = arith.constant 0 : i32
    %c0_i32_0 = arith.constant 0 : i32
    %c0_i32_1 = arith.constant 0 : i32
    return %c0_i32, %c0_i32_0 : i32, i32
  }
  func.func @transform_2(%arg0: i32) -> (i32, i32) {
    %c0_i32 = arith.constant 0 : i32
    %c0_i32_0 = arith.constant 0 : i32
    %c0_i32_1 = arith.constant 0 : i32
    return %c0_i32, %c0_i32_0 : i32, i32
  }
  func.func @transform_3(%arg0: i32) -> (i32, i32) {
    %c0_i32 = arith.constant 0 : i32
    %c0_i32_0 = arith.constant 0 : i32
    %c0_i32_1 = arith.constant 0 : i32
    return %c0_i32, %c0_i32_0 : i32, i32
  }
  func.func @transform_4(%arg0: i32) -> (i32, i32) {
    %c0_i32 = arith.constant 0 : i32
    %c0_i32_0 = arith.constant 0 : i32
    %c0_i32_1 = arith.constant 0 : i32
    return %c0_i32, %c0_i32_0 : i32, i32
  }
  func.func @transform_5(%arg0: i32) -> (i32, i32) {
    %c0_i32 = arith.constant 0 : i32
    %c0_i32_0 = arith.constant 0 : i32
    %c0_i32_1 = arith.constant 0 : i32
    return %c0_i32, %c0_i32_0 : i32, i32
  }
  func.func @transform_6(%arg0: i32) -> (i32, i32) {
    %c0_i32 = arith.constant 0 : i32
    %c0_i32_0 = arith.constant 0 : i32
    %c0_i32_1 = arith.constant 0 : i32
    return %c0_i32, %c0_i32_0 : i32, i32
  }
  func.func @transform_7(%arg0: i32) -> (i32, i32, i32) {
    %c0_i32 = arith.constant 0 : i32
    %c0_i32_0 = arith.constant 0 : i32
    %c0_i32_1 = arith.constant 0 : i32
    return %arg0, %c0_i32, %c0_i32_0 : i32, i32, i32
  }
  func.func @transform_8(%arg0: i32) -> (i32, i32, i32) {
    %c0_i32 = arith.constant 0 : i32
    %c0_i32_0 = arith.constant 0 : i32
    %c0_i32_1 = arith.constant 0 : i32
    return %arg0, %c0_i32, %c0_i32_0 : i32, i32, i32
  }
}

</mosaic_0001>

<bundles_post_ra>
// kernel: tpu_custom_call.1
= control target key start
LH: loop header
LB: loop body
LE: loop exit
PB: predicated region body
PF: predicated region fallthrough
CT: control target
= control target key end

     0   :  { %14 = vsyncpa [#allocation4], 0  ;;  %s5060_s0 = inlined_call_operand.hbm [shape: f32[2,8,256], index: 0, kind: input, shape index: {}]   ;;  %s5061_s1 = inlined_call_operand.hbm [shape: bf16[8,128], index: 1, kind: input, shape index: {}]   ;;  %s5062_s2 = inlined_call_operand.vmem [shape: f32[1,128], index: 2, kind: input, shape index: {}]   ;;  %s5063_s3 = inlined_call_operand.vmem [shape: f32[1,128], index: 3, kind: input, shape index: {}]   ;;  %s5064_s4 = inlined_call_operand.hbm [shape: f32[9,128], index: 4, kind: input, shape index: {}]   ;;  %s5065_s5 = inlined_call_operand.vmem [shape: f32[1,128], index: 5, kind: input, shape index: {}]   ;;  %s5066_s6 = inlined_call_operand.vmem [shape: f32[1,128], index: 6, kind: input, shape index: {}]   ;;  %s5067_s7 = inlined_call_operand.hbm [shape: bf16[2,256,128], index: 7, kind: output, shape index: {0}]   ;;  %s5068_s8 = inlined_call_operand.hbm [shape: f32[2,1,128], index: 8, kind: output, shape index: {1}]  }
   0x1   :  { %16 = vsyncpa [#allocation4 + $0x1], 0 }
   0x2   :  { %17 = vsyncpa [#allocation7], 0 }
   0x3   :  { %18 = vsyncpa [#allocation5], 0 }
   0x4   :  { %20 = vsyncpa [#allocation5 + $0x1], 0 }
   0x5   :  { %21 = vsyncpa [#allocation11], 0 }
   0x6   :  { %23 = vsyncpa [#allocation11 + $0x1], 0  ;;  %s3456_s27 = smov 0   ;;  %s3458_s28 = smov 0  }
   0x7   :  { %s3460_s29 = smov 0   ;;  %s3462_s30 = smov 0  }
   0x8 LB: > { %s3477_s9 = sadd.s32 4294967295, %s3399_s30   ;;  %s2551_s10 = sadd.s32 4294967294, %s3399_s30   ;;  %s3399_s30 = sphi %s3462_s30, %s5225_s30   ;;  %s3395_s29 = sphi %s3460_s29, %s5224_s29   ;;  %s3391_s28 = sphi %s3458_s28, %s5223_s28   ;;  %s3387_s27 = sphi %s3456_s27, %s5222_s27  }
   0x9   : > { %p49_p0 = scmp.ne.s32.totalorder %s3391_s28, %s3387_s27  ;;  %p5069_p1 = scmp.eq.s32.totalorder %s3477_s9, 0 }
   0xa   : > { %p205_p3 = scmp.eq.s32.totalorder %s2551_s10, 1  ;;  %p2552_p5 = scmp.ge.s32.totalorder %s3399_s30, 1 }
   0xb   : > { %p3486_p4 = por %p5069_p1, %p49_p0  ;;  %p238_p7 = scmp.lt.s32.totalorder %s3399_s30, 3 }
   0xc   : > { %p3491_p6 = por %p205_p3, %p49_p0  ;;  %s3401_s14 = smov [#allocation6]  }
   0xd   : > { %s5105_s11 = scalar_select %p3486_p4, 1, 0 }
   0xe   : > { %s5106_s12 = scalar_select %p3491_p6, 1, 0 }
   0xf   : > { %p3496_p8 = pnand %p2552_p5, %p238_p7  ;;  %s251_s15 = sshll.u32 %s3401_s14, 4  ;;  %s252_s15 = int_to_ptr.vmem [resolvable:$true] %s251_s15 }
  0x10   : > { %s3402_s16 = smov [#allocation8]   ;;  %s3211_s21 = scalar_lea.hbm %s5061_s1, 64 }
  0x11   : > { %s5107_s13 = scalar_select %p3496_p8, 1, 0 }
  0x12   : > { %p2885_p10 = pneg %p3496_p8  ;;  %s267_s17 = sshll.u32 %s3402_s16, 4  ;;  %s3509_s17 = int_to_ptr.vmem [resolvable:$true] %s267_s17 }
  0x13   : > { %p3212_p12 = scmp.ne.s32.totalorder %s5061_s1, %s3211_s21  ;;  %p3218_p5 = scmp.lt.u32.totalorder %s3211_s21, %s5061_s1 }
  0x14   : > { %p3505_p11 = pnand %p2885_p10, %p5069_p1 }
  0x16   : > { %p3213_p13 = pneg %p3505_p11 }
  0x18   : > { %p3214_p0 = pnand %p3213_p13, %p3212_p12 }
  0x1a   : > { %p3215_p3 = pneg %p3214_p0 }
  0x1c   : > { %p3220_p7 = pnand %p3218_p5, %p3215_p3 }
  0x1e   : > { %3223 = shalt.err (!%p3220_p7)
}
  0x1f   : > { %s3224_s26 = scalar_lea.vmem %s252_s15, 64  ;;  %p3232_p2 = scmp.lt.s32.totalorder %s252_s15, %s252_s15 }
  0x20   : > { %p3225_p10 = scmp.ne.s32.totalorder %s252_s15, %s3224_s26  ;;  %p3233_p6 = scmp.lt.s32.totalorder %s3224_s26, %s3224_s26 }
  0x22   : > { %p3227_p9 = pnand %p3225_p10, %p3213_p13  ;;  %p3234_p4 = por %p3233_p6, %p3232_p2 }
  0x24   : > { %p3228_p1 = pneg %p3227_p9 }
  0x26   : > { %p3235_p8 = pnand %p3234_p4, %p3228_p1 }
  0x28   : > { %3238 = shalt.err (!%p3235_p8)
}
  0x29   : > { %2888 = dma.hbm_to_vmem [thread:$0]  (!%p3505_p11), %s5061_s1, 64, %s252_s15, [#allocation7]  }
  0x2a   : > { %s3239_s20 = scalar_lea.hbm %s5064_s4, 256 }
  0x2b   : > { %p3240_p9 = scmp.ne.s32.totalorder %s5064_s4, %s3239_s20  ;;  %p3246_p4 = scmp.lt.u32.totalorder %s3239_s20, %s5064_s4 }
  0x2d   : > { %p3242_p2 = pnand %p3240_p9, %p3213_p13 }
  0x2f   : > { %p3243_p1 = pneg %p3242_p2 }
  0x31   : > { %p3248_p6 = pnand %p3246_p4, %p3243_p1 }
  0x33   : > { %3251 = shalt.err (!%p3248_p6)
}
  0x34   : > { %s3252_s15 = scalar_lea.vmem %s3509_s17, 256  ;;  %p3260_p3 = scmp.lt.s32.totalorder %s3509_s17, %s3509_s17 }
  0x35   : > { %p3253_p8 = scmp.ne.s32.totalorder %s3509_s17, %s3252_s15  ;;  %p3261_p5 = scmp.lt.s32.totalorder %s3252_s15, %s3252_s15 }
  0x37   : > { %p3255_p12 = pnand %p3253_p8, %p3213_p13  ;;  %p3262_p7 = por %p3261_p5, %p3260_p3 }
  0x39   : > { %p3256_p0 = pneg %p3255_p12 }
  0x3b   : > { %p3263_p10 = pnand %p3262_p7, %p3256_p0 }
  0x3d   : > { %3266 = shalt.err (!%p3263_p10)
}
  0x3e   : > { %s3403_s25 = smov 128   ;;  %s3404_s26 = smov 8  }
  0x3f   : > { %2891 = dma.hbm_to_vmem [thread:$0]  (!%p3505_p11), %s5064_s4, 256, %s3509_s17, [#allocation7], %s3403_s25, %s3403_s25, %s3404_s26  }
  0x40   : > { %s3559_s16 = sadd.s32 1, %s3399_s30   ;;  %s36_s19 = sadd.s32 1, %s3395_s29 }
  0x41   : > { %s33_s20 = ssub.s32 %s3399_s30, %s3559_s16  ;;  %p43_p13 = scmp.ne.s32.totalorder %s3395_s29, %s3391_s28 }
  0x42   : > { %p34_p9 = scmp.eq.s32.totalorder %s33_s20, 0  ;;  %p44_p2 = scmp.eq.s32.totalorder %s3399_s30, 0 }
  0x43   : > { %p5109_p1 = scmp.eq.s32.totalorder %s3477_s9, 1  ;;  %p2905_p6 = scmp.lt.s32.totalorder %s3399_s30, 2 }
  0x44   : > { %s3575_s22 = scalar_select %p34_p9, %s3395_s29, %s36_s19  }
  0x45   : > { %p3569_p4 = por %p5109_p1, %p43_p13  ;;  %p45_p8 = por %p44_p2, %p43_p13 }
  0x46   : > { %s287_s18 = sand.u32 1, %s3395_s29   ;;  %s2687_s17 = sshll.u32 %s3399_s30, 8 }
  0x47   : > { %s2556_s23 = sshll.u32 %s287_s18, 4  ;;  %s3582_s25 = scalar_lea.hbm %s5060_s0, %s2687_s17 }
  0x48   : > { %s291_s26 = scalar_lea.vmem [#allocation3], %s2556_s23  ;;  %p3586_p11 = pnand %p2905_p6, %p45_p8 }
  0x49   : > { %s299_s10 = sshll.u32 %s291_s26, 4  ;;  %s288_s19 = scalar_lea.sflag [#allocation4], %s287_s18  ;;  %s3584_s10 = int_to_ptr.vmem [resolvable:$true] %s299_s10 }
  0x4a   : > { %s3267_s20 = scalar_lea.hbm %s3582_s25, 256  ;;  %p3269_p0 = pneg %p3586_p11 }
  0x4b   : > { %p3268_p12 = scmp.ne.s32.totalorder %s3582_s25, %s3267_s20  ;;  %s3272_s24 = scalar_lea.hbm %s5060_s0, 512 }
  0x4c   : > { %p3273_p7 = scmp.lt.u32.totalorder %s3582_s25, %s5060_s0  ;;  %p3274_p10 = scmp.lt.u32.totalorder %s3272_s24, %s3267_s20 }
  0x4d   : > { %p3270_p3 = pnand %p3269_p0, %p3268_p12  ;;  %p3276_p9 = scmp.lt.u32.totalorder %s3267_s20, %s3582_s25 }
  0x4e   : > { %p3275_p13 = por %p3274_p10, %p3273_p7 }
  0x4f   : > { %p3271_p5 = pneg %p3270_p3 }
  0x50   : > { %p3277_p2 = por %p3276_p9, %p3275_p13 }
  0x52   : > { %p3278_p1 = pnand %p3277_p2, %p3271_p5 }
  0x54   : > { %3281 = shalt.err (!%p3278_p1)
}
  0x55   : > { %s3282_s18 = scalar_lea.vmem %s3584_s10, 256  ;;  %s3405_s17 = smov [#allocation3]  }
  0x56   : > { %p3283_p6 = scmp.ne.s32.totalorder %s3584_s10, %s3282_s18  ;;  %s3287_s23 = sshll.u32 %s3405_s17, 4  ;;  %s3288_s23 = int_to_ptr.vmem [resolvable:$false] %s3287_s23 }
  0x57   : > { %s3289_s15 = scalar_lea.vmem %s3288_s23, 512  ;;  %p3290_p3 = scmp.lt.s32.totalorder %s3584_s10, %s3288_s23 }
  0x58   : > { %p3285_p8 = pnand %p3283_p6, %p3269_p0  ;;  %p3291_p7 = scmp.lt.s32.totalorder %s3289_s15, %s3282_s18 }
  0x5a   : > { %p3286_p12 = pneg %p3285_p8  ;;  %p3292_p10 = por %p3291_p7, %p3290_p3 }
  0x5c   : > { %p3293_p13 = pnand %p3292_p10, %p3286_p12 }
  0x5e   : > { %3296 = shalt.err (!%p3293_p13)
}
  0x5f   : > { %2895 = dma.hbm_to_vmem [thread:$0]  (!%p3586_p11), %s3582_s25, 256, %s3584_s10, %s288_s19  }
  0x60   : > { %p5112_p5 = scmp.ne.s32.totalorder %s5107_s13, 0 }
  0x62   : > { %308 = sbr.rel (%p5112_p5) target bundleno = 785 (0x311), region = 48 }
  0x69   : > { %s3618_s20 = sand.u32 1, %s3391_s28   ;;  %p5113_p0 = scmp.ne.s32.totalorder %s5105_s11, 0 }
  0x6a   : > { %s2560_s24 = sshll.u32 %s3618_s20, 4  ;;  %s311_s26 = scalar_lea.sflag [#allocation4], %s3618_s20 }
  0x6b   : > { %s314_s18 = scalar_lea.vmem [#allocation3], %s2560_s24 }
  0x6c   : > { %3370 = dma.done.wait (%p5113_p0), %s311_s26, 256  }
  0x6d   : > { %3372 = vsyncadd (%p5113_p0), %s311_s26, 4294967040  ;;  %p5114_p9 = scmp.eq.s32.totalorder %s3477_s9, 0 }
  0x6f   : > { %3374 = dma.done.wait (%p5114_p9), [#allocation7], 320   ;;  %p5115_p11 = pmov %p5114_p9 }
  0x70   : > { %vm446_vm0 = vcmask 1043456   ;;  %v360_v0 = vld [vmem:[%s314_s18] sm:$0xff]  ;;  %v361_v4 = vld [vmem:[%s314_s18 + $0x8] sm:$0xff]  ;;  %vm397_vm1 = vcmask 64512   ;;  %v3406_v22 = vmov 0.0   ;;  %v1007_v42 = vlaneseq  ;;  %s2563_s15 = sshll.u32 %s3618_s20, 7 }
  0x71   : > { %3376 = vsyncadd (%p5115_p11), [#allocation7], 4294966976  ;;  %v364_v1 = vld [vmem:[#allocation6] sm:$0xf]  ;;  %v362_v2 = vpack.c.bf16 %v360_v0, %v360_v0  ;;  %v363_v5 = vpack.c.bf16 %v361_v4, %v361_v4  ;;  %924 = vst [vmem:[#allocation2 + $0x47] sm:$0x1] %v3406_v22 }
  0x72   : > { %2869 = vmatprep.subr.msk.bf16.mxu0 %vm446_vm0, %v364_v1  ;;  %v448_v3 = vsel %vm446_vm0, %v364_v1, 0  ;;  %2870 = vmatprep.subr.msk.bf16.mxu1 %vm446_vm0, %v364_v1  ;;  %913 = vst [vmem:[#allocation2] sm:$0xff] %v3406_v22  ;;  %914 = vst [vmem:[#allocation2 + $0x8] sm:$0xff] %v3406_v22  ;;  %v3649_v23 = vld [vmem:[%s5062_s2] ss:$0 sm:$0xff]  ;;  %v3686_v52 = vshrl.u32 %v1007_v42, 7 }
  0x73   : > { %2834 = vmatpush3.bf16.msra.mxu0 %v448_v3  ;;  %2868 = vmatpush3.bf16.msra.mxu1 %v448_v3  ;;  %915 = vst [vmem:[#allocation2 + $0x10] sm:$0xff] %v3406_v22  ;;  %916 = vst [vmem:[#allocation2 + $0x18] sm:$0xff] %v3406_v22  ;;  %v3654_v25 = vld [vmem:[%s5063_s3] ss:$0 sm:$0xff]  ;;  %s4089_s24 = scalar_lea.vmem [#allocation9], %s2563_s15  ;;  %s2720_s17 = sshll.u32 %s3477_s9, 11 }
  0x74   : > { %365 = vxpose.xlu0.c.b16.start.end [1/1] (short) %v362_v2, 128  ;;  %918 = vst [vmem:[#allocation2 + $0x220] sm:$0xff] %v3406_v22  ;;  %919 = vst [vmem:[#allocation2 + $0x228] sm:$0xff] %v3406_v22  ;;  %v1061_v61 = vsub.s32 1, %v3686_v52  ;;  %v1009_v2 = vsub.s32 0, %v3686_v52  ;;  %s2418_s23 = sshll.u32 %s4089_s24, 4  ;;  %s4980_s18 = scalar_lea.hbm %s5067_s7, %s2720_s17  ;;  %s4982_s23 = int_to_ptr.vmem [resolvable:$true] %s2418_s23 }
  0x75   : > { %920 = vst [vmem:[#allocation2 + $0x230] sm:$0xff] %v3406_v22  ;;  %921 = vst [vmem:[#allocation2 + $0x238] sm:$0xff] %v3406_v22  ;;  %s2401_s11 = scalar_lea.sflag [#allocation5], %s3618_s20  ;;  %s3297_s13 = scalar_lea.vmem %s4982_s23, 2048 }
  0x76   : > { %923 = vst [vmem:[#allocation2 + $0x27] sm:$0x1] %v3406_v22  ;;  %925 = vst [vmem:[#allocation2 + $0x67] sm:$0x1] %v3406_v22  ;;  %p3298_p2 = scmp.ne.s32.totalorder %s4982_s23, %s3297_s13  ;;  %s3407_s25 = smov [#allocation9]  }
  0x77   : > { %926 = vst [vmem:[#allocation2 + $0x87] sm:$0x1] %v3406_v22  ;;  %927 = vst [vmem:[#allocation2 + $0xa7] sm:$0x1] %v3406_v22  ;;  %s3301_s10 = sshll.u32 %s3407_s25, 4  ;;  %s3302_s10 = int_to_ptr.vmem [resolvable:$false] %s3301_s10 }
  0x78   : > { %928 = vst [vmem:[#allocation2 + $0xc7] sm:$0x1] %v3406_v22  ;;  %929 = vst [vmem:[#allocation2 + $0xe7] sm:$0x1] %v3406_v22  ;;  %p3299_p1 = pnand %p3298_p2, %p3569_p4  ;;  %s3303_s14 = scalar_lea.vmem %s3302_s10, 4096 }
  0x79   : > { %930 = vst [vmem:[#allocation2 + $0x107] sm:$0x1] %v3406_v22  ;;  %931 = vst [vmem:[#allocation2 + $0x127] sm:$0x1] %v3406_v22  ;;  %p3304_p8 = scmp.lt.s32.totalorder %s4982_s23, %s3302_s10  ;;  %p3305_p12 = scmp.lt.s32.totalorder %s3303_s14, %s3297_s13 }
  0x7a   : > { %932 = vst [vmem:[#allocation2 + $0x147] sm:$0x1] %v3406_v22  ;;  %933 = vst [vmem:[#allocation2 + $0x167] sm:$0x1] %v3406_v22  ;;  %p3300_p6 = pneg %p3299_p1 }
  0x7b   : > { %934 = vst [vmem:[#allocation2 + $0x187] sm:$0x1] %v3406_v22  ;;  %935 = vst [vmem:[#allocation2 + $0x1a7] sm:$0x1] %v3406_v22  ;;  %p3306_p3 = por %p3305_p12, %p3304_p8 }
  0x7c   : > { %936 = vst [vmem:[#allocation2 + $0x1c7] sm:$0x1] %v3406_v22  ;;  %937 = vst [vmem:[#allocation2 + $0x1e7] sm:$0x1] %v3406_v22 }
  0x7d   : > { %938 = vst [vmem:[#allocation2 + $0x207] sm:$0x1] %v3406_v22  ;;  %939 = vst [vmem:[#allocation2 + $0x38] sm:$0x1] %v3406_v22  ;;  %p3307_p7 = pnand %p3306_p3, %p3300_p6 }
  0x7e   : > { %940 = vst [vmem:[#allocation2 + $0x58] sm:$0x1] %v3406_v22  ;;  %941 = vst [vmem:[#allocation2 + $0x78] sm:$0x1] %v3406_v22 }
  0x7f   : > { %942 = vst [vmem:[#allocation2 + $0x98] sm:$0x1] %v3406_v22  ;;  %943 = vst [vmem:[#allocation2 + $0xb8] sm:$0x1] %v3406_v22 }
  0x80   : > { %944 = vst [vmem:[#allocation2 + $0xd8] sm:$0x1] %v3406_v22  ;;  %945 = vst [vmem:[#allocation2 + $0xf8] sm:$0x1] %v3406_v22 }
  0x81   : > { %946 = vst [vmem:[#allocation2 + $0x118] sm:$0x1] %v3406_v22  ;;  %947 = vst [vmem:[#allocation2 + $0x138] sm:$0x1] %v3406_v22 }
  0x82   : > { %948 = vst [vmem:[#allocation2 + $0x158] sm:$0x1] %v3406_v22  ;;  %949 = vst [vmem:[#allocation2 + $0x178] sm:$0x1] %v3406_v22 }
  0x83   : > { %950 = vst [vmem:[#allocation2 + $0x198] sm:$0x1] %v3406_v22  ;;  %951 = vst [vmem:[#allocation2 + $0x1b8] sm:$0x1] %v3406_v22 }
  0x84   : > { %952 = vst [vmem:[#allocation2 + $0x1d8] sm:$0x1] %v3406_v22  ;;  %953 = vst [vmem:[#allocation2 + $0x1f8] sm:$0x1] %v3406_v22 }
  0x85   : > { %954 = vst [vmem:[#allocation2 + $0x218] sm:$0x1] %v3406_v22  ;;  %5116 = vst [vmem:[#allocation16_spill] sm:$0xff] %v3649_v23  ;;  %v1113_v22 = vsub.s32 2, %v3686_v52 }
  0x86   : > { %5117 = vst [vmem:[#allocation17_spill] sm:$0xff] %v3654_v25 }
  0x91   : > { %381 = vxpose.xlu0.c.b16.start.end [1/1] (short) %v363_v5, 128 }
  0xda   : > { %v373_v6 = vpop.trf.xlu0 }
  0xdb   : > { %2835 = vmatprep.mubr.msk.bf16.mxu0 %vm397_vm1, %v373_v6 }
  0xde   : > { %v374_v7 = vpop.trf.xlu0 }
  0xdf   : > { %2836 = vmatmul.mubr.msk.bf16.vlgmr.msra.gmra.mrb[0].mxu0 %vm397_vm1, %v374_v7 }
  0xe2   : > { %v375_v8 = vpop.trf.xlu0 }
  0xe3   : > { %2839 = vmatprep.mubr.msk.bf16.mxu0 %vm397_vm1, %v375_v8 }
  0xe6   : > { %v376_v9 = vpop.trf.xlu0 }
  0xe7   : > { %2840 = vmatmul.mubr.msk.bf16.gmra.mrb[4].mxu0 %vm397_vm1, %v376_v9 }
  0xea   : > { %v377_v10 = vpop.trf.xlu0 }
  0xeb   : > { %2843 = vmatprep.mubr.msk.bf16.mxu0 %vm397_vm1, %v377_v10 }
  0xee   : > { %v378_v11 = vpop.trf.xlu0 }
  0xef   : > { %2844 = vmatmul.mubr.msk.bf16.gmra.mrb[8].mxu0 %vm397_vm1, %v378_v11 }
  0xf2   : > { %v379_v12 = vpop.trf.xlu0 }
  0xf3   : > { %2847 = vmatprep.mubr.msk.bf16.mxu0 %vm397_vm1, %v379_v12 }
  0xf6   : > { %v380_v13 = vpop.trf.xlu0 }
  0xf7   : > { %2848 = vmatmul.mubr.msk.bf16.gmra.mrb[12].mxu0 %vm397_vm1, %v380_v13 }
  0xfa   : > { %v389_v14 = vpop.trf.xlu0 }
  0xfb   : > { %2851 = vmatprep.mubr.msk.bf16.mxu1 %vm397_vm1, %v389_v14  ;;  %v3710_v14 = vld [vmem:[#allocation8] sm:$0xff] }
  0xfc   : > { %v3733_v42 = vrot.slane %v3710_v14, %v1113_v22 }
  0xfe   : > { %v390_v15 = vpop.trf.xlu0 }
  0xff   : > { %2852 = vmatmul.mubr.msk.bf16.vlgmr.msra.gmra.mrb[0].mxu1 %vm397_vm1, %v390_v15 }
 0x102   : > { %v391_v16 = vpop.trf.xlu0 }
 0x103   : > { %2855 = vmatprep.mubr.msk.bf16.mxu1 %vm397_vm1, %v391_v16 }
 0x106   : > { %v392_v17 = vpop.trf.xlu0 }
 0x107   : > { %2856 = vmatmul.mubr.msk.bf16.gmra.mrb[4].mxu1 %vm397_vm1, %v392_v17 }
 0x10a   : > { %v393_v18 = vpop.trf.xlu0 }
 0x10b   : > { %2859 = vmatprep.mubr.msk.bf16.mxu1 %vm397_vm1, %v393_v18  ;;  %v3717_v18 = vrot.slane %v3710_v14, %v1009_v2 }
 0x10e   : > { %v394_v19 = vpop.trf.xlu0 }
 0x10f   : > { %2860 = vmatmul.mubr.msk.bf16.gmra.mrb[8].mxu1 %vm397_vm1, %v394_v19 }
 0x112   : > { %v395_v20 = vpop.trf.xlu0 }
 0x113   : > { %2863 = vmatprep.mubr.msk.bf16.mxu1 %vm397_vm1, %v395_v20 }
 0x116   : > { %v396_v21 = vpop.trf.xlu0 }
 0x117   : > { %2864 = vmatmul.mubr.msk.bf16.gmra.mrb[12].mxu1 %vm397_vm1, %v396_v21  ;;  %v991_v21 = vld [vmem:[#allocation2 + $0x7] sm:$0xff] }
 0x1b2   : > { %v2837_v24 = vpop.f32.mrb[0].mxu0 }
 0x1b3   : > { %v620_v26 = vmul.f32 %v2837_v24, %v3649_v23  ;;  %v484_v27 = vpop.f32.mrb[1].mxu0 }
 0x1b4   : > { %v618_v28 = vmul.f32 %v3649_v23, %v484_v27  ;;  %v2838_v29 = vpop.f32.mrb[2].mxu0 }
 0x1b5   : > { %v3659_v30 = vadd.f32 %v3654_v25, %v620_v26  ;;  %v621_v31 = vmul.f32 %v2838_v29, %v3649_v23  ;;  %v487_v32 = vpop.f32.mrb[3].mxu0  ;;  %v3727_v29 = vrot.slane %v3710_v14, %v1061_v61  ;;  %v1096_v61 = vld [vmem:[#allocation2 + $0x11] sm:$0xff] }
 0x1b6   : > { %v3663_v33 = vadd.f32 %v3654_v25, %v618_v28  ;;  %v619_v34 = vmul.f32 %v3649_v23, %v487_v32 }
 0x1b7   : > { %v2584_v35 = vmul.f32 -1.442695, %v3659_v30  ;;  %v3668_v36 = vadd.f32 %v3654_v25, %v621_v31  ;;  %5118 = vst [vmem:[#allocation18_spill] sm:$0xff] %v3727_v29  ;;  %v992_v31 = vld [vmem:[#allocation2 + $0xf] sm:$0xff] }
 0x1b8   : > { %v2582_v37 = vmul.f32 -1.442695, %v3663_v33  ;;  %v3672_v38 = vadd.f32 %v3654_v25, %v619_v34 }
 0x1b9   : > { %2949 = vpow2.f32 %v2584_v35  ;;  %v2585_v39 = vmul.f32 -1.442695, %v3668_v36  ;;  %v1011_v35 = vmul.f32 %v3717_v18, %v991_v21 }
 0x1ba   : > { %2951 = vpow2.f32 %v2582_v37  ;;  %v2583_v40 = vmul.f32 -1.442695, %v3672_v38  ;;  %v2841_v41 = vpop.f32.mrb[4].mxu0 }
 0x1bb   : > { %2953 = vpow2.f32 %v2585_v39  ;;  %v624_v43 = vmul.f32 %v2841_v41, %v3649_v23  ;;  %v500_v44 = vpop.f32.mrb[5].mxu0  ;;  %v1063_v41 = vmul.f32 0.0, %v3727_v29 }
 0x1bc   : > { %2955 = vpow2.f32 %v2583_v40  ;;  %v622_v45 = vmul.f32 %v3649_v23, %v500_v44  ;;  %v2842_v46 = vpop.f32.mrb[6].mxu0 }
 0x1bd   : > { %v3679_v47 = vadd.f32 %v3654_v25, %v624_v43  ;;  %v625_v48 = vmul.f32 %v2842_v46, %v3649_v23  ;;  %v503_v49 = vpop.f32.mrb[7].mxu0  ;;  %v1095_v46 = vld [vmem:[#allocation2 + $0x9] sm:$0xff] }
 0x1be   : > { %v3683_v50 = vadd.f32 %v3654_v25, %v622_v45  ;;  %v623_v51 = vmul.f32 %v3649_v23, %v503_v49  ;;  %v1115_v2 = vmul.f32 %v3733_v42, %v1095_v46 }
 0x1bf   : > { %v2588_v53 = vmul.f32 -1.442695, %v3679_v47  ;;  %v3690_v54 = vadd.f32 %v3654_v25, %v625_v48  ;;  %v1012_v48 = vmul.f32 %v3717_v18, %v992_v31 }
 0x1c0   : > { %v2586_v55 = vmul.f32 -1.442695, %v3683_v50  ;;  %v3694_v56 = vadd.f32 %v3654_v25, %v623_v51 }
 0x1c1   : > { %2957 = vpow2.f32 %v2588_v53  ;;  %v2589_v57 = vmul.f32 -1.442695, %v3690_v54  ;;  %v1217_v53 = vsub.s32 4, %v3686_v52 }
 0x1c2   : > { %2959 = vpow2.f32 %v2586_v55  ;;  %v2587_v58 = vmul.f32 -1.442695, %v3694_v56  ;;  %v2845_v59 = vpop.f32.mrb[8].mxu0 }
 0x1c3   : > { %v2950_v60 = vpop.eup %2949  ;;  %v628_v62 = vmul.f32 %v2845_v59, %v3649_v23  ;;  %v516_v63 = vpop.f32.mrb[9].mxu0  ;;  %2961 = vpow2.f32 %v2589_v57  ;;  %v1322_v59 = vsub.s32 6, %v3686_v52 }
 0x1c4   : > { %v2952_v0 = vpop.eup %2951  ;;  %v787_v1 = vadd.f32 1.0, %v2950_v60  ;;  %v626_v3 = vmul.f32 %v3649_v23, %v516_v63  ;;  %v2846_v4 = vpop.f32.mrb[10].mxu0  ;;  %2963 = vpow2.f32 %v2587_v58  ;;  %v1165_v58 = vsub.s32 3, %v3686_v52 }
 0x1c5   : > { %v2954_v5 = vpop.eup %2953  ;;  %v785_v6 = vadd.f32 1.0, %v2952_v0  ;;  %v3703_v7 = vadd.f32 %v3654_v25, %v628_v62  ;;  %v629_v8 = vmul.f32 %v2846_v4, %v3649_v23  ;;  %v519_v9 = vpop.f32.mrb[11].mxu0  ;;  %v1374_v60 = vsub.s32 7, %v3686_v52 }
 0x1c6   : > { %v2956_v10 = vpop.eup %2955  ;;  %2965 = vrcp.f32 %v787_v1  ;;  %v788_v11 = vadd.f32 1.0, %v2954_v5  ;;  %v3707_v12 = vadd.f32 %v3654_v25, %v626_v3  ;;  %v627_v13 = vmul.f32 %v3649_v23, %v519_v9 }
 0x1c7   : > { %2967 = vrcp.f32 %v785_v6  ;;  %v786_v15 = vadd.f32 1.0, %v2956_v10  ;;  %v2592_v16 = vmul.f32 -1.442695, %v3703_v7  ;;  %v3714_v17 = vadd.f32 %v3654_v25, %v629_v8 }
 0x1c8   : > { %2969 = vrcp.f32 %v788_v11  ;;  %v2590_v19 = vmul.f32 -1.442695, %v3707_v12  ;;  %v3721_v20 = vadd.f32 %v3654_v25, %v627_v13  ;;  %v1079_v1 = vadd.f32 %v1063_v41, %v1011_v35 }
 0x1c9   : > { %2971 = vrcp.f32 %v786_v15  ;;  %v2593_v24 = vmul.f32 -1.442695, %v3714_v17  ;;  %v1269_v3 = vsub.s32 5, %v3686_v52  ;;  %v1080_v6 = vadd.f32 %v1063_v41, %v1012_v48 }
 0x1ca   : > { %2973 = vpow2.f32 %v2592_v16  ;;  %v2591_v26 = vmul.f32 -1.442695, %v3721_v20  ;;  %v2849_v27 = vpop.f32.mrb[12].mxu0 }
 0x1cb   : > { %v2958_v28 = vpop.eup %2957  ;;  %2975 = vpow2.f32 %v2590_v19  ;;  %v532_v32 = vpop.f32.mrb[13].mxu0  ;;  %v632_v39 = vmul.f32 %v2849_v27, %v3649_v23  ;;  %v3770_v27 = vrot.slane %v3710_v14, %v1217_v53 }
 0x1cc   : > { %v2960_v34 = vpop.eup %2959  ;;  %v791_v37 = vadd.f32 1.0, %v2958_v28  ;;  %2977 = vpow2.f32 %v2593_v24  ;;  %v2850_v40 = vpop.f32.mrb[14].mxu0  ;;  %v630_v49 = vmul.f32 %v3649_v23, %v532_v32  ;;  %v3773_v28 = vrot.slane %v3710_v14, %v1374_v60 }
 0x1cd   : > { %v789_v43 = vadd.f32 1.0, %v2960_v34  ;;  %2979 = vpow2.f32 %v2591_v26  ;;  %v535_v44 = vpop.f32.mrb[15].mxu0  ;;  %v2962_v45 = vpop.eup %2961  ;;  %v633_v55 = vmul.f32 %v2850_v40, %v3649_v23  ;;  %v3743_v62 = vadd.f32 %v3654_v25, %v632_v39 }
 0x1ce   : > { %2981 = vrcp.f32 %v791_v37  ;;  %v2964_v51 = vpop.eup %2963  ;;  %v792_v8 = vadd.f32 1.0, %v2962_v45  ;;  %v3750_v9 = vadd.f32 %v3654_v25, %v630_v49  ;;  %v631_v22 = vmul.f32 %v3649_v23, %v535_v44 }
 0x1cf   : > { %2983 = vrcp.f32 %v789_v43  ;;  %5119 = vst [vmem:[#allocation19_spill] sm:$0xff] %v3743_v62  ;;  %v790_v15 = vadd.f32 1.0, %v2964_v51  ;;  %v3757_v16 = vadd.f32 %v3654_v25, %v633_v55  ;;  %v2596_v21 = vmul.f32 -1.442695, %v3743_v62 }
 0x1d0   : > { %v2966_v57 = vpop.eup %2965  ;;  %5120 = vst [vmem:[#allocation20_spill] sm:$0xff] %v3750_v9  ;;  %v3778_v32 = vrot.slane %v3710_v14, %v1322_v59  ;;  %v1131_v34 = vadd.f32 %v1115_v2, %v1079_v1  ;;  %2985 = vrcp.f32 %v792_v8  ;;  %v2594_v35 = vmul.f32 -1.442695, %v3750_v9 }
 0x1d1   : > { %v2968_v63 = vpop.eup %2967  ;;  %v883_v0 = vmul.f32 %v2966_v57, %v3659_v30  ;;  %v1116_v30 = vmul.f32 %v3733_v42, %v1096_v61  ;;  %5121 = vst [vmem:[#allocation21_spill] sm:$0xff] %v3757_v16  ;;  %v3782_v39 = vrot.slane %v3710_v14, %v1269_v3  ;;  %2987 = vrcp.f32 %v790_v15 }
 0x1d2   : > { %v2970_v4 = vpop.eup %2969  ;;  %v881_v5 = vmul.f32 %v2968_v63, %v3663_v33  ;;  %v3752_v10 = vpop.f32.mrb[0].mxu1  ;;  %v2597_v41 = vmul.f32 -1.442695, %v3757_v16  ;;  %2989 = vpow2.f32 %v2596_v21  ;;  %v3789_v46 = vadd.f32 %v3654_v25, %v631_v22 }
 0x1d3   : > { %v2972_v11 = vpop.eup %2971  ;;  %957 = vst [vmem:[#allocation2 + $0x48] sm:$0xff] %v883_v0  ;;  %v884_v13 = vmul.f32 %v2970_v4, %v3668_v36  ;;  %v3759_v52 = vpop.f32.mrb[1].mxu1  ;;  %v3767_v36 = vrot.slane %v3710_v14, %v1165_v58  ;;  %v3784_v40 = vadd.f32 %v1116_v30, %v1080_v6  ;;  %v1067_v44 = vmul.f32 %v3727_v29, %v883_v0 }
 0x1d4   : > { %v2974_v33 = vpop.eup %2973  ;;  %955 = vst [vmem:[#allocation2 + $0x28] sm:$0xff] %v881_v5  ;;  %v882_v19 = vmul.f32 %v2972_v11, %v3672_v38  ;;  %v3764_v24 = vpop.f32.mrb[2].mxu1  ;;  %5124 = vst [vmem:[#allocation24_spill] sm:$0xff] %v3789_v46  ;;  %v3792_v49 = vmul.f32 %v3770_v27, %v883_v0  ;;  %v3795_v14 = vmul.f32 %v3773_v28, %v883_v0  ;;  %2991 = vpow2.f32 %v2594_v35 }
 0x1d5   : > { %5122 = vst [vmem:[#allocation22_spill] sm:$0xff] %v3764_v24  ;;  %v2976_v26 = vpop.eup %2975  ;;  %958 = vst [vmem:[#allocation2 + $0x50] sm:$0xff] %v884_v13  ;;  %v3775_v31 = vpop.f32.mrb[3].mxu1  ;;  %v795_v45 = vadd.f32 1.0, %v2974_v33  ;;  %v1065_v57 = vmul.f32 %v3727_v29, %v881_v5  ;;  %v1219_v63 = vmul.f32 %v3770_v27, %v881_v5  ;;  %v3808_v0 = vmul.f32 %v3727_v29, %v884_v13 }
 0x1d6   : > { %5123 = vst [vmem:[#allocation23_spill] sm:$0xff] %v3775_v31  ;;  %v2978_v38 = vpop.eup %2977  ;;  %956 = vst [vmem:[#allocation2 + $0x30] sm:$0xff] %v882_v19  ;;  %v793_v53 = vadd.f32 1.0, %v2976_v26  ;;  %2993 = vpow2.f32 %v2597_v41  ;;  %v3820_v6 = vmul.f32 %v3770_v27, %v884_v13  ;;  %v3823_v8 = vmul.f32 %v3773_v28, %v884_v13 }
 0x1d7   : > { %v2980_v37 = vpop.eup %2979  ;;  %v796_v59 = vadd.f32 1.0, %v2978_v38  ;;  %2995 = vrcp.f32 %v795_v45  ;;  %v1066_v30 = vmul.f32 %v3727_v29, %v882_v19  ;;  %v1220_v22 = vmul.f32 %v3770_v27, %v882_v19 }
 0x1d8   : > { %v2982_v43 = vpop.eup %2981  ;;  %2997 = vrcp.f32 %v793_v53  ;;  %v3831_v26 = vmul.f32 %v3752_v10, %v3649_v23 }
 0x1d9   : > { %v2984_v48 = vpop.eup %2983  ;;  %v3798_v51 = vmul.f32 %v2982_v43, %v3679_v47  ;;  %v794_v47 = vadd.f32 1.0, %v2980_v37  ;;  %2999 = vrcp.f32 %v796_v59  ;;  %v3836_v37 = vmul.f32 %v3649_v23, %v3759_v52 }
 0x1da   : > { %v995_v55 = vld [vmem:[#allocation2 + $0x47] sm:$0xff]  ;;  %v3802_v58 = vmul.f32 %v2984_v48, %v3683_v50  ;;  %v3804_v60 = vpop.f32.mrb[4].mxu1  ;;  %5129 = vst [vmem:[#allocation29_spill] sm:$0xff] %v3831_v26  ;;  %v2986_v41 = vpop.eup %2985 }
 0x1db   : > { %5125 = vst [vmem:[#allocation25_spill] sm:$0xff] %v3804_v60  ;;  %v993_v61 = vld [vmem:[#allocation2 + $0x27] sm:$0xff]  ;;  %961 = vst [vmem:[#allocation2 + $0x88] sm:$0xff] %v3798_v51  ;;  %v3811_v1 = vpop.f32.mrb[5].mxu1  ;;  %v1015_v2 = vmul.f32 %v3717_v18, %v995_v55  ;;  %v1169_v38 = vmul.f32 %v3767_v36, %v995_v55  ;;  %3001 = vrcp.f32 %v794_v47  ;;  %v2988_v53 = vpop.eup %2987  ;;  %v1324_v10 = vmul.f32 %v3778_v32, %v995_v55 }
 0x1dc   : > { %5126 = vst [vmem:[#allocation26_spill] sm:$0xff] %v3811_v1  ;;  %v1013_v50 = vmul.f32 %v3717_v18, %v993_v61  ;;  %v1167_v3 = vmul.f32 %v3767_v36, %v993_v61  ;;  %959 = vst [vmem:[#allocation2 + $0x68] sm:$0xff] %v3802_v58  ;;  %v3817_v4 = vpop.f32.mrb[6].mxu1  ;;  %v1099_v5 = vld [vmem:[#allocation2 + $0x49] sm:$0xff]  ;;  %v3845_v61 = vmul.f32 %v3727_v29, %v3798_v51  ;;  %v3847_v52 = vpop.eup %2989 }
 0x1dd   : > { %5127 = vst [vmem:[#allocation27_spill] sm:$0xff] %v3817_v4  ;;  %v994_v11 = vld [vmem:[#allocation2 + $0x2f] sm:$0xff]  ;;  %v3826_v15 = vpop.f32.mrb[7].mxu1  ;;  %5130 = vst [vmem:[#allocation30_spill] sm:$0xff] %v3836_v37  ;;  %v1083_v43 = vadd.f32 %v1067_v44, %v1015_v2  ;;  %v1119_v19 = vmul.f32 %v3733_v42, %v1099_v5  ;;  %v3853_v2 = vmul.f32 %v3770_v27, %v3798_v51 }
 0x1de   : > { %5128 = vst [vmem:[#allocation28_spill] sm:$0xff] %v3826_v15  ;;  %v1183_v33 = vadd.f32 %v1167_v3, %v1131_v34  ;;  %v1097_v21 = vld [vmem:[#allocation2 + $0x29] sm:$0xff]  ;;  %v1081_v35 = vadd.f32 %v1065_v57, %v1013_v50  ;;  %v1098_v13 = vld [vmem:[#allocation2 + $0x31] sm:$0xff]  ;;  %v1014_v48 = vmul.f32 %v3717_v18, %v994_v11  ;;  %v1168_v57 = vmul.f32 %v3767_v36, %v994_v11  ;;  %v3864_v4 = vpop.eup %2991 }
 0x1df   : > { %v996_v45 = vld [vmem:[#allocation2 + $0x4f] sm:$0xff]  ;;  %v1117_v59 = vmul.f32 %v3733_v42, %v1097_v21  ;;  %v1271_v47 = vmul.f32 %v3782_v39, %v1097_v21  ;;  %v3857_v50 = vld [vmem:[#allocation8 + $0x8] ss:$0 sm:$0xff]  ;;  %v1135_v21 = vadd.f32 %v1119_v19, %v1083_v43  ;;  %v1273_v16 = vmul.f32 %v3782_v39, %v1099_v5 }
 0x1e0   : > { %v1235_v34 = vadd.f32 %v1219_v63, %v1183_v33  ;;  %v1082_v44 = vadd.f32 %v1066_v30, %v1014_v48  ;;  %v1118_v63 = vmul.f32 %v3733_v42, %v1098_v13  ;;  %v1016_v3 = vmul.f32 %v3717_v18, %v996_v45  ;;  %v3869_v60 = vpop.eup %2993 }
 0x1e1   : > { %v1170_v11 = vmul.f32 %v3767_v36, %v996_v45  ;;  %v1133_v33 = vadd.f32 %v1117_v59, %v1081_v35  ;;  %v1184_v15 = vadd.f32 %v1168_v57, %v3784_v40  ;;  %5134 = vst [vmem:[#allocation34_spill] sm:$0xff] %v3869_v60  ;;  %v1272_v35 = vmul.f32 %v3782_v39, %v1098_v13  ;;  %v2996_v59 = vpop.eup %2995 }
 0x1e2   : > { %v3855_v55 = vpop.f32.mrb[8].mxu1  ;;  %v1134_v1 = vadd.f32 %v1118_v63, %v1082_v44  ;;  %v1287_v9 = vadd.f32 %v1271_v47, %v1235_v34  ;;  %v1325_v57 = vmul.f32 %v3778_v32, %v996_v45  ;;  %v2998_v46 = vpop.eup %2997  ;;  %v1100_v44 = vld [vmem:[#allocation2 + $0x51] sm:$0xff]  ;;  %v1223_v47 = vmul.f32 %v3770_v27, %v3802_v58  ;;  %v999_v13 = vld [vmem:[#allocation2 + $0x87] sm:$0xff] }
 0x1e3   : > { %5131 = vst [vmem:[#allocation31_spill] sm:$0xff] %v3855_v55  ;;  %v997_v30 = vld [vmem:[#allocation2 + $0x67] sm:$0xff]  ;;  %v3862_v48 = vpop.f32.mrb[9].mxu1  ;;  %v1185_v62 = vadd.f32 %v1169_v38, %v1133_v33  ;;  %v1236_v31 = vadd.f32 %v1220_v22, %v1184_v15  ;;  %v3000_v22 = vpop.eup %2999  ;;  %v888_v45 = vmul.f32 %v2986_v41, %v3690_v54  ;;  %v3894_v54 = vmul.f32 %v3773_v28, %v3798_v51 }
 0x1e4   : > { %5132 = vst [vmem:[#allocation32_spill] sm:$0xff] %v3862_v48  ;;  %v3867_v55 = vpop.f32.mrb[10].mxu1  ;;  %v1171_v40 = vmul.f32 %v3767_v36, %v997_v30  ;;  %v1428_v48 = vmul.f32 %v3857_v50, %v1099_v5  ;;  %v1186_v43 = vadd.f32 %v1170_v11, %v1134_v1  ;;  %v1340_v19 = vadd.f32 %v1324_v10, %v1287_v9 }
 0x1e5   : > { %5133 = vst [vmem:[#allocation33_spill] sm:$0xff] %v3867_v55  ;;  %v1288_v34 = vadd.f32 %v1272_v35, %v1236_v31  ;;  %v1237_v15 = vadd.f32 %v3792_v49, %v1185_v62  ;;  %v1326_v33 = vmul.f32 %v3778_v32, %v997_v30  ;;  %v886_v1 = vmul.f32 %v2988_v53, %v3694_v56  ;;  %v3002_v9 = vpop.eup %3001  ;;  %v3885_v31 = vld [vmem:[%s5065_s5] ss:$0 sm:$0xff]  ;;  %v3911_v35 = vpop.f32.mrb[11].mxu1 }
 0x1e6   : > { %v1187_v63 = vadd.f32 %v1171_v40, %v1135_v21  ;;  %v1392_v38 = vadd.f32 %v3795_v14, %v1340_v19  ;;  %v1238_v49 = vadd.f32 %v3820_v6, %v1186_v43  ;;  %v1084_v14 = vadd.f32 %v3808_v0, %v1016_v3  ;;  %962 = vst [vmem:[#allocation2 + $0x90] sm:$0xff] %v888_v45  ;;  %v3899_v56 = vld [vmem:[%s5066_s6] ss:$0 sm:$0xff] }
 0x1e7   : > { %v1341_v5 = vadd.f32 %v1325_v57, %v1288_v34  ;;  %v1289_v62 = vadd.f32 %v1273_v16, %v1237_v15  ;;  %v1429_v11 = vmul.f32 %v3857_v50, %v1100_v44  ;;  %960 = vst [vmem:[#allocation2 + $0x70] sm:$0xff] %v886_v1  ;;  %v1019_v6 = vmul.f32 %v3717_v18, %v999_v13 }
 0x1e8   : > { %v3887_v10 = vadd.f32 %v1223_v47, %v1187_v63  ;;  %v1444_v21 = vadd.f32 %v1428_v48, %v1392_v38  ;;  %v1378_v0 = vmul.f32 %v3773_v28, %v3802_v58  ;;  %v1120_v53 = vmul.f32 %v3733_v42, %v1100_v44  ;;  %5136 = vst [vmem:[#allocation36_spill] sm:$0xff] %v3911_v35 }
 0x1e9   : > { %v1393_v16 = vadd.f32 %v3823_v8, %v1341_v5  ;;  %v1342_v41 = vadd.f32 %v1326_v33, %v1289_v62  ;;  %v1017_v3 = vmul.f32 %v3717_v18, %v997_v30  ;;  %v3909_v48 = vmul.f32 %v2996_v59, %v3703_v7 }
 0x1ea   : > { %v1466_v51 = vmul.f32 %v3885_v31, %v1444_v21  ;;  %v889_v8 = vmul.f32 %v2998_v46, %v3707_v12  ;;  %v3917_v43 = vmul.f32 %v3000_v22, %v3714_v17  ;;  %v1136_v19 = vadd.f32 %v1120_v53, %v1084_v14 }
 0x1eb   : > { %5135 = vst [vmem:[#allocation35_spill] sm:$0xff] %v3909_v48  ;;  %v1445_v40 = vadd.f32 %v1429_v11, %v1393_v16  ;;  %v3913_v57 = vadd.f32 %v1378_v0, %v1342_v41  ;;  %v1274_v34 = vmul.f32 %v3782_v39, %v1100_v44  ;;  %v1069_v7 = vmul.f32 %v3727_v29, %v3802_v58 }
 0x1ec   : > { %5137 = vst [vmem:[#allocation37_spill] sm:$0xff] %v3917_v43  ;;  %v3921_v63 = vadd.f32 %v3899_v56, %v1466_v51  ;;  %965 = vst [vmem:[#allocation2 + $0xc8] sm:$0xff] %v3909_v48  ;;  %v1087_v59 = vadd.f32 %v3845_v61, %v1019_v6  ;;  %v1173_v12 = vmul.f32 %v3767_v36, %v999_v13 }
 0x1ed   : > { %v1467_v30 = vmul.f32 %v3885_v31, %v1445_v40  ;;  %v1328_v17 = vmul.f32 %v3778_v32, %v999_v13  ;;  %963 = vst [vmem:[#allocation2 + $0xa8] sm:$0xff] %v889_v8  ;;  %966 = vst [vmem:[#allocation2 + $0xd0] sm:$0xff] %v3917_v43  ;;  %v1085_v44 = vadd.f32 %v1069_v7, %v1017_v3  ;;  %v3939_v22 = vld [vmem:[#allocation2 + $0x8f] sm:$0xff]  ;;  %v3986_v7 = vadd.f32 1.0, %v3847_v52 }
 0x1ee   : > { %v2617_v46 = vmul.f32 -1.442695, %v3921_v63  ;;  %v1072_v47 = vmul.f32 %v3727_v29, %v888_v45  ;;  %v3934_v58 = vmul.f32 %v3770_v27, %v888_v45  ;;  %v3942_v61 = vmul.f32 %v3773_v28, %v888_v45  ;;  %v1103_v33 = vld [vmem:[#allocation2 + $0x89] sm:$0xff]  ;;  %v3953_v45 = vld [vmem:[#allocation2 + $0x91] sm:$0xff] }
 0x1ef   : > { %v3937_v15 = vadd.f32 %v3899_v56, %v1467_v30  ;;  %v1070_v38 = vmul.f32 %v3727_v29, %v886_v1  ;;  %v3946_v13 = vmul.f32 %v3002_v9, %v3721_v20  ;;  %v1101_v5 = vld [vmem:[#allocation2 + $0x69] sm:$0xff]  ;;  %v1224_v62 = vmul.f32 %v3770_v27, %v886_v1 }
 0x1f0   : > { %3003 = vpow2.f32 %v2617_v46  ;;  %v1290_v14 = vadd.f32 %v1274_v34, %v1238_v49  ;;  %v1379_v11 = vmul.f32 %v3773_v28, %v886_v1  ;;  %v1020_v16 = vmul.f32 %v3717_v18, %v3939_v22  ;;  %v998_v6 = vld [vmem:[#allocation2 + $0x6f] sm:$0xff] }
 0x1f1   : > { %v2618_v21 = vmul.f32 -1.442695, %v3937_v15  ;;  %v3957_v20 = vmul.f32 %v3770_v27, %v3909_v48  ;;  %v3961_v9 = vmul.f32 %v3773_v28, %v3909_v48  ;;  %964 = vst [vmem:[#allocation2 + $0xb0] sm:$0xff] %v3946_v13  ;;  %v3965_v1 = vmul.f32 %v3727_v29, %v889_v8 }
 0x1f2   : > { %v1227_v49 = vmul.f32 %v3770_v27, %v889_v8  ;;  %v3969_v41 = vmul.f32 %v3773_v28, %v889_v8  ;;  %v3973_v0 = vmul.f32 %v3770_v27, %v3917_v43  ;;  %v1123_v53 = vmul.f32 %v3733_v42, %v1103_v33 }
 0x1f3   : > { %3005 = vpow2.f32 %v2618_v21  ;;  %v1121_v51 = vmul.f32 %v3733_v42, %v1101_v5  ;;  %v3979_v3 = vmul.f32 %v3773_v28, %v3917_v43  ;;  %v1124_v40 = vmul.f32 %v3733_v42, %v3953_v45  ;;  %v1102_v21 = vld [vmem:[#allocation2 + $0x71] sm:$0xff] }
 0x1f4   : > { %v1172_v34 = vmul.f32 %v3767_v36, %v998_v6  ;;  %v1275_v8 = vmul.f32 %v3782_v39, %v1101_v5  ;;  %v1088_v30 = vadd.f32 %v1072_v47, %v1020_v16  ;;  %v1277_v46 = vmul.f32 %v3782_v39, %v1103_v33 }
 0x1f5   : > { %v1137_v35 = vadd.f32 %v1121_v51, %v1085_v44  ;;  %v1327_v55 = vmul.f32 %v3778_v32, %v998_v6  ;;  %v1018_v43 = vmul.f32 %v3717_v18, %v998_v6  ;;  %v1430_v37 = vmul.f32 %v3857_v50, %v1101_v5  ;;  %v1001_v51 = vld [vmem:[#allocation2 + $0xa7] sm:$0xff] }
 0x1f6   : > { %v1188_v48 = vadd.f32 %v1172_v34, %v1136_v19  ;;  %v1291_v60 = vadd.f32 %v1275_v8, %v3887_v10  ;;  %v1139_v25 = vadd.f32 %v1123_v53, %v1087_v59  ;;  %v1329_v26 = vmul.f32 %v3778_v32, %v3939_v22 }
 0x1f7   : > { %v1189_v52 = vadd.f32 %v1173_v12, %v1137_v35  ;;  %v1343_v24 = vadd.f32 %v1327_v55, %v1290_v14  ;;  %v1276_v16 = vmul.f32 %v3782_v39, %v1102_v21  ;;  %v1446_v44 = vadd.f32 %v1430_v37, %v3913_v57 }
 0x1f8   : > { %v1240_v47 = vadd.f32 %v1224_v62, %v1188_v48  ;;  %v1344_v23 = vadd.f32 %v1328_v17, %v1291_v60  ;;  %v1432_v6 = vmul.f32 %v3857_v50, %v1103_v33  ;;  %v1433_v10 = vmul.f32 %v3857_v50, %v3953_v45 }
 0x1f9   : > { %v1395_v19 = vadd.f32 %v1379_v11, %v1343_v24  ;;  %v1431_v59 = vmul.f32 %v3857_v50, %v1102_v21  ;;  %v1086_v53 = vadd.f32 %v1070_v38, %v1018_v43  ;;  %v1468_v48 = vmul.f32 %v3885_v31, %v1446_v44 }
 0x1fa   : > { %v3004_v5 = vpop.eup %3003  ;;  %v1292_v34 = vadd.f32 %v1276_v16, %v1240_v47  ;;  %v1396_v55 = vadd.f32 %v3894_v54, %v1344_v23  ;;  %v1175_v37 = vmul.f32 %v3767_v36, %v1001_v51  ;;  %v1241_v57 = vadd.f32 %v3853_v2, %v1189_v52 }
 0x1fb   : > { %v1552_v35 = vadd.f32 1.0, %v3004_v5  ;;  %v1447_v60 = vadd.f32 %v1431_v59, %v1395_v19  ;;  %v1122_v12 = vmul.f32 %v3733_v42, %v1102_v21  ;;  %v4007_v24 = vadd.f32 %v3899_v56, %v1468_v48  ;;  %v4026_v19 = vpop.f32.mrb[12].mxu1 }
 0x1fc   : > { %v1345_v17 = vadd.f32 %v1329_v26, %v1292_v34  ;;  %v1448_v33 = vadd.f32 %v1432_v6, %v1396_v55  ;;  %v1191_v23 = vadd.f32 %v1175_v37, %v1139_v25  ;;  %v1293_v54 = vadd.f32 %v1277_v46, %v1241_v57  ;;  %v4020_v25 = vld [vmem:[#allocation2 + $0xc7] sm:$0xff]  ;;  %v1002_v34 = vld [vmem:[#allocation2 + $0xaf] sm:$0xff] }
 0x1fd   : > { %v3006_v62 = vpop.eup %3005  ;;  %3007 = vrcp.f32 %v1552_v35  ;;  %v1469_v43 = vmul.f32 %v3885_v31, %v1447_v60  ;;  %v2619_v2 = vmul.f32 -1.442695, %v4007_v24  ;;  %v1138_v8 = vadd.f32 %v1122_v12, %v1086_v53  ;;  %v4032_v53 = vld [vmem:[#allocation2 + $0xcf] sm:$0xff] }
 0x1fe   : > { %v1553_v38 = vadd.f32 1.0, %v3006_v62  ;;  %v1397_v14 = vadd.f32 %v3942_v61, %v1345_v17  ;;  %v1470_v11 = vmul.f32 %v3885_v31, %v1448_v33  ;;  %v1243_v21 = vadd.f32 %v1227_v49, %v1191_v23 }
 0x1ff   : > { %v4014_v26 = vadd.f32 %v3899_v56, %v1469_v43  ;;  %v1330_v52 = vmul.f32 %v3778_v32, %v1001_v51  ;;  %v1021_v61 = vmul.f32 %v3717_v18, %v1001_v51  ;;  %v1174_v46 = vmul.f32 %v3767_v36, %v3939_v22  ;;  %v4034_v51 = vld [vmem:[#allocation2 + $0xc9] sm:$0xff]  ;;  %v4036_v22 = vpop.f32.mrb[13].mxu1 }
 0x200   : > { %3009 = vrcp.f32 %v1553_v38  ;;  %v1449_v47 = vadd.f32 %v1433_v10, %v1397_v14  ;;  %v4018_v16 = vadd.f32 %v3899_v56, %v1470_v11  ;;  %v1140_v49 = vadd.f32 %v1124_v40, %v1088_v30  ;;  %5138 = vst [vmem:[#allocation38_spill] sm:$0xff] %v4036_v22  ;;  %v1105_v30 = vld [vmem:[#allocation2 + $0xa9] sm:$0xff]  ;;  %v4041_v35 = vpop.f32.mrb[14].mxu1 }
 0x201   : > { %3011 = vpow2.f32 %v2619_v2  ;;  %v2620_v44 = vmul.f32 -1.442695, %v4014_v26  ;;  %v1346_v6 = vadd.f32 %v1330_v52, %v1293_v54  ;;  %v1278_v10 = vmul.f32 %v3782_v39, %v3953_v45  ;;  %v1106_v45 = vld [vmem:[#allocation2 + $0xb1] sm:$0xff]  ;;  %5139 = vst [vmem:[#allocation39_spill] sm:$0xff] %v4041_v35 }
 0x202   : > { %v1471_v59 = vmul.f32 %v3885_v31, %v1449_v47  ;;  %v2621_v5 = vmul.f32 -1.442695, %v4018_v16  ;;  %v1190_v55 = vadd.f32 %v1174_v46, %v1138_v8  ;;  %v1177_v48 = vmul.f32 %v3767_v36, %v4020_v25 }
 0x203   : > { %3013 = vpow2.f32 %v2620_v44  ;;  %v1398_v40 = vadd.f32 %v3969_v41, %v1346_v6  ;;  %v1332_v37 = vmul.f32 %v3778_v32, %v4020_v25  ;;  %v1089_v57 = vadd.f32 %v3965_v1, %v1021_v61  ;;  %v4069_v61 = vpop.f32.mrb[15].mxu1 }
 0x204   : > { %v4044_v60 = vadd.f32 %v3899_v56, %v1471_v59  ;;  %3015 = vpow2.f32 %v2621_v5  ;;  %v1178_v12 = vmul.f32 %v3767_v36, %v4032_v53  ;;  %v1333_v17 = vmul.f32 %v3778_v32, %v4032_v53 }
 0x205   : > { %v1436_v41 = vmul.f32 %v3857_v50, %v4034_v51  ;;  %v1022_v33 = vmul.f32 %v3717_v18, %v1002_v34  ;;  %v1074_v43 = vmul.f32 %v3727_v29, %v3946_v13  ;;  %v1125_v23 = vmul.f32 %v3733_v42, %v1105_v30 }
 0x206   : > { %v2622_v62 = vmul.f32 -1.442695, %v4044_v60  ;;  %v1126_v1 = vmul.f32 %v3733_v42, %v1106_v45  ;;  %v1176_v38 = vmul.f32 %v3767_v36, %v1002_v34  ;;  %v1228_v14 = vmul.f32 %v3770_v27, %v3946_v13 }
 0x207   : > { %v3008_v54 = vpop.eup %3007  ;;  %v1242_v11 = vadd.f32 %v3934_v58, %v1190_v55  ;;  %v1279_v2 = vmul.f32 %v3782_v39, %v1105_v30  ;;  %v1090_v52 = vadd.f32 %v1074_v43, %v1022_v33  ;;  %v1141_v47 = vadd.f32 %v1125_v23, %v1089_v57 }
 0x208   : > { %v4067_v8 = vmul.f32 %v3008_v54, %v3921_v63  ;;  %3017 = vpow2.f32 %v2622_v62  ;;  %v1192_v46 = vadd.f32 %v1176_v38, %v1140_v49  ;;  %v1280_v44 = vmul.f32 %v3782_v39, %v1106_v45 }
 0x209   : > { %v1294_v6 = vadd.f32 %v1278_v10, %v1242_v11  ;;  %v1295_v59 = vadd.f32 %v1279_v2, %v1243_v21  ;;  %v1142_v35 = vadd.f32 %v1126_v1, %v1090_v52  ;;  %v1193_v22 = vadd.f32 %v1177_v48, %v1141_v47  ;;  %v4083_v48 = vld [vmem:[#allocation2 + $0xd1] sm:$0xff] }
 0x20a   : > { %v3010_v5 = vpop.eup %3009  ;;  %v1331_v58 = vmul.f32 %v3778_v32, %v1002_v34  ;;  %v1383_v63 = vmul.f32 %v3773_v28, %v3946_v13  ;;  %v1244_v57 = vadd.f32 %v1228_v14, %v1192_v46  ;;  %v1434_v49 = vmul.f32 %v3857_v50, %v1105_v30  ;;  %v5140_v46 = vld [vmem:[#allocation16_spill] sm:$0xff] }
 0x20b   : > { %v3012_v55 = vpop.eup %3011  ;;  %v4077_v33 = vmul.f32 %v3010_v5, %v3937_v15  ;;  %v1348_v62 = vadd.f32 %v1332_v37, %v1295_v59  ;;  %v1194_v23 = vadd.f32 %v1178_v12, %v1142_v35  ;;  %v1435_v21 = vmul.f32 %v3857_v50, %v1106_v45 }
 0x20c   : > { %v1554_v43 = vadd.f32 1.0, %v3012_v55  ;;  %v1347_v10 = vadd.f32 %v1331_v58, %v1294_v6  ;;  %v1296_v13 = vadd.f32 %v1280_v44, %v1244_v57  ;;  %v1450_v15 = vadd.f32 %v1434_v49, %v1398_v40  ;;  %v5141_v44 = vld [vmem:[#allocation22_spill] sm:$0xff]  ;;  %v5143_v55 = vld [vmem:[#allocation17_spill] sm:$0xff] }
 0x20d   : > { %v3014_v1 = vpop.eup %3013  ;;  %v2724_v34 = vpack.c.bf16 %v4077_v33, %v4067_v8  ;;  %v1400_v54 = vadd.f32 %v3961_v9, %v1348_v62  ;;  %v4087_v30 = vadd.f32 %v3957_v20, %v1193_v22  ;;  %v1437_v9 = vmul.f32 %v3857_v50, %v4083_v48 }
 0x20e   : > { %v3016_v38 = vpop.eup %3015  ;;  %v1555_v14 = vadd.f32 1.0, %v3014_v1  ;;  %3019 = vrcp.f32 %v1554_v43  ;;  %v1399_v37 = vadd.f32 %v1383_v63, %v1347_v10  ;;  %v1349_v35 = vadd.f32 %v1333_v17, %v1296_v13  ;;  %v5142_v63 = vld [vmem:[#allocation29_spill] sm:$0xff]  ;;  %v5145_v43 = vld [vmem:[#allocation34_spill] sm:$0xff] }
 0x20f   : > { %2725 = vst [vmem:[%s4089_s24] sm:$0xff] %v2724_v34   ;;  %v1556_v45 = vadd.f32 1.0, %v3016_v38  ;;  %v1452_v12 = vadd.f32 %v1436_v41, %v1400_v54  ;;  %v1472_v11 = vmul.f32 %v3885_v31, %v1450_v15  ;;  %v797_v2 = vadd.f32 1.0, %v3864_v4  ;;  %v5147_v38 = vld [vmem:[#allocation23_spill] sm:$0xff] }
 0x210   : > { %3021 = vrcp.f32 %v1555_v14  ;;  %v1451_v40 = vadd.f32 %v1435_v21, %v1399_v37  ;;  %v1401_v20 = vadd.f32 %v3979_v3, %v1349_v35  ;;  %v4104_v41 = vadd.f32 %v3973_v0, %v1194_v23  ;;  %v5144_v0 = vld [vmem:[#allocation30_spill] sm:$0xff]  ;;  %v5146_v21 = vld [vmem:[#allocation24_spill] sm:$0xff] }
 0x211   : > { %3023 = vrcp.f32 %v1556_v45  ;;  %v1474_v22 = vmul.f32 %v3885_v31, %v1452_v12  ;;  %v4099_v52 = vadd.f32 %v3899_v56, %v1472_v11  ;;  %v637_v6 = vmul.f32 %v5141_v44, %v5140_v46  ;;  %v5150_v44 = vld [vmem:[#allocation25_spill] sm:$0xff] }
 0x212   : > { %v3018_v47 = vpop.eup %3017  ;;  %v1473_v17 = vmul.f32 %v3885_v31, %v1451_v40  ;;  %3025 = vrcp.f32 %v3986_v7  ;;  %v1453_v59 = vadd.f32 %v1437_v9, %v1401_v20  ;;  %v4117_v7 = vadd.f32 %v5143_v55, %v5142_v63 }
 0x213   : > { %v1557_v4 = vadd.f32 1.0, %v3018_v47  ;;  %v4109_v3 = vadd.f32 %v3899_v56, %v1474_v22  ;;  %v2623_v5 = vmul.f32 -1.442695, %v4099_v52  ;;  %3027 = vrcp.f32 %v797_v2  ;;  %v5149_v47 = vld [vmem:[#allocation19_spill] sm:$0xff] }
 0x214   : > { %v4113_v58 = vadd.f32 %v3899_v56, %v1473_v17  ;;  %v4121_v57 = vadd.f32 %v5143_v55, %v5144_v0  ;;  %v1475_v62 = vmul.f32 %v3885_v31, %v1453_v59  ;;  %v800_v23 = vadd.f32 1.0, %v5145_v43 }
 0x215   : > { %3029 = vrcp.f32 %v1557_v4  ;;  %v2625_v49 = vmul.f32 -1.442695, %v4109_v3  ;;  %v2595_v1 = vmul.f32 -1.442695, %v5146_v21  ;;  %v4129_v34 = vadd.f32 %v5143_v55, %v637_v6 }
 0x216   : > { %3031 = vpow2.f32 %v2623_v5  ;;  %v2624_v10 = vmul.f32 -1.442695, %v4113_v58  ;;  %v4132_v13 = vadd.f32 %v3899_v56, %v1475_v62  ;;  %v2600_v15 = vmul.f32 -1.442695, %v4117_v7  ;;  %v5151_v5 = vld [vmem:[#allocation20_spill] sm:$0xff]  ;;  %v5154_v62 = vld [vmem:[#allocation35_spill] sm:$0xff] }
 0x217   : > { %3033 = vpow2.f32 %v2625_v49  ;;  %v635_v14 = vmul.f32 %v5140_v46, %v5147_v38  ;;  %v2598_v45 = vmul.f32 -1.442695, %v4121_v57  ;;  %v2601_v12 = vmul.f32 -1.442695, %v4129_v34 }
 0x218   : > { %v3020_v54 = vpop.eup %3019  ;;  %3035 = vpow2.f32 %v2624_v10  ;;  %v2626_v37 = vmul.f32 -1.442695, %v4132_v13  ;;  %v1024_v59 = vmul.f32 %v3717_v18, %v4032_v53 }
 0x219   : > { %3037 = vrcp.f32 %v800_v23  ;;  %v4141_v9 = vmul.f32 %v3020_v54, %v4007_v24  ;;  %v4147_v20 = vadd.f32 %v5143_v55, %v635_v14  ;;  %v640_v24 = vmul.f32 %v5150_v44, %v5140_v46  ;;  %v5155_v23 = vld [vmem:[#allocation37_spill] sm:$0xff]  ;;  %v5157_v54 = vld [vmem:[#allocation26_spill] sm:$0xff] }
 0x21a   : > { %v3022_v35 = vpop.eup %3021  ;;  %3039 = vpow2.f32 %v2595_v1  ;;  %v1076_v53 = vmul.f32 %v3727_v29, %v5155_v23  ;;  %v4188_v1 = vld [vmem:[%s5062_s2] ss:$0 sm:$0xff] }
 0x21b   : > { %v3024_v11 = vpop.eup %3023  ;;  %v4144_v40 = vmul.f32 %v3022_v35, %v4014_v26  ;;  %3041 = vpow2.f32 %v2626_v37  ;;  %v1023_v26 = vmul.f32 %v3717_v18, %v4020_v25  ;;  %v1075_v25 = vmul.f32 %v3727_v29, %v5154_v62  ;;  %5156 = vst [vmem:[#allocation17_spill] sm:$0xff] %v4188_v1  ;;  %v5158_v44 = vld [vmem:[#allocation21_spill] sm:$0xff] }
 0x21c   : > { %v3026_v2 = vpop.eup %3025  ;;  %3043 = vpow2.f32 %v2600_v15  ;;  %v4166_v0 = vmul.f32 %v3024_v11, %v4018_v16  ;;  %v2599_v49 = vmul.f32 -1.442695, %v4147_v20  ;;  %v4180_v16 = vld [vmem:[%s5063_s3] ss:$0 sm:$0xff]  ;;  %v638_v15 = vmul.f32 %v4188_v1, %v5157_v54  ;;  %v5161_v54 = vld [vmem:[#allocation31_spill] sm:$0xff] }
 0x21d   : > { %5148 = vst [vmem:[#allocation16_spill] sm:$0xff] %v4144_v40  ;;  %v2729_v22 = vpack.c.bf16 %v4144_v40, %v4141_v9  ;;  %v4152_v17 = vmul.f32 %v3026_v2, %v5149_v47  ;;  %3045 = vpow2.f32 %v2598_v45  ;;  %v3028_v6 = vpop.eup %3027  ;;  %v1091_v37 = vadd.f32 %v1075_v25, %v1023_v26 }
 0x21e   : > { %3047 = vpow2.f32 %v2601_v12  ;;  %v4163_v63 = vmul.f32 %v3028_v6, %v5151_v5  ;;  %5152 = vst [vmem:[#allocation22_spill] sm:$0xff] %v4166_v0  ;;  %v1127_v45 = vmul.f32 %v3733_v42, %v4034_v51  ;;  %v1092_v11 = vadd.f32 %v1076_v53, %v1024_v59  ;;  %v5159_v6 = vld [vmem:[#allocation27_spill] sm:$0xff]  ;;  %v5160_v53 = vld [vmem:[#allocation28_spill] sm:$0xff] }
 0x21f   : > { %v3030_v4 = vpop.eup %3029  ;;  %2801 = vst [vmem:[%s4089_s24 + $0x8] sm:$0xff] %v2729_v22   ;;  %969 = vst [vmem:[#allocation2 + $0x108] sm:$0xff] %v4152_v17  ;;  %v1281_v47 = vmul.f32 %v3782_v39, %v4034_v51  ;;  %v641_v26 = vmul.f32 %v4188_v1, %v5159_v6  ;;  %v4206_v59 = vadd.f32 %v4180_v16, %v638_v15 }
 0x220   : > { %v3032_v55 = vpop.eup %3031  ;;  %v4169_v46 = vmul.f32 %v3030_v4, %v4044_v60  ;;  %967 = vst [vmem:[#allocation2 + $0xe8] sm:$0xff] %v4163_v63  ;;  %v4183_v60 = vadd.f32 %v4180_v16, %v640_v24  ;;  %v1128_v25 = vmul.f32 %v3733_v42, %v4083_v48  ;;  %v1143_v51 = vadd.f32 %v1127_v45, %v1091_v37 }
 0x221   : > { %v3034_v43 = vpop.eup %3033  ;;  %v1558_v10 = vadd.f32 1.0, %v3032_v55  ;;  %v1297_v23 = vadd.f32 %v1281_v47, %v4087_v30  ;;  %v644_v15 = vmul.f32 %v4188_v1, %v5161_v54  ;;  %v4219_v45 = vadd.f32 %v4180_v16, %v641_v26 }
 0x222   : > { %5153 = vst [vmem:[#allocation29_spill] sm:$0xff] %v4169_v46  ;;  %v3036_v38 = vpop.eup %3035  ;;  %v2734_v14 = vpack.c.bf16 %v4169_v46, %v4166_v0  ;;  %v1560_v35 = vadd.f32 1.0, %v3034_v43  ;;  %v2604_v55 = vmul.f32 -1.442695, %v4183_v60 }
 0x223   : > { %v3038_v12 = vpop.eup %3037  ;;  %v1559_v2 = vadd.f32 1.0, %v3036_v38  ;;  %3049 = vrcp.f32 %v1558_v10  ;;  %v639_v10 = vmul.f32 %v4188_v1, %v5160_v53  ;;  %5162 = vst [vmem:[#allocation30_spill] sm:$0xff] %v4219_v45 }
 0x224   : > { %v3040_v22 = vpop.eup %3039  ;;  %2802 = vst [vmem:[%s4089_s24 + $0x10] sm:$0xff] %v2734_v14   ;;  %v4200_v24 = vmul.f32 %v3038_v12, %v5158_v44  ;;  %3051 = vpow2.f32 %v2599_v49  ;;  %v5163_v44 = vld [vmem:[#allocation32_spill] sm:$0xff] }
 0x225   : > { %v3042_v4 = vpop.eup %3041  ;;  %3053 = vrcp.f32 %v1559_v2  ;;  %v798_v5 = vadd.f32 1.0, %v3040_v22  ;;  %v2602_v2 = vmul.f32 -1.442695, %v4206_v59  ;;  %v1231_v22 = vmul.f32 %v3770_v27, %v4163_v63 }
 0x226   : > { %v3044_v62 = vpop.eup %3043  ;;  %v1561_v43 = vadd.f32 1.0, %v3042_v4  ;;  %3055 = vrcp.f32 %v1560_v35  ;;  %970 = vst [vmem:[#allocation2 + $0x110] sm:$0xff] %v4200_v24  ;;  %v642_v6 = vmul.f32 %v4188_v1, %v5163_v44 }
 0x227   : > { %v3046_v49 = vpop.eup %3045  ;;  %3057 = vrcp.f32 %v798_v5  ;;  %v4216_v14 = vld [vmem:[#allocation2 + $0xe7] sm:$0xff]  ;;  %v803_v12 = vadd.f32 1.0, %v3044_v62  ;;  %v1386_v5 = vmul.f32 %v3773_v28, %v4163_v63  ;;  %v1282_v62 = vmul.f32 %v3782_v39, %v4083_v48 }
 0x228   : > { %v3048_v38 = vpop.eup %3047  ;;  %3059 = vrcp.f32 %v1561_v43  ;;  %v801_v37 = vadd.f32 1.0, %v3046_v49  ;;  %v1179_v35 = vmul.f32 %v3767_v36, %v4216_v14  ;;  %v1334_v30 = vmul.f32 %v3778_v32, %v4216_v14  ;;  %v5165_v49 = vld [vmem:[#allocation36_spill] sm:$0xff] }
 0x229   : > { %3061 = vpow2.f32 %v2604_v55  ;;  %v804_v47 = vadd.f32 1.0, %v3048_v38  ;;  %v5164_v55 = vld [vmem:[#allocation33_spill] sm:$0xff]  ;;  %v643_v53 = vmul.f32 %v4188_v1, %v5165_v49 }
 0x22a   : > { %3063 = vrcp.f32 %v803_v12  ;;  %v1195_v4 = vadd.f32 %v1179_v35, %v1143_v51  ;;  %v1350_v26 = vadd.f32 %v1334_v30, %v1297_v23  ;;  %v645_v43 = vmul.f32 %v4188_v1, %v5164_v55 }
 0x22b   : > { %3065 = vrcp.f32 %v801_v37  ;;  %v4243_v51 = vadd.f32 %v4180_v16, %v639_v10  ;;  %v4246_v23 = vadd.f32 %v4180_v16, %v644_v15  ;;  %v4248_v35 = vadd.f32 %v1128_v25, %v1092_v11 }
 0x22c   : > { %3067 = vrcp.f32 %v804_v47  ;;  %v4238_v38 = vadd.f32 %v1231_v22, %v1195_v4  ;;  %v4240_v12 = vadd.f32 %v1386_v5, %v1350_v26  ;;  %v4251_v30 = vadd.f32 %v1282_v62, %v4104_v41 }
 0x22d   : > { %v3050_v54 = vpop.eup %3049  ;;  %5166 = vst [vmem:[#allocation34_spill] sm:$0xff] %v4243_v51  ;;  %5167 = vst [vmem:[#allocation24_spill] sm:$0xff] %v4246_v23  ;;  %3069 = vpow2.f32 %v2602_v2  ;;  %v4254_v47 = vmul.f32 -1.442695, %v4219_v45  ;;  %v4257_v22 = vadd.f32 %v4180_v16, %v642_v6  ;;  %v1161_v2 = vld [vmem:[#allocation2 + $0x107] sm:$0xff]  ;;  %v4266_v11 = vadd.f32 %v4180_v16, %v645_v43  ;;  %v4327_v0 = vld [vmem:[#allocation2 + $0x10f] sm:$0xff] }
 0x22e   : > { %v3052_v37 = vpop.eup %3051  ;;  %v4260_v10 = vmul.f32 %v3050_v54, %v4099_v52  ;;  %v4269_v41 = vadd.f32 %v4180_v16, %v643_v53  ;;  %v4273_v6 = vmul.f32 %v3770_v27, %v4152_v17  ;;  %v4277_v52 = vmul.f32 %v3773_v28, %v4152_v17 }
 0x22f   : > { %v3054_v48 = vpop.eup %3053  ;;  %5168 = vst [vmem:[#allocation23_spill] sm:$0xff] %v4257_v22  ;;  %5171 = vst [vmem:[#allocation20_spill] sm:$0xff] %v4266_v11  ;;  %v4283_v4 = vmul.f32 -1.442695, %v4246_v23  ;;  %v1783_v62 = vmul.f32 %v3727_v29, %v4152_v17  ;;  %v1077_v55 = vmul.f32 %v3727_v29, %v4163_v63  ;;  %v1265_v17 = vld [vmem:[#allocation2 + $0x109] sm:$0xff] }
 0x230   : > { %v3056_v44 = vpop.eup %3055  ;;  %5169 = vst [vmem:[#allocation19_spill] sm:$0xff] %v4260_v10  ;;  %v4263_v15 = vmul.f32 %v3054_v48, %v4113_v58  ;;  %5172 = vst [vmem:[#allocation35_spill] sm:$0xff] %v4269_v41  ;;  %v4280_v58 = vmul.f32 -1.442695, %v4243_v51  ;;  %v1735_v48 = vmul.f32 %v1161_v2, %v3717_v18  ;;  %v5179_v63 = vld [vmem:[#allocation38_spill] sm:$0xff] }
 0x231   : > { %v3058_v25 = vpop.eup %3057  ;;  %5173 = vst [vmem:[#allocation37_spill] sm:$0xff] %v4283_v4  ;;  %v4295_v53 = vmul.f32 %v3056_v44, %v4109_v3  ;;  %v4310_v3 = vmul.f32 -1.442695, %v4269_v41  ;;  %v646_v44 = vmul.f32 %v4188_v1, %v5179_v63 }
 0x232   : > { %5170 = vst [vmem:[#allocation25_spill] sm:$0xff] %v4263_v15  ;;  %v3060_v26 = vpop.eup %3059  ;;  %v2739_v5 = vpack.c.bf16 %v4263_v15, %v4260_v10  ;;  %v4292_v43 = vmul.f32 %v3058_v25, %v5146_v21  ;;  %v4302_v15 = vmul.f32 -1.442695, %v4257_v22  ;;  %v4307_v21 = vmul.f32 -1.442695, %v4266_v11  ;;  %v5180_v11 = vld [vmem:[#allocation39_spill] sm:$0xff] }
 0x233   : > { %v3062_v49 = vpop.eup %3061  ;;  %5174 = vst [vmem:[#allocation26_spill] sm:$0xff] %v4295_v53  ;;  %v4298_v54 = vmul.f32 %v3060_v26, %v4132_v13  ;;  %5178 = vst [vmem:[#allocation31_spill] sm:$0xff] %v4310_v3  ;;  %v648_v13 = vmul.f32 %v4188_v1, %v4026_v19  ;;  %v4325_v41 = vmul.f32 %v4188_v1, %v5180_v11 }
 0x234   : > { %5176 = vst [vmem:[#allocation27_spill] sm:$0xff] %v4302_v15  ;;  %v3064_v10 = vpop.eup %3063  ;;  %2803 = vst [vmem:[%s4089_s24 + $0x18] sm:$0xff] %v2739_v5   ;;  %v1025_v5 = vmul.f32 %v3717_v18, %v4216_v14  ;;  %v4331_v19 = vmul.f32 %v3770_v27, %v4200_v24  ;;  %v1696_v14 = vadd.f32 %v4077_v33, %v4067_v8  ;;  %v807_v22 = vadd.f32 1.0, %v3062_v49 }
 0x235   : > { %5175 = vst [vmem:[#allocation21_spill] sm:$0xff] %v4298_v54  ;;  %968 = vst [vmem:[#allocation2 + $0xf0] sm:$0xff] %v4292_v43  ;;  %v3066_v25 = vpop.eup %3065  ;;  %v2744_v26 = vpack.c.bf16 %v4298_v54, %v4295_v53  ;;  %v4321_v46 = vmul.f32 %v3064_v10, %v4117_v7  ;;  %v802_v54 = vadd.f32 1.0, %v3052_v37  ;;  %v1799_v7 = vadd.f32 %v1783_v62, %v1735_v48  ;;  %v4339_v10 = vld [vmem:[#allocation2 + $0x111] sm:$0xff] }
 0x236   : > { %5177 = vst [vmem:[#allocation28_spill] sm:$0xff] %v4307_v21  ;;  %v3068_v3 = vpop.eup %3067  ;;  %v4334_v63 = vmul.f32 %v3066_v25, %v4121_v57  ;;  %v1831_v11 = vmul.f32 %v1265_v17, %v3733_v42  ;;  %v1181_v57 = vmul.f32 %v3767_v36, %v1161_v2  ;;  %v1336_v37 = vmul.f32 %v3778_v32, %v1161_v2 }
 0x237   : > { %2804 = vst [vmem:[%s4089_s24 + $0x20] sm:$0xff] %v2744_v26   ;;  %973 = vst [vmem:[#allocation2 + $0x148] sm:$0xff] %v4321_v46  ;;  %v4344_v53 = vmul.f32 %v3068_v3, %v4129_v34  ;;  %v3070_v23 = vpop.eup %3069  ;;  %v1389_v8 = vmul.f32 %v3773_v28, %v4200_v24  ;;  %v4352_v33 = vadd.f32 %v4180_v16, %v648_v13  ;;  %3071 = vrcp.f32 %v802_v54 }
 0x238   : > { %971 = vst [vmem:[#allocation2 + $0x128] sm:$0xff] %v4334_v63  ;;  %v1093_v62 = vadd.f32 %v1077_v55, %v1025_v5  ;;  %v1285_v48 = vmul.f32 %v3782_v39, %v1265_v17  ;;  %v1337_v34 = vmul.f32 %v3778_v32, %v4327_v0  ;;  %v4359_v49 = vadd.f32 %v4180_v16, %v646_v44 }
 0x239   : > { %5181 = vst [vmem:[#allocation32_spill] sm:$0xff] %v4344_v53  ;;  %5182 = vst [vmem:[#allocation33_spill] sm:$0xff] %v4352_v33  ;;  %v1440_v2 = vmul.f32 %v3857_v50, %v1265_v17  ;;  %v4364_v3 = vmul.f32 %v3857_v50, %v4339_v10  ;;  %v4367_v13 = vadd.f32 %v1696_v14, %v4141_v9  ;;  %3073 = vrcp.f32 %v807_v22 }
 0x23a   : > { %974 = vst [vmem:[#allocation2 + $0x150] sm:$0xff] %v4344_v53  ;;  %5183 = vst [vmem:[#allocation36_spill] sm:$0xff] %v4359_v49  ;;  %v4371_v55 = vmul.f32 %v4327_v0, %v3717_v18  ;;  %v1847_v25 = vadd.f32 %v1831_v11, %v1799_v7  ;;  %v805_v44 = vadd.f32 1.0, %v3070_v23  ;;  %v1078_v17 = vmul.f32 %v3727_v29, %v4292_v43 }
 0x23b   : > { %5184 = vst [vmem:[#allocation38_spill] sm:$0xff] %v4367_v13  ;;  %v1232_v14 = vmul.f32 %v3770_v27, %v4292_v43  ;;  %v1387_v13 = vmul.f32 %v3773_v28, %v4292_v43  ;;  %3075 = vpow2.f32 %v4254_v47 }
 0x23c   : > { %v1006_v26 = vld [vmem:[#allocation2 + $0xef] sm:$0xff]  ;;  %3077 = vrcp.f32 %v805_v44 }
 0x23d   : > { %v1109_v5 = vld [vmem:[#allocation2 + $0xe9] sm:$0xff]  ;;  %v1026_v21 = vmul.f32 %v3717_v18, %v1006_v26  ;;  %v1180_v54 = vmul.f32 %v3767_v36, %v1006_v26  ;;  %v1110_v9 = vld [vmem:[#allocation2 + $0xf1] sm:$0xff]  ;;  %v1335_v7 = vmul.f32 %v3778_v32, %v1006_v26  ;;  %3079 = vpow2.f32 %v4280_v58 }
 0x23e   : > { %v1129_v51 = vmul.f32 %v3733_v42, %v1109_v5  ;;  %v1283_v45 = vmul.f32 %v3782_v39, %v1109_v5  ;;  %v1438_v22 = vmul.f32 %v3857_v50, %v1109_v5  ;;  %v1284_v5 = vmul.f32 %v3782_v39, %v1110_v9 }
 0x23f   : > { %v1196_v11 = vadd.f32 %v1180_v54, %v4248_v35  ;;  %v1351_v15 = vadd.f32 %v1335_v7, %v4251_v30  ;;  %v1094_v4 = vadd.f32 %v1078_v17, %v1026_v21  ;;  %v1439_v35 = vmul.f32 %v3857_v50, %v1110_v9  ;;  %v1318_v54 = vld [vmem:[#allocation2 + $0x127] sm:$0xff] }
 0x240   : > { %v1145_v23 = vadd.f32 %v1129_v51, %v1093_v62  ;;  %v1299_v40 = vadd.f32 %v1283_v45, %v4238_v38  ;;  %v1454_v53 = vadd.f32 %v1438_v22, %v4240_v12  ;;  %v1390_v38 = vmul.f32 %v3773_v28, %v4334_v63  ;;  %v1723_v22 = vld [vmem:[#allocation2 + $0x147] sm:$0xff] }
 0x241   : > { %v1248_v26 = vadd.f32 %v1232_v14, %v1196_v11  ;;  %v1403_v62 = vadd.f32 %v1387_v13, %v1351_v15  ;;  %v1130_v12 = vmul.f32 %v3733_v42, %v1110_v9  ;;  %v3072_v50 = vpop.eup %3071  ;;  %v1928_v14 = vmul.f32 %v3770_v27, %v4334_v63 }
 0x242   : > { %v1197_v1 = vadd.f32 %v1181_v57, %v1145_v23  ;;  %v1352_v51 = vadd.f32 %v1336_v37, %v1299_v40  ;;  %v1476_v43 = vmul.f32 %v3885_v31, %v1454_v53  ;;  %v1338_v57 = vmul.f32 %v3778_v32, %v1318_v54 }
 0x243   : > { %v1300_v47 = vadd.f32 %v1284_v5, %v1248_v26  ;;  %v1455_v21 = vadd.f32 %v1439_v35, %v1403_v62  ;;  %v1146_v37 = vadd.f32 %v1130_v12, %v1094_v4  ;;  %v4435_v35 = vadd.f32 %v4180_v16, %v4325_v41  ;;  %v4448_v41 = vld [vmem:[#allocation2 + $0x149] sm:$0xff] }
 0x244   : > { %v1249_v45 = vadd.f32 %v4273_v6, %v1197_v1  ;;  %v1404_v30 = vadd.f32 %v4277_v52, %v1352_v51  ;;  %v4400_v40 = vadd.f32 %v3899_v56, %v1476_v43  ;;  %v1880_v1 = vmul.f32 %v1318_v54, %v3767_v36  ;;  %v3074_v6 = vpop.eup %3073 }
 0x245   : > { %v1353_v15 = vadd.f32 %v1337_v34, %v1300_v47  ;;  %v1477_v58 = vmul.f32 %v3885_v31, %v1455_v21  ;;  %v3076_v4 = vpop.eup %3075  ;;  %v4426_v51 = vmul.f32 -1.442695, %v4352_v33  ;;  %v1286_v43 = vmul.f32 %v3782_v39, %v4339_v10  ;;  %v4526_v33 = vld [vmem:[%s5065_s5] ss:$0 sm:$0xff] }
 0x246   : > { %v1301_v53 = vadd.f32 %v1285_v48, %v1249_v45  ;;  %v1456_v13 = vadd.f32 %v1440_v2, %v1404_v30  ;;  %v2627_v44 = vmul.f32 -1.442695, %v4400_v40  ;;  %v1896_v9 = vadd.f32 %v1880_v1, %v1847_v25  ;;  %v3078_v11 = vpop.eup %3077  ;;  %v5185_v1 = vld [vmem:[#allocation17_spill] sm:$0xff] }
 0x247   : > { %v1405_v17 = vadd.f32 %v1389_v8, %v1353_v15  ;;  %v1182_v48 = vmul.f32 %v3767_v36, %v4327_v0  ;;  %v4412_v7 = vadd.f32 %v3899_v56, %v1477_v58  ;;  %v1784_v2 = vmul.f32 %v3727_v29, %v4200_v24 }
 0x248   : > { %v1354_v52 = vadd.f32 %v1338_v57, %v1301_v53  ;;  %v1478_v34 = vmul.f32 %v3885_v31, %v1456_v13  ;;  %3081 = vpow2.f32 %v2627_v44  ;;  %v4419_v23 = vadd.f32 %v1928_v14, %v1896_v9  ;;  %v5187_v13 = vld [vmem:[#allocation32_spill] sm:$0xff] }
 0x249   : > { %v1457_v8 = vadd.f32 %v4364_v3, %v1405_v17  ;;  %v1198_v26 = vadd.f32 %v1182_v48, %v1146_v37  ;;  %v2628_v5 = vmul.f32 -1.442695, %v4412_v7  ;;  %v1800_v62 = vadd.f32 %v1784_v2, %v4371_v55  ;;  %v1724_v37 = vld [vmem:[#allocation2 + $0x14f] sm:$0xff] }
 0x24a   : > { %v4417_v25 = vadd.f32 %v1390_v38, %v1354_v52  ;;  %v4422_v0 = vadd.f32 %v3899_v56, %v1478_v34  ;;  %v4431_v3 = vmul.f32 -1.442695, %v4359_v49  ;;  %v1739_v45 = vmul.f32 %v1723_v22, %v3717_v18  ;;  %v3080_v38 = vpop.eup %3079 }
 0x24b   : > { %v1479_v24 = vmul.f32 %v3885_v31, %v1457_v8  ;;  %3083 = vpow2.f32 %v2628_v5  ;;  %v1832_v55 = vmul.f32 %v4339_v10, %v3733_v42  ;;  %v1787_v12 = vmul.f32 %v3727_v29, %v4321_v46  ;;  %v5189_v5 = vld [vmem:[#allocation16_spill] sm:$0xff] }
 0x24c   : > { %v2629_v47 = vmul.f32 -1.442695, %v4422_v0  ;;  %v898_v30 = vmul.f32 %v3072_v50, %v4147_v20  ;;  %v1250_v21 = vadd.f32 %v4331_v19, %v1198_v26  ;;  %v4453_v15 = vmul.f32 %v3074_v6, %v4183_v60 }
 0x24d   : > { %v4444_v31 = vadd.f32 %v3899_v56, %v1479_v24  ;;  %v4456_v53 = vmul.f32 %v3078_v11, %v4206_v59  ;;  %v1848_v10 = vadd.f32 %v1832_v55, %v1800_v62  ;;  %v4461_v57 = vmul.f32 %v3770_v27, %v4321_v46  ;;  %v5186_v59 = vld [vmem:[#allocation37_spill] sm:$0xff]  ;;  %v5190_v62 = vld [vmem:[#allocation38_spill] sm:$0xff] }
 0x24e   : > { %3085 = vpow2.f32 %v2629_v47  ;;  %972 = vst [vmem:[#allocation2 + $0x130] sm:$0xff] %v898_v30  ;;  %v4465_v20 = vmul.f32 %v5185_v1, %v4069_v61  ;;  %v1803_v50 = vadd.f32 %v1787_v12, %v1739_v45  ;;  %v1737_v19 = vmul.f32 %v1318_v54, %v3717_v18  ;;  %977 = vst [vmem:[#allocation2 + $0x188] sm:$0xff] %v4453_v15 }
 0x24f   : > { %v2630_v56 = vmul.f32 -1.442695, %v4444_v31  ;;  %v1835_v60 = vmul.f32 %v4448_v41, %v3733_v42  ;;  %975 = vst [vmem:[#allocation2 + $0x168] sm:$0xff] %v4456_v53  ;;  %3087 = vpow2.f32 %v5186_v59  ;;  %v4475_v6 = vmul.f32 %v3773_v28, %v4321_v46  ;;  %v5188_v46 = vld [vmem:[#allocation27_spill] sm:$0xff] }
 0x250   : > { %v1785_v61 = vmul.f32 %v3727_v29, %v4334_v63  ;;  %v4481_v54 = vmul.f32 %v3727_v29, %v5187_v13  ;;  %v4485_v44 = vmul.f32 %v3770_v27, %v5187_v13  ;;  %v4489_v17 = vmul.f32 %v3773_v28, %v5187_v13 }
 0x251   : > { %3089 = vpow2.f32 %v2630_v56  ;;  %v808_v52 = vadd.f32 1.0, %v3076_v4  ;;  %v1882_v63 = vmul.f32 %v1723_v22, %v3767_v36  ;;  %v4494_v14 = vmul.f32 %v1723_v22, %v3778_v32 }
 0x252   : > { %v3082_v58 = vpop.eup %3081  ;;  %3091 = vpow2.f32 %v5188_v46  ;;  %v806_v48 = vadd.f32 1.0, %v3080_v38  ;;  %v1801_v34 = vadd.f32 %v1785_v61, %v1737_v19  ;;  %v4497_v2 = vmul.f32 %v1724_v37, %v3717_v18  ;;  %v4514_v19 = vld [vmem:[#allocation8 + $0x8] ss:$0 sm:$0xff] }
 0x253   : > { %v1562_v9 = vadd.f32 1.0, %v3082_v58  ;;  %v4499_v8 = vadd.f32 %v1835_v60, %v1803_v50  ;;  %v1883_v11 = vmul.f32 %v1724_v37, %v3767_v36  ;;  %v4504_v4 = vmul.f32 %v4448_v41, %v3782_v39 }
 0x254   : > { %v1302_v26 = vadd.f32 %v1286_v43, %v1250_v21  ;;  %v4508_v24 = vadd.f32 %v5190_v62, %v5189_v5  ;;  %v1391_v45 = vmul.f32 %v3773_v28, %v898_v30  ;;  %v1786_v12 = vmul.f32 %v3727_v29, %v898_v30 }
 0x255   : > { %3093 = vrcp.f32 %v1562_v9  ;;  %v3084_v22 = vpop.eup %3083  ;;  %v1319_v47 = vld [vmem:[#allocation2 + $0x12f] sm:$0xff]  ;;  %v1929_v56 = vmul.f32 %v3770_v27, %v898_v30 }
 0x256   : > { %v1422_v38 = vld [vmem:[#allocation2 + $0x129] sm:$0xff]  ;;  %v1423_v55 = vld [vmem:[#allocation2 + $0x131] sm:$0xff]  ;;  %3095 = vrcp.f32 %v808_v52  ;;  %v1563_v1 = vadd.f32 1.0, %v3084_v22  ;;  %v1339_v50 = vmul.f32 %v3778_v32, %v1319_v47  ;;  %v1738_v59 = vmul.f32 %v1319_v47, %v3717_v18 }
 0x257   : > { %v1442_v43 = vmul.f32 %v4514_v19, %v1422_v38  ;;  %3097 = vrcp.f32 %v806_v48  ;;  %v1443_v60 = vmul.f32 %v4514_v19, %v1423_v55  ;;  %v1833_v61 = vmul.f32 %v1422_v38, %v3733_v42 }
 0x258   : > { %v3086_v21 = vpop.eup %3085  ;;  %v1881_v13 = vmul.f32 %v1319_v47, %v3767_v36  ;;  %3099 = vrcp.f32 %v1563_v1  ;;  %v1355_v30 = vadd.f32 %v1339_v50, %v1302_v26  ;;  %v1802_v9 = vadd.f32 %v1786_v12, %v1738_v59  ;;  %v4530_v50 = vld [vmem:[#allocation2 + $0x151] sm:$0xff] }
 0x259   : > { %v1564_v58 = vadd.f32 1.0, %v3086_v21  ;;  %v1458_v52 = vadd.f32 %v1442_v43, %v4417_v25  ;;  %v3088_v46 = vpop.eup %3087  ;;  %v1834_v5 = vmul.f32 %v1423_v55, %v3733_v42  ;;  %v1849_v62 = vadd.f32 %v1833_v61, %v1801_v34  ;;  %v4537_v21 = vld [vmem:[%s5066_s6] ss:$0 sm:$0xff] }
 0x25a   : > { %v1897_v48 = vadd.f32 %v1881_v13, %v1848_v10  ;;  %v1407_v49 = vadd.f32 %v1391_v45, %v1355_v30  ;;  %v1976_v26 = vmul.f32 %v1422_v38, %v3782_v39  ;;  %v1977_v10 = vmul.f32 %v1423_v55, %v3782_v39  ;;  %v1725_v55 = vld [vmem:[#allocation2 + $0x167] sm:$0xff] }
 0x25b   : > { %v3090_v22 = vpop.eup %3089  ;;  %3101 = vrcp.f32 %v1564_v58  ;;  %v1480_v47 = vmul.f32 %v4526_v33, %v1458_v52  ;;  %v1850_v12 = vadd.f32 %v1834_v5, %v1802_v9  ;;  %v2026_v34 = vmul.f32 %v1724_v37, %v3778_v32 }
 0x25c   : > { %v3092_v1 = vpop.eup %3091  ;;  %v1565_v25 = vadd.f32 1.0, %v3090_v22  ;;  %v1945_v43 = vadd.f32 %v1929_v56, %v1897_v48  ;;  %v1459_v45 = vadd.f32 %v1443_v60, %v1407_v49  ;;  %v1992_v38 = vadd.f32 %v1976_v26, %v4419_v23 }
 0x25d   : > { %v4540_v59 = vadd.f32 %v4537_v21, %v1480_v47  ;;  %v2121_v61 = vmul.f32 %v4514_v19, %v4448_v41  ;;  %v1898_v56 = vadd.f32 %v1882_v63, %v1849_v62  ;;  %v2122_v49 = vmul.f32 %v4514_v19, %v4530_v50 }
 0x25e   : > { %3103 = vrcp.f32 %v1565_v25  ;;  %v1993_v13 = vadd.f32 %v1977_v10, %v1945_v43  ;;  %v1481_v37 = vmul.f32 %v4526_v33, %v1459_v45  ;;  %v2041_v30 = vadd.f32 %v4494_v14, %v1992_v38 }
 0x25f   : > { %v3094_v58 = vpop.eup %3093  ;;  %v2631_v60 = vmul.f32 -1.442695, %v4540_v59  ;;  %v1899_v9 = vadd.f32 %v1883_v11, %v1850_v12  ;;  %v1932_v5 = vmul.f32 %v3770_v27, %v4456_v53  ;;  %v2075_v41 = vmul.f32 %v3773_v28, %v4456_v53 }
 0x260   : > { %v3096_v52 = vpop.eup %3095  ;;  %v2042_v23 = vadd.f32 %v2026_v34, %v1993_v13  ;;  %v4555_v62 = vadd.f32 %v4537_v21, %v1481_v37  ;;  %v2089_v48 = vadd.f32 %v4475_v6, %v2041_v30  ;;  %v1884_v22 = vmul.f32 %v1725_v55, %v3767_v36  ;;  %v5191_v34 = vld [vmem:[#allocation30_spill] sm:$0xff] }
 0x261   : > { %v3098_v63 = vpop.eup %3097  ;;  %3105 = vpow2.f32 %v2631_v60  ;;  %v4560_v14 = vmul.f32 %v3094_v58, %v4400_v40  ;;  %v1946_v47 = vadd.f32 %v4461_v57, %v1898_v56  ;;  %v2027_v26 = vmul.f32 %v1725_v55, %v3778_v32  ;;  %v1727_v58 = vld [vmem:[#allocation2 + $0x187] sm:$0xff] }
 0x262   : > { %v2090_v11 = vadd.f32 %v4489_v17, %v2042_v23  ;;  %v3100_v25 = vpop.eup %3099  ;;  %v2632_v12 = vmul.f32 -1.442695, %v4555_v62  ;;  %v2137_v43 = vadd.f32 %v2121_v61, %v2089_v48  ;;  %v1900_v10 = vadd.f32 %v1884_v22, %v4499_v8  ;;  %v5192_v17 = vld [vmem:[#allocation34_spill] sm:$0xff] }
 0x263   : > { %v4568_v45 = vmul.f32 %v3096_v52, %v5191_v34  ;;  %v4571_v6 = vmul.f32 %v3100_v25, %v4412_v7  ;;  %v1994_v38 = vadd.f32 %v4504_v4, %v1946_v47  ;;  %v902_v13 = vmul.f32 %v3098_v63, %v5192_v17  ;;  %v5193_v52 = vld [vmem:[#allocation28_spill] sm:$0xff] }
 0x264   : > { %v2138_v40 = vadd.f32 %v2122_v49, %v2090_v11  ;;  %3107 = vpow2.f32 %v2632_v12  ;;  %v2153_v56 = vmul.f32 %v4526_v33, %v2137_v43  ;;  %v4576_v61 = vadd.f32 %v1932_v5, %v1900_v10 }
 0x265   : > { %v3102_v57 = vpop.eup %3101  ;;  %978 = vst [vmem:[#allocation2 + $0x190] sm:$0xff] %v4568_v45  ;;  %v811_v8 = vadd.f32 1.0, %v3088_v46  ;;  %v2749_v7 = vpack.c.bf16 %v4571_v6, %v4560_v14  ;;  %v2043_v37 = vadd.f32 %v2027_v26, %v1994_v38  ;;  %976 = vst [vmem:[#allocation2 + $0x170] sm:$0xff] %v902_v13  ;;  %v809_v4 = vadd.f32 1.0, %v3092_v1 }
 0x266   : > { %v2154_v49 = vmul.f32 %v4526_v33, %v2138_v40  ;;  %v1804_v60 = vadd.f32 %v4481_v54, %v4497_v2  ;;  %v4585_v30 = vadd.f32 %v4537_v21, %v2153_v56  ;;  %3109 = vpow2.f32 %v5193_v52 }
 0x267   : > { %v4590_v23 = vadd.f32 %v4180_v16, %v4465_v20  ;;  %2805 = vst [vmem:[%s4089_s24 + $0x28] sm:$0xff] %v2749_v7   ;;  %v1743_v63 = vmul.f32 %v1727_v58, %v3717_v18  ;;  %v4597_v1 = vadd.f32 %v2075_v41, %v2043_v37  ;;  %v1947_v54 = vadd.f32 %v4485_v44, %v1899_v9 }
 0x268   : > { %v3104_v46 = vpop.eup %3103  ;;  %v4594_v5 = vadd.f32 %v4537_v21, %v2154_v49  ;;  %v4601_v2 = vmul.f32 %v3102_v57, %v4422_v0  ;;  %v2649_v16 = vmul.f32 -1.442695, %v4585_v30  ;;  %3111 = vrcp.f32 %v811_v8 }
 0x269   : > { %v4604_v48 = vmul.f32 %v3104_v46, %v4444_v31  ;;  %v1836_v20 = vmul.f32 %v4530_v50, %v3733_v42  ;;  %v1741_v41 = vmul.f32 %v1725_v55, %v3717_v18  ;;  %3113 = vrcp.f32 %v809_v4 }
 0x26a   : > { %5194 = vst [vmem:[#allocation39_spill] sm:$0xff] %v4601_v2  ;;  %v2650_v22 = vmul.f32 -1.442695, %v4594_v5  ;;  %v1979_v31 = vmul.f32 %v4530_v50, %v3782_v39  ;;  %3115 = vpow2.f32 %v2649_v16  ;;  %v1791_v44 = vmul.f32 %v3727_v29, %v4453_v15 }
 0x26b   : > { %5195 = vst [vmem:[#allocation17_spill] sm:$0xff] %v4604_v48  ;;  %v3106_v11 = vpop.eup %3105  ;;  %v2754_v0 = vpack.c.bf16 %v4604_v48, %v4601_v2  ;;  %v1852_v9 = vadd.f32 %v1836_v20, %v1804_v60  ;;  %v1789_v26 = vmul.f32 %v3727_v29, %v4456_v53  ;;  %v1886_v12 = vmul.f32 %v1727_v58, %v3767_v36 }
 0x26c   : > { %v1566_v47 = vadd.f32 1.0, %v3106_v11  ;;  %3117 = vpow2.f32 %v2650_v22  ;;  %v4619_v25 = vld [vmem:[#allocation2 + $0x18f] sm:$0xff]  ;;  %v4622_v55 = vadd.f32 %v1791_v44, %v1743_v63  ;;  %v4627_v50 = vmul.f32 %v3770_v27, %v4453_v15 }
 0x26d   : > { %2806 = vst [vmem:[%s4089_s24 + $0x30] sm:$0xff] %v2754_v0   ;;  %v2077_v43 = vmul.f32 %v3773_v28, %v4453_v15  ;;  %v1726_v10 = vld [vmem:[#allocation2 + $0x16f] sm:$0xff]  ;;  %v2029_v40 = vmul.f32 %v1727_v58, %v3778_v32  ;;  %v1805_v38 = vadd.f32 %v1789_v26, %v1741_v41  ;;  %v4634_v53 = vmul.f32 %v3770_v27, %v4568_v45 }
 0x26e   : > { %v1821_v34 = vld [vmem:[#allocation2 + $0x169] sm:$0xff]  ;;  %v1790_v17 = vmul.f32 %v3727_v29, %v902_v13  ;;  %v1822_v57 = vld [vmem:[#allocation2 + $0x171] sm:$0xff]  ;;  %v3108_v56 = vpop.eup %3107  ;;  %v1887_v8 = vmul.f32 %v4619_v25, %v3767_v36  ;;  %v1933_v7 = vmul.f32 %v3770_v27, %v902_v13  ;;  %v1995_v49 = vadd.f32 %v1979_v31, %v1947_v54 }
 0x26f   : > { %v2076_v15 = vmul.f32 %v3773_v28, %v902_v13  ;;  %v1567_v37 = vadd.f32 1.0, %v3108_v56  ;;  %3119 = vrcp.f32 %v1566_v47  ;;  %v1823_v58 = vld [vmem:[#allocation2 + $0x189] sm:$0xff]  ;;  %v1742_v4 = vmul.f32 %v1726_v10, %v3717_v18  ;;  %v5196_v29 = vld [vmem:[#allocation24_spill] sm:$0xff] }
 0x270   : > { %v1837_v60 = vmul.f32 %v1821_v34, %v3733_v42  ;;  %v3110_v52 = vpop.eup %3109  ;;  %v2030_v46 = vmul.f32 %v4619_v25, %v3778_v32  ;;  %v1838_v63 = vmul.f32 %v1822_v57, %v3733_v42  ;;  %v1885_v16 = vmul.f32 %v1726_v10, %v3767_v36 }
 0x271   : > { %v1980_v20 = vmul.f32 %v1821_v34, %v3782_v39  ;;  %3121 = vrcp.f32 %v1567_v37  ;;  %v1806_v54 = vadd.f32 %v1790_v17, %v1742_v4  ;;  %v2028_v22 = vmul.f32 %v1726_v10, %v3778_v32  ;;  %v5197_v4 = vld [vmem:[#allocation23_spill] sm:$0xff] }
 0x272   : > { %v1853_v13 = vadd.f32 %v1837_v60, %v1805_v38  ;;  %v3112_v41 = vpop.eup %3111  ;;  %v2125_v11 = vmul.f32 %v4514_v19, %v1823_v58  ;;  %v1901_v0 = vadd.f32 %v1885_v16, %v1852_v9  ;;  %v2123_v44 = vmul.f32 %v4514_v19, %v1821_v34 }
 0x273   : > { %v1996_v31 = vadd.f32 %v1980_v20, %v4576_v61  ;;  %v3114_v47 = vpop.eup %3113  ;;  %v1854_v26 = vadd.f32 %v1838_v63, %v1806_v54  ;;  %v1981_v56 = vmul.f32 %v1822_v57, %v3782_v39  ;;  %v2044_v48 = vadd.f32 %v2028_v22, %v1995_v49 }
 0x274   : > { %v4654_v2 = vmul.f32 %v3112_v41, %v5196_v29  ;;  %v3116_v17 = vpop.eup %3115  ;;  %v1949_v38 = vadd.f32 %v1933_v7, %v1901_v0  ;;  %v2139_v10 = vadd.f32 %v2123_v44, %v4597_v1  ;;  %v4658_v60 = vmul.f32 %v3114_v47, %v5197_v4  ;;  %v4664_v1 = vld [vmem:[#allocation2 + $0x191] sm:$0xff] }
 0x275   : > { %v2045_v37 = vadd.f32 %v2029_v40, %v1996_v31  ;;  %v2233_v61 = vadd.f32 1.0, %v3116_v17  ;;  %v1902_v16 = vadd.f32 %v1886_v12, %v1853_v13  ;;  %v2092_v34 = vadd.f32 %v2076_v15, %v2044_v48 }
 0x276   : > { %v3118_v9 = vpop.eup %3117  ;;  %v2124_v63 = vmul.f32 %v4514_v19, %v1822_v57  ;;  %981 = vst [vmem:[#allocation2 + $0x1c8] sm:$0xff] %v4654_v2  ;;  %v1997_v20 = vadd.f32 %v1981_v56, %v1949_v38  ;;  %v2155_v54 = vmul.f32 %v4526_v33, %v2139_v10  ;;  %979 = vst [vmem:[#allocation2 + $0x1a8] sm:$0xff] %v4658_v60  ;;  %v812_v22 = vadd.f32 1.0, %v3110_v52 }
 0x277   : > { %v2234_v49 = vadd.f32 1.0, %v3118_v9  ;;  %v2093_v29 = vadd.f32 %v2077_v43, %v2045_v37  ;;  %3123 = vrcp.f32 %v2233_v61  ;;  %v1903_v40 = vadd.f32 %v1887_v8, %v1854_v26 }
 0x278   : > { %v2140_v7 = vadd.f32 %v2124_v63, %v2092_v34  ;;  %v2078_v48 = vmul.f32 %v3773_v28, %v4568_v45  ;;  %v2046_v12 = vadd.f32 %v2030_v46, %v1997_v20  ;;  %v1839_v13 = vmul.f32 %v1823_v58, %v3733_v42 }
 0x279   : > { %3125 = vrcp.f32 %v2234_v49  ;;  %v2141_v57 = vadd.f32 %v2125_v11, %v2093_v29  ;;  %v3120_v15 = vpop.eup %3119  ;;  %v1982_v43 = vmul.f32 %v1823_v58, %v3782_v39  ;;  %v4672_v0 = vadd.f32 %v4537_v21, %v2155_v54 }
 0x27a   : > { %v2156_v41 = vmul.f32 %v4526_v33, %v2140_v7  ;;  %v2126_v8 = vmul.f32 %v4514_v19, %v4664_v1  ;;  %v2094_v52 = vadd.f32 %v2078_v48, %v2046_v12  ;;  %v1950_v44 = vadd.f32 %v4627_v50, %v1902_v16  ;;  %v5200_v7 = vld [vmem:[#allocation29_spill] sm:$0xff] }
 0x27b   : > { %v2157_v31 = vmul.f32 %v4526_v33, %v2141_v57  ;;  %v3122_v46 = vpop.eup %3121  ;;  %v2651_v47 = vmul.f32 -1.442695, %v4672_v0  ;;  %3127 = vrcp.f32 %v812_v22  ;;  %v4683_v58 = vadd.f32 %v4634_v53, %v1903_v40  ;;  %v5198_v53 = vld [vmem:[#allocation22_spill] sm:$0xff]  ;;  %v5199_v40 = vld [vmem:[#allocation31_spill] sm:$0xff] }
 0x27c   : > { %v4679_v11 = vadd.f32 %v4537_v21, %v2156_v41  ;;  %v4686_v26 = vmul.f32 %v3120_v15, %v4540_v59  ;;  %v4689_v56 = vmul.f32 %v3122_v46, %v4555_v62  ;;  %v2142_v17 = vadd.f32 %v2126_v8, %v2094_v52  ;;  %v5201_v41 = vld [vmem:[#allocation19_spill] sm:$0xff] }
 0x27d   : > { %v4692_v50 = vadd.f32 %v4537_v21, %v2157_v31  ;;  %3129 = vpow2.f32 %v2651_v47  ;;  %v4695_v37 = vld [vmem:[#allocation2 + $0x1a7] sm:$0xff]  ;;  %v2613_v10 = vmul.f32 -1.442695, %v4435_v35  ;;  %v1699_v4 = vadd.f32 %v4508_v24, %v5198_v53 }
 0x27e   : > { %v2652_v38 = vmul.f32 -1.442695, %v4679_v11  ;;  %v2759_v59 = vpack.c.bf16 %v4689_v56, %v4686_v26  ;;  %v2158_v62 = vmul.f32 %v4526_v33, %v2142_v17  ;;  %v1998_v61 = vadd.f32 %v1982_v43, %v1950_v44  ;;  %v5203_v17 = vld [vmem:[#allocation20_spill] sm:$0xff] }
 0x27f   : > { %v2653_v9 = vmul.f32 -1.442695, %v4692_v50  ;;  %v1855_v16 = vadd.f32 %v1839_v13, %v4622_v55  ;;  %v1888_v34 = vmul.f32 %v4695_v37, %v3767_v36  ;;  %v2611_v63 = vmul.f32 -1.442695, %v4590_v23 }
 0x280   : > { %3131 = vpow2.f32 %v2652_v38  ;;  %2807 = vst [vmem:[%s4089_s24 + $0x38] sm:$0xff] %v2759_v59   ;;  %v4710_v49 = vadd.f32 %v4537_v21, %v2158_v62  ;;  %v1936_v24 = vmul.f32 %v3770_v27, %v4658_v60  ;;  %v2031_v20 = vmul.f32 %v4695_v37, %v3778_v32  ;;  %v5204_v38 = vld [vmem:[#allocation26_spill] sm:$0xff]  ;;  %v5205_v59 = vld [vmem:[#allocation21_spill] sm:$0xff] }
 0x281   : > { %3133 = vpow2.f32 %v2653_v9  ;;  %v3124_v29 = vpop.eup %3123  ;;  %v1904_v54 = vadd.f32 %v1888_v34, %v1855_v16  ;;  %v2079_v55 = vmul.f32 %v3773_v28, %v4658_v60  ;;  %v1700_v22 = vadd.f32 %v1699_v4, %v5200_v7 }
 0x282   : > { %3135 = vpow2.f32 %v5199_v40  ;;  %v2281_v12 = vmul.f32 %v3124_v29, %v4585_v30  ;;  %v2654_v57 = vmul.f32 -1.442695, %v4710_v49  ;;  %v2047_v15 = vadd.f32 %v2031_v20, %v1998_v61  ;;  %v5202_v30 = vld [vmem:[#allocation25_spill] sm:$0xff] }
 0x283   : > { %v3126_v48 = vpop.eup %3125  ;;  %3137 = vpow2.f32 %v4426_v51  ;;  %v4724_v43 = vadd.f32 %v1936_v24, %v1904_v54  ;;  %v1701_v8 = vadd.f32 %v1700_v22, %v5201_v41  ;;  %v1744_v40 = vmul.f32 %v4619_v25, %v3717_v18  ;;  %v2120_v25 = vld [vmem:[#allocation2 + $0x231] sm:$0xff] }
 0x284   : > { %v2282_v13 = vmul.f32 %v3126_v48, %v4594_v5  ;;  %3139 = vpow2.f32 %v4431_v3  ;;  %v4728_v52 = vadd.f32 %v2079_v55, %v2047_v15 }
 0x285   : > { %3141 = vpow2.f32 %v2654_v57  ;;  %v3128_v31 = vpop.eup %3127  ;;  %v1702_v46 = vadd.f32 %v1701_v8, %v5202_v30  ;;  %v5206_v57 = vld [vmem:[#allocation39_spill] sm:$0xff] }
 0x286   : > { %v2764_v44 = vpack.c.bf16 %v2282_v13, %v2281_v12  ;;  %3143 = vpow2.f32 %v2613_v10  ;;  %v4731_v47 = vadd.f32 %v2282_v13, %v2281_v12  ;;  %v4734_v51 = vmul.f32 %v3128_v31, %v5203_v17  ;;  %v2023_v12 = vld [vmem:[#allocation2 + $0x227] sm:$0xff]  ;;  %v2024_v8 = vld [vmem:[#allocation2 + $0x22f] sm:$0xff]  ;;  %v5208_v17 = vld [vmem:[#allocation17_spill] sm:$0xff] }
 0x287   : > { %3145 = vpow2.f32 %v2611_v63  ;;  %v3130_v5 = vpop.eup %3129  ;;  %v1703_v3 = vadd.f32 %v1702_v46, %v5204_v38  ;;  %v5207_v13 = vld [vmem:[#allocation18_spill] sm:$0xff] }
 0x288   : > { %2808 = vst [vmem:[%s4089_s24 + $0x40] sm:$0xff] %v2764_v44   ;;  %v2235_v53 = vadd.f32 1.0, %v3130_v5  ;;  %982 = vst [vmem:[#allocation2 + $0x1d0] sm:$0xff] %v4734_v51  ;;  %v1792_v41 = vmul.f32 %v5207_v13, %v4568_v45  ;;  %v2119_v31 = vld [vmem:[#allocation2 + $0x229] sm:$0xff]  ;;  %v4748_v44 = vmul.f32 %v2023_v12, %v3778_v32  ;;  %v4754_v45 = vmul.f32 %v2024_v8, %v3778_v32 }
 0x289   : > { %v1704_v62 = vadd.f32 %v1703_v3, %v5205_v59  ;;  %v1840_v3 = vmul.f32 %v4664_v1, %v3733_v42 }
 0x28a   : > { %v3132_v4 = vpop.eup %3131  ;;  %3147 = vrcp.f32 %v2235_v53  ;;  %v1731_v53 = vld [vmem:[#allocation2 + $0x1c7] sm:$0xff] }
 0x28b   : > { %v3134_v9 = vpop.eup %3133  ;;  %v2236_v10 = vadd.f32 1.0, %v3132_v4  ;;  %v1705_v34 = vadd.f32 %v1704_v62, %v4560_v14  ;;  %v3210_v4 = vld [vmem:[#allocation2] sm:$0xff]  ;;  %v4760_v62 = vmul.f32 %v4514_v19, %v2119_v31 }
 0x28c   : > { %v3136_v61 = vpop.eup %3135  ;;  %v2237_v16 = vadd.f32 1.0, %v3134_v9  ;;  %v4757_v59 = vmul.f32 %v3210_v4, %v3773_v28  ;;  %v5213_v31 = vld [vmem:[#allocation33_spill] sm:$0xff] }
 0x28d   : > { %v3138_v24 = vpop.eup %3137  ;;  %3149 = vrcp.f32 %v2236_v10  ;;  %v810_v63 = vadd.f32 1.0, %v3136_v61  ;;  %v1706_v54 = vadd.f32 %v1705_v34, %v4571_v6  ;;  %v1808_v6 = vadd.f32 %v1792_v41, %v1744_v40  ;;  %5209 = vst [vmem:[#allocation37_spill] sm:$0xff] %v4760_v62 }
 0x28e   : > { %v3140_v20 = vpop.eup %3139  ;;  %3151 = vrcp.f32 %v2237_v16  ;;  %v815_v29 = vadd.f32 1.0, %v3138_v24  ;;  %v4764_v61 = vmul.f32 %v4514_v19, %v2120_v25  ;;  %v1793_v41 = vmul.f32 %v5207_v13, %v4658_v60 }
 0x28f   : > { %v3142_v55 = vpop.eup %3141  ;;  %3153 = vrcp.f32 %v810_v63  ;;  %v813_v48 = vadd.f32 1.0, %v3140_v20  ;;  %v1707_v14 = vadd.f32 %v1706_v54, %v5206_v57  ;;  %v1732_v10 = vld [vmem:[#allocation2 + $0x1cf] sm:$0xff]  ;;  %v4767_v24 = vadd.f32 %v1840_v3, %v1808_v6 }
 0x290   : > { %v3144_v7 = vpop.eup %3143  ;;  %v2238_v22 = vadd.f32 1.0, %v3142_v55  ;;  %3155 = vrcp.f32 %v815_v29  ;;  %5210 = vst [vmem:[#allocation32_spill] sm:$0xff] %v4764_v61  ;;  %v1983_v63 = vmul.f32 %v4664_v1, %v3782_v39  ;;  %v1795_v20 = vmul.f32 %v5207_v13, %v4654_v2  ;;  %v1828_v8 = vld [vmem:[#allocation2 + $0x1d1] sm:$0xff] }
 0x291   : > { %v3146_v15 = vpop.eup %3145  ;;  %v816_v30 = vadd.f32 1.0, %v3144_v7  ;;  %v1708_v5 = vadd.f32 %v1707_v14, %v5208_v17  ;;  %v1747_v54 = vmul.f32 %v1731_v53, %v3717_v18  ;;  %v4782_v1 = vmul.f32 %v3770_v27, %v4654_v2 }
 0x292   : > { %3157 = vrcp.f32 %v2238_v22  ;;  %v814_v46 = vadd.f32 1.0, %v3146_v15  ;;  %v1745_v22 = vmul.f32 %v4695_v37, %v3717_v18  ;;  %v4793_v15 = vmul.f32 %v1731_v53, %v3767_v36 }
 0x293   : > { %3159 = vrcp.f32 %v813_v48  ;;  %v1709_v16 = vadd.f32 %v1708_v5, %v4686_v26  ;;  %v1827_v48 = vld [vmem:[#allocation2 + $0x1c9] sm:$0xff]  ;;  %v1796_v37 = vmul.f32 %v5207_v13, %v4734_v51  ;;  %v1999_v17 = vadd.f32 %v1983_v63, %v4683_v58  ;;  %v5214_v63 = vld [vmem:[#allocation36_spill] sm:$0xff] }
 0x294   : > { %v3148_v38 = vpop.eup %3147  ;;  %3161 = vrcp.f32 %v816_v30  ;;  %v1811_v30 = vadd.f32 %v1795_v20, %v1747_v54  ;;  %v1809_v60 = vadd.f32 %v1793_v41, %v1745_v22  ;;  %v4817_v58 = vmul.f32 %v3773_v28, %v4734_v51 }
 0x295   : > { %v2283_v9 = vmul.f32 %v3148_v38, %v4672_v0  ;;  %3163 = vrcp.f32 %v814_v46  ;;  %v4776_v55 = vadd.f32 %v1709_v16, %v4689_v56  ;;  %v4789_v56 = vmul.f32 %v3773_v28, %v4654_v2 }
 0x296   : > { %v4802_v2 = vmul.f32 %v1731_v53, %v3778_v32  ;;  %v1843_v46 = vmul.f32 %v1827_v48, %v3733_v42  ;;  %v4809_v16 = vmul.f32 %v1732_v10, %v3767_v36  ;;  %v4813_v53 = vmul.f32 %v3770_v27, %v4734_v51 }
 0x297   : > { %v3150_v34 = vpop.eup %3149  ;;  %5211 = vst [vmem:[#allocation27_spill] sm:$0xff] %v4776_v55  ;;  %v2378_v26 = vadd.f32 %v4731_v47, %v2283_v9  ;;  %v5212_v47 = vld [vmem:[#allocation35_spill] sm:$0xff]  ;;  %v2129_v22 = vmul.f32 %v4514_v19, %v1827_v48 }
 0x298   : > { %v3152_v29 = vpop.eup %3151  ;;  %v2284_v0 = vmul.f32 %v3150_v34, %v4679_v11  ;;  %v1748_v11 = vmul.f32 %v1732_v10, %v3717_v18  ;;  %v4820_v34 = vmul.f32 %v1827_v48, %v3782_v39  ;;  %v1859_v54 = vadd.f32 %v1843_v46, %v1811_v30 }
 0x299   : > { %v3154_v40 = vpop.eup %3153  ;;  %v2285_v7 = vmul.f32 %v3152_v29, %v4692_v50 }
 0x29a   : > { %v3156_v12 = vpop.eup %3155  ;;  %v2769_v57 = vpack.c.bf16 %v2284_v0, %v2283_v9  ;;  %v906_v14 = vmul.f32 %v3154_v40, %v5212_v47  ;;  %v2379_v50 = vadd.f32 %v2378_v26, %v2284_v0  ;;  %v1812_v38 = vadd.f32 %v1796_v37, %v1748_v11 }
 0x29b   : > { %v911_v6 = vmul.f32 %v3156_v12, %v5213_v31  ;;  %v1844_v9 = vmul.f32 %v1828_v8, %v3733_v42  ;;  %v4826_v26 = vmul.f32 %v1828_v8, %v3782_v39  ;;  %v2034_v40 = vmul.f32 %v1732_v10, %v3778_v32 }
 0x29c   : > { %v3158_v25 = vpop.eup %3157  ;;  %2809 = vst [vmem:[%s4089_s24 + $0x48] sm:$0xff] %v2769_v57   ;;  %980 = vst [vmem:[#allocation2 + $0x1b0] sm:$0xff] %v906_v14  ;;  %v2380_v3 = vadd.f32 %v2379_v50, %v2285_v7  ;;  %v1794_v12 = vmul.f32 %v5207_v13, %v906_v14  ;;  %v1937_v47 = vmul.f32 %v3770_v27, %v906_v14 }
 0x29d   : > { %v2286_v5 = vmul.f32 %v3158_v25, %v4710_v49  ;;  %985 = vst [vmem:[#allocation2 + $0x208] sm:$0xff] %v911_v6  ;;  %v3160_v4 = vpop.eup %3159  ;;  %v4831_v51 = vadd.f32 %v1844_v9, %v1812_v38  ;;  %v2080_v50 = vmul.f32 %v3773_v28, %v906_v14  ;;  %v4841_v10 = vmul.f32 %v3770_v27, %v911_v6 }
 0x29e   : > { %v909_v20 = vmul.f32 %v3160_v4, %v5214_v63  ;;  %v3162_v0 = vpop.eup %3161 }
 0x29f   : > { %v2774_v49 = vpack.c.bf16 %v2286_v5, %v2285_v7  ;;  %v4823_v29 = vadd.f32 %v2380_v3, %v2286_v5  ;;  %v3164_v11 = vpop.eup %3163  ;;  %v4834_v7 = vmul.f32 %v4514_v19, %v1828_v8  ;;  %v912_v57 = vmul.f32 %v3162_v0, %v4435_v35 }
 0x2a0   : > { %983 = vst [vmem:[#allocation2 + $0x1e8] sm:$0xff] %v909_v20  ;;  %v4844_v48 = vmul.f32 %v3164_v11, %v4590_v23  ;;  %v4847_v8 = vmul.f32 %v3773_v28, %v911_v6  ;;  %v1797_v25 = vmul.f32 %v5207_v13, %v909_v20  ;;  %v1940_v35 = vmul.f32 %v3770_v27, %v909_v20 }
 0x2a1   : > { %5215 = vst [vmem:[#allocation16_spill] sm:$0xff] %v4823_v29  ;;  %2810 = vst [vmem:[%s4089_s24 + $0x50] sm:$0xff] %v2774_v49   ;;  %v2083_v30 = vmul.f32 %v3773_v28, %v909_v20  ;;  %v4856_v5 = vmul.f32 %v3770_v27, %v912_v57  ;;  %v4863_v9 = vmul.f32 %v3773_v28, %v912_v57 }
 0x2a2   : > { %986 = vst [vmem:[#allocation2 + $0x210] sm:$0xff] %v912_v57  ;;  %984 = vst [vmem:[#allocation2 + $0x1f0] sm:$0xff] %v4844_v48 }
 0x2a3   : > { %v1730_v41 = vld [vmem:[#allocation2 + $0x1af] sm:$0xff] }
 0x2a4   : > { %v1825_v37 = vld [vmem:[#allocation2 + $0x1a9] sm:$0xff]  ;;  %v1826_v31 = vld [vmem:[#allocation2 + $0x1b1] sm:$0xff]  ;;  %v1746_v14 = vmul.f32 %v1730_v41, %v3717_v18  ;;  %v1889_v23 = vmul.f32 %v1730_v41, %v3767_v36  ;;  %v2032_v38 = vmul.f32 %v1730_v41, %v3778_v32 }
 0x2a5   : > { %v1841_v46 = vmul.f32 %v1825_v37, %v3733_v42  ;;  %v1984_v6 = vmul.f32 %v1825_v37, %v3782_v39  ;;  %v2127_v3 = vmul.f32 %v4514_v19, %v1825_v37  ;;  %v1878_v4 = vld [vmem:[#allocation2 + $0x207] sm:$0xff]  ;;  %v1842_v63 = vmul.f32 %v1826_v31, %v3733_v42 }
 0x2a6   : > { %v1810_v49 = vadd.f32 %v1794_v12, %v1746_v14  ;;  %v1905_v0 = vadd.f32 %v1889_v23, %v4767_v24  ;;  %v1985_v11 = vmul.f32 %v1826_v31, %v3782_v39  ;;  %v2048_v29 = vadd.f32 %v2032_v38, %v1999_v17 }
 0x2a7   : > { %v1857_v20 = vadd.f32 %v1841_v46, %v1809_v60  ;;  %v2000_v55 = vadd.f32 %v1984_v6, %v4724_v43  ;;  %v2143_v61 = vadd.f32 %v2127_v3, %v4728_v52  ;;  %v2128_v62 = vmul.f32 %v4514_v19, %v1826_v31  ;;  %v1733_v12 = vld [vmem:[#allocation2 + $0x1e7] sm:$0xff] }
 0x2a8   : > { %v1953_v37 = vadd.f32 %v1937_v47, %v1905_v0  ;;  %v1894_v57 = vmul.f32 %v1878_v4, %v3767_v36  ;;  %v1858_v14 = vadd.f32 %v1842_v63, %v1810_v49  ;;  %v2096_v46 = vadd.f32 %v2080_v50, %v2048_v29 }
 0x2a9   : > { %v1906_v41 = vadd.f32 %v4793_v15, %v1857_v20  ;;  %v2049_v60 = vadd.f32 %v4802_v2, %v2000_v55  ;;  %v2159_v24 = vmul.f32 %v4526_v33, %v2143_v61  ;;  %v1749_v43 = vmul.f32 %v1733_v12, %v3717_v18  ;;  %v1879_v29 = vld [vmem:[#allocation2 + $0x20f] sm:$0xff] }
 0x2aa   : > { %v2001_v23 = vadd.f32 %v1985_v11, %v1953_v37  ;;  %v1892_v17 = vmul.f32 %v1733_v12, %v3767_v36  ;;  %v2144_v47 = vadd.f32 %v2128_v62, %v2096_v46  ;;  %v2037_v6 = vmul.f32 %v1878_v4, %v3778_v32  ;;  %v1974_v62 = vld [vmem:[#allocation2 + $0x209] sm:$0xff]  ;;  %v4888_v49 = vld [vmem:[#allocation2 + $0x211] sm:$0xff] }
 0x2ab   : > { %v1954_v52 = vadd.f32 %v4782_v1, %v1906_v41  ;;  %v2097_v15 = vadd.f32 %v4789_v56, %v2049_v60  ;;  %v4880_v31 = vadd.f32 %v4537_v21, %v2159_v24  ;;  %v2035_v61 = vmul.f32 %v1733_v12, %v3778_v32  ;;  %v1734_v20 = vld [vmem:[#allocation2 + $0x1ef] sm:$0xff] }
 0x2ac   : > { %v2050_v38 = vadd.f32 %v2034_v40, %v2001_v23  ;;  %v1908_v55 = vadd.f32 %v1892_v17, %v1859_v54  ;;  %v1907_v50 = vadd.f32 %v4809_v16, %v1858_v14  ;;  %v2160_v1 = vmul.f32 %v4526_v33, %v2144_v47 }
 0x2ad   : > { %v2002_v2 = vadd.f32 %v4820_v34, %v1954_v52  ;;  %v2145_v3 = vadd.f32 %v2129_v22, %v2097_v15  ;;  %v2655_v56 = vmul.f32 -1.442695, %v4880_v31  ;;  %v1813_v4 = vadd.f32 %v1797_v25, %v1749_v43  ;;  %v1829_v22 = vld [vmem:[#allocation2 + $0x1e9] sm:$0xff]  ;;  %v1830_v25 = vld [vmem:[#allocation2 + $0x1f1] sm:$0xff] }
 0x2ae   : > { %v2098_v63 = vadd.f32 %v4817_v58, %v2050_v38  ;;  %v1956_v40 = vadd.f32 %v1940_v35, %v1908_v55  ;;  %v4893_v0 = vadd.f32 %v4537_v21, %v2160_v1  ;;  %v1895_v16 = vmul.f32 %v1879_v29, %v3767_v36 }
 0x2af   : > { %v2051_v54 = vadd.f32 %v2035_v61, %v2002_v2  ;;  %v2161_v34 = vmul.f32 %v4526_v33, %v2145_v3  ;;  %3165 = vpow2.f32 %v2655_v56  ;;  %v1990_v37 = vmul.f32 %v1974_v62, %v3782_v39 }
 0x2b0   : > { %v2146_v11 = vadd.f32 %v4834_v7, %v2098_v63  ;;  %v1991_v58 = vmul.f32 %v4888_v49, %v3782_v39  ;;  %v2656_v12 = vmul.f32 -1.442695, %v4893_v0  ;;  %v2038_v14 = vmul.f32 %v1879_v29, %v3778_v32 }
 0x2b1   : > { %v2099_v41 = vadd.f32 %v2083_v30, %v2051_v54  ;;  %v4901_v35 = vadd.f32 %v4537_v21, %v2161_v34  ;;  %v1750_v60 = vmul.f32 %v1734_v20, %v3717_v18  ;;  %v2133_v7 = vmul.f32 %v4514_v19, %v1974_v62 }
 0x2b2   : > { %v2162_v46 = vmul.f32 %v4526_v33, %v2146_v11  ;;  %v1798_v30 = vmul.f32 %v5207_v13, %v4844_v48  ;;  %v1845_v24 = vmul.f32 %v1829_v22, %v3733_v42  ;;  %3167 = vpow2.f32 %v2656_v12 }
 0x2b3   : > { %v2657_v23 = vmul.f32 -1.442695, %v4901_v35  ;;  %v1846_v43 = vmul.f32 %v1830_v25, %v3733_v42  ;;  %v1893_v17 = vmul.f32 %v1734_v20, %v3767_v36  ;;  %v1955_v47 = vadd.f32 %v4813_v53, %v1907_v50 }
 0x2b4   : > { %v4915_v52 = vadd.f32 %v4537_v21, %v2162_v46  ;;  %v1814_v18 = vadd.f32 %v1798_v30, %v1750_v60  ;;  %v1861_v15 = vadd.f32 %v1845_v24, %v1813_v4  ;;  %v1941_v13 = vmul.f32 %v3770_v27, %v4844_v48 }
 0x2b5   : > { %3169 = vpow2.f32 %v2657_v23  ;;  %v1909_v38 = vadd.f32 %v1893_v17, %v4831_v51  ;;  %v1988_v55 = vmul.f32 %v1829_v22, %v3782_v39  ;;  %v2003_v36 = vadd.f32 %v4826_v26, %v1955_v47 }
 0x2b6   : > { %v2658_v2 = vmul.f32 -1.442695, %v4915_v52  ;;  %v1862_v42 = vadd.f32 %v1846_v43, %v1814_v18  ;;  %v1910_v61 = vadd.f32 %v1894_v57, %v1861_v15  ;;  %v1989_v3 = vmul.f32 %v1830_v25, %v3782_v39  ;;  %v5217_v43 = vld [vmem:[#allocation32_spill] sm:$0xff] }
 0x2b7   : > { %v1957_v29 = vadd.f32 %v1941_v13, %v1909_v38  ;;  %v2004_v1 = vadd.f32 %v1988_v55, %v1956_v40  ;;  %v2036_v53 = vmul.f32 %v1734_v20, %v3778_v32  ;;  %v2131_v27 = vmul.f32 %v4514_v19, %v1829_v22 }
 0x2b8   : > { %3171 = vpow2.f32 %v2658_v2  ;;  %v1911_v50 = vadd.f32 %v1895_v16, %v1862_v42  ;;  %v1958_v51 = vadd.f32 %v4841_v10, %v1910_v61  ;;  %v2084_v57 = vmul.f32 %v3773_v28, %v4844_v48 }
 0x2b9   : > { %v3166_v56 = vpop.eup %3165  ;;  %v2005_v62 = vadd.f32 %v1989_v3, %v1957_v29  ;;  %v2052_v63 = vadd.f32 %v2036_v53, %v2003_v36  ;;  %v2053_v4 = vadd.f32 %v2037_v6, %v2004_v1  ;;  %v2147_v40 = vadd.f32 %v2131_v27, %v2099_v41  ;;  %v5218_v1 = vld [vmem:[#allocation16_spill] sm:$0xff] }
 0x2ba   : > { %v2239_v26 = vadd.f32 1.0, %v3166_v56  ;;  %v1959_v54 = vadd.f32 %v4856_v5, %v1911_v50  ;;  %v2006_v39 = vadd.f32 %v1990_v37, %v1958_v51  ;;  %v2132_v10 = vmul.f32 %v4514_v19, %v1830_v25 }
 0x2bb   : > { %v2054_v34 = vadd.f32 %v2038_v14, %v2005_v62  ;;  %v2100_v32 = vadd.f32 %v2084_v57, %v2052_v63  ;;  %v2101_v20 = vadd.f32 %v4847_v8, %v2053_v4  ;;  %v2163_v6 = vmul.f32 %v4526_v33, %v2147_v40 }
 0x2bc   : > { %3173 = vrcp.f32 %v2239_v26  ;;  %v2007_v16 = vadd.f32 %v1991_v58, %v1959_v54  ;;  %v2055_v22 = vadd.f32 %v4748_v44, %v2006_v39  ;;  %v3168_v11 = vpop.eup %3167  ;;  %v2134_v28 = vmul.f32 %v4514_v19, %v4888_v49 }
 0x2bd   : > { %v2102_v48 = vadd.f32 %v4863_v9, %v2054_v34  ;;  %v2148_v5 = vadd.f32 %v2132_v10, %v2100_v32  ;;  %v2149_v41 = vadd.f32 %v2133_v7, %v2101_v20  ;;  %v2240_v37 = vadd.f32 1.0, %v3168_v11  ;;  %v5216_v9 = vld [vmem:[#allocation37_spill] sm:$0xff] }
 0x2be   : > { %v2056_v12 = vadd.f32 %v4754_v45, %v2007_v16  ;;  %v2103_v8 = vadd.f32 %v4757_v59, %v2055_v22  ;;  %v4941_v25 = vadd.f32 %v4537_v21, %v2163_v6 }
 0x2bf   : > { %v3170_v58 = vpop.eup %3169  ;;  %v2150_v44 = vadd.f32 %v2134_v28, %v2102_v48  ;;  %v2164_v14 = vmul.f32 %v4526_v33, %v2148_v5  ;;  %v2165_v60 = vmul.f32 %v4526_v33, %v2149_v41  ;;  %3175 = vrcp.f32 %v2240_v37 }
 0x2c0   : > { %v2241_v46 = vadd.f32 1.0, %v3170_v58  ;;  %v2104_v19 = vadd.f32 %v4757_v59, %v2056_v12  ;;  %v2151_v49 = vadd.f32 %v5216_v9, %v2103_v8  ;;  %v2659_v24 = vmul.f32 -1.442695, %v4941_v25 }
 0x2c1   : > { %v2166_v7 = vmul.f32 %v4526_v33, %v2150_v44  ;;  %v4949_v45 = vadd.f32 %v4537_v21, %v2164_v14  ;;  %v4952_v30 = vadd.f32 %v4537_v21, %v2165_v60  ;;  %v5219_v44 = vld [vmem:[#allocation27_spill] sm:$0xff] }
 0x2c2   : > { %v3172_v23 = vpop.eup %3171  ;;  %3177 = vrcp.f32 %v2241_v46  ;;  %v2152_v17 = vadd.f32 %v5217_v43, %v2104_v19  ;;  %v2167_v18 = vmul.f32 %v4526_v33, %v2151_v49  ;;  %v1711_v14 = vrot.slane %v5219_v44, 4 }
 0x2c3   : > { %v2242_v15 = vadd.f32 1.0, %v3172_v23  ;;  %v2182_v59 = vadd.f32 %v4537_v21, %v2166_v7  ;;  %3179 = vpow2.f32 %v2659_v24  ;;  %v2660_v47 = vmul.f32 -1.442695, %v4949_v45 }
 0x2c4   : > { %v2168_v38 = vmul.f32 %v4526_v33, %v2152_v17  ;;  %v2183_v13 = vadd.f32 %v4537_v21, %v2167_v18  ;;  %v2661_v55 = vmul.f32 -1.442695, %v4952_v30 }
 0x2c5   : > { %3181 = vrcp.f32 %v2242_v15  ;;  %v2662_v2 = vmul.f32 -1.442695, %v2182_v59 }
 0x2c6   : > { %v3174_v42 = vpop.eup %3173  ;;  %v2184_v61 = vadd.f32 %v4537_v21, %v2168_v38  ;;  %3183 = vpow2.f32 %v2660_v47  ;;  %v2663_v36 = vmul.f32 -1.442695, %v2183_v13 }
 0x2c7   : > { %v2287_v29 = vmul.f32 %v3174_v42, %v4880_v31  ;;  %3185 = vpow2.f32 %v2661_v55 }
 0x2c8   : > { %3187 = vpow2.f32 %v2662_v2  ;;  %v2664_v3 = vmul.f32 -1.442695, %v2184_v61 }
 0x2c9   : > { %3189 = vpow2.f32 %v2663_v36  ;;  %v2382_v33 = vadd.f32 %v5218_v1, %v2287_v29  ;;  %v3176_v53 = vpop.eup %3175 }
 0x2ca   : > { %3191 = vpow2.f32 %v2664_v3  ;;  %v2288_v50 = vmul.f32 %v3176_v53, %v4893_v0 }
 0x2cc   : > { %v3178_v51 = vpop.eup %3177  ;;  %v2779_v21 = vpack.c.bf16 %v2288_v50, %v2287_v29  ;;  %v2383_v62 = vadd.f32 %v2382_v33, %v2288_v50 }
 0x2cd   : > { %v3180_v27 = vpop.eup %3179  ;;  %v2289_v56 = vmul.f32 %v3178_v51, %v4901_v35 }
 0x2ce   : > { %v2243_v63 = vadd.f32 1.0, %v3180_v27  ;;  %2811 = vst [vmem:[%s4089_s24 + $0x58] sm:$0xff] %v2779_v21  }
 0x2cf   : > { %v3182_v4 = vpop.eup %3181  ;;  %v2384_v31 = vadd.f32 %v2383_v62, %v2289_v56 }
 0x2d0   : > { %v3184_v57 = vpop.eup %3183  ;;  %v2290_v26 = vmul.f32 %v3182_v4, %v4915_v52  ;;  %3193 = vrcp.f32 %v2243_v63 }
 0x2d1   : > { %v3186_v54 = vpop.eup %3185  ;;  %v2244_v39 = vadd.f32 1.0, %v3184_v57 }
 0x2d2   : > { %v3188_v40 = vpop.eup %3187  ;;  %v2784_v34 = vpack.c.bf16 %v2290_v26, %v2289_v56  ;;  %v2245_v0 = vadd.f32 1.0, %v3186_v54  ;;  %v2385_v32 = vadd.f32 %v2384_v31, %v2290_v26 }
 0x2d3   : > { %v3190_v20 = vpop.eup %3189  ;;  %v2246_v10 = vadd.f32 1.0, %v3188_v40  ;;  %3195 = vrcp.f32 %v2244_v39 }
 0x2d4   : > { %v3192_v35 = vpop.eup %3191  ;;  %2812 = vst [vmem:[%s4089_s24 + $0x60] sm:$0xff] %v2784_v34   ;;  %v2247_v16 = vadd.f32 1.0, %v3190_v20  ;;  %3197 = vrcp.f32 %v2245_v0 }
 0x2d5   : > { %v2248_v22 = vadd.f32 1.0, %v3192_v35  ;;  %3199 = vrcp.f32 %v2246_v10 }
 0x2d6   : > { %3201 = vrcp.f32 %v2247_v16 }
 0x2d7   : > { %3203 = vrcp.f32 %v2248_v22 }
 0x2da   : > { %v3194_v52 = vpop.eup %3193 }
 0x2db   : > { %v2291_v6 = vmul.f32 %v3194_v52, %v4941_v25 }
 0x2dd   : > { %v3196_v11 = vpop.eup %3195  ;;  %v2386_v28 = vadd.f32 %v2385_v32, %v2291_v6 }
 0x2de   : > { %v3198_v48 = vpop.eup %3197  ;;  %v2292_v5 = vmul.f32 %v3196_v11, %v4949_v45  ;;  %v1712_v45 = vadd.f32 %v1711_v14, %v5219_v44 }
 0x2df   : > { %v3200_v41 = vpop.eup %3199  ;;  %v2293_v37 = vmul.f32 %v3198_v48, %v4952_v30 }
 0x2e0   : > { %v3202_v12 = vpop.eup %3201  ;;  %v2294_v8 = vmul.f32 %v3200_v41, %v2182_v59  ;;  %v2789_v58 = vpack.c.bf16 %v2292_v5, %v2291_v6  ;;  %v2387_v25 = vadd.f32 %v2386_v28, %v2292_v5 }
 0x2e1   : > { %v3204_v60 = vpop.eup %3203  ;;  %v2295_v46 = vmul.f32 %v3202_v12, %v2183_v13 }
 0x2e2   : > { %v2296_v19 = vmul.f32 %v3204_v60, %v2184_v61  ;;  %2813 = vst [vmem:[%s4089_s24 + $0x68] sm:$0xff] %v2789_v58   ;;  %v2794_v9 = vpack.c.bf16 %v2294_v8, %v2293_v37  ;;  %v2388_v49 = vadd.f32 %v2387_v25, %v2293_v37 }
 0x2e4   : > { %2814 = vst [vmem:[%s4089_s24 + $0x70] sm:$0xff] %v2794_v9   ;;  %v2799_v7 = vpack.c.bf16 %v2296_v19, %v2295_v46  ;;  %v2389_v30 = vadd.f32 %v2388_v49, %v2294_v8 }
 0x2e6   : > { %2815 = vst [vmem:[%s4089_s24 + $0x78] sm:$0xff] %v2799_v7   ;;  %v2390_v24 = vadd.f32 %v2389_v30, %v2295_v46 }
 0x2e7   : > { %3310 = shalt.err (!%p3307_p7)
}
 0x2e8   : > { %s3311_s24 = scalar_lea.hbm %s4980_s18, 2048  ;;  %s3315_s15 = scalar_lea.hbm %s5067_s7, 4096 }
 0x2e9   : > { %p3312_p10 = scmp.ne.s32.totalorder %s4980_s18, %s3311_s24  ;;  %p3316_p0 = scmp.lt.u32.totalorder %s4980_s18, %s5067_s7 }
 0x2ea   : > { %p3317_p9 = scmp.lt.u32.totalorder %s3315_s15, %s3311_s24  ;;  %p3319_p2 = scmp.lt.u32.totalorder %s3311_s24, %s4980_s18 }
 0x2eb   : > { %p3313_p13 = pnand %p3312_p10, %p3569_p4 }
 0x2ec   : > { %p3318_p11 = por %p3317_p9, %p3316_p0 }
 0x2ed   : > { %p3314_p5 = pneg %p3313_p13 }
 0x2ee   : > { %p3320_p1 = por %p3319_p2, %p3318_p11 }
 0x2f0   : > { %p3321_p6 = pnand %p3320_p1, %p3314_p5 }
 0x2f2   : > { %3324 = shalt.err (!%p3321_p6)
}
 0x2f3   : > { %s3408_s13 = smov 64   ;;  %s3409_s10 = smov 4   ;;  %v1713_v23 = vrot.slane %v1712_v45, 2  ;;  %v2391_v43 = vadd.f32 %v2390_v24, %v2296_v19 }
 0x2f4   : > { %2881 = dma.vmem_to_hbm [thread:$0]  (%p3569_p4), %s4982_s23, 2048, %s4980_s18, %s2401_s11, %s3408_s13, %s3408_s13, %s3409_s10  }
 0x2f5   : > { %v2392_v17 = vrot.slane %v2391_v43, 4  ;;  %v1714_v18 = vadd.f32 %v1713_v23, %v1712_v45  ;;  %s2684_s14 = sshll.u32 %s3477_s9, 4  ;;  %s358_s24 = scalar_lea.vmem [#allocation10], %s3618_s20 }
 0x2f6   : > { %s2434_s19 = sshll.u32 %s358_s24, 4  ;;  %s5016_s23 = scalar_lea.hbm %s5068_s8, %s2684_s14  ;;  %s5018_s19 = int_to_ptr.vmem [resolvable:$true] %s2434_s19 }
 0x2f7   : > { %v2393_v15 = vadd.f32 %v2392_v17, %v2391_v43  ;;  %v1715_v47 = vrot.slane %v1714_v18, 1  ;;  %s2406_s18 = scalar_lea.sflag [#allocation11], %s3618_s20  ;;  %s3325_s11 = scalar_lea.vmem %s5018_s19, 16 }
 0x2f8   : > { %p3326_p8 = scmp.ne.s32.totalorder %s5018_s19, %s3325_s11  ;;  %s3410_s9 = smov [#allocation10]  }
 0x2f9   : > { %v2394_v59 = vrot.slane %v2393_v15, 2  ;;  %v1716_v55 = vadd.f32 %v1715_v47, %v1714_v18  ;;  %s3329_s26 = sshll.u32 %s3410_s9, 4  ;;  %s3330_s26 = int_to_ptr.vmem [resolvable:$false] %s3329_s26 }
 0x2fa   : > { %p3327_p12 = pnand %p3326_p8, %p3569_p4  ;;  %s3331_s25 = scalar_lea.vmem %s3330_s26, 32 }
 0x2fb   : > { %v2395_v38 = vadd.f32 %v2394_v59, %v2393_v15  ;;  %p3332_p7 = scmp.lt.s32.totalorder %s5018_s19, %s3330_s26  ;;  %p3333_p10 = scmp.lt.s32.totalorder %s3331_s25, %s3325_s11 }
 0x2fc   : > { %p3328_p3 = pneg %p3327_p12 }
 0x2fd   : > { %v2396_v13 = vrot.slane %v2395_v38, 1  ;;  %p3334_p13 = por %p3333_p10, %p3332_p7 }
 0x2ff   : > { %v2397_v2 = vadd.f32 %v2396_v13, %v2395_v38  ;;  %p3335_p5 = pnand %p3334_p13, %p3328_p3 }
 0x301   : > { %v2398_v42 = vadd.f32 %v2397_v2, %v1716_v55 }
 0x303   : > { %2399 = vst [vmem:[%s358_s24] sm:$0x1] %v2398_v42 }
 0x304   : > { %3338 = shalt.err (!%p3335_p5)
}
 0x305   : > { %s3339_s20 = scalar_lea.hbm %s5016_s23, 16  ;;  %s3343_s14 = scalar_lea.hbm %s5068_s8, 32 }
 0x306   : > { %p3340_p0 = scmp.ne.s32.totalorder %s5016_s23, %s3339_s20  ;;  %p3344_p2 = scmp.lt.u32.totalorder %s5016_s23, %s5068_s8 }
 0x307   : > { %p3345_p1 = scmp.lt.u32.totalorder %s3343_s14, %s3339_s20  ;;  %p3347_p8 = scmp.lt.u32.totalorder %s3339_s20, %s5016_s23 }
 0x308   : > { %p3341_p9 = pnand %p3340_p0, %p3569_p4 }
 0x309   : > { %p3346_p6 = por %p3345_p1, %p3344_p2 }
 0x30a   : > { %p3342_p11 = pneg %p3341_p9 }
 0x30b   : > { %p3348_p12 = por %p3347_p8, %p3346_p6 }
 0x30d   : > { %p3349_p3 = pnand %p3348_p12, %p3342_p11 }
 0x30f   : > { %3352 = shalt.err (!%p3349_p3)
}
 0x310   : > { %2882 = dma.vmem_to_hbm [thread:$0]  (%p3569_p4), %s5018_s19, 16, %s5016_s23, %s2406_s18  }
 0x311 PF: > { %s2446_s15 = sand.u32 1, %s3387_s27   ;;  %p5220_p7 = scmp.ne.s32.totalorder %s5106_s12, 0 }
 0x312   : > { %p5221_p10 = scmp.ge.s32.totalorder %s3399_s30, 2  ;;  %s2447_s11 = scalar_lea.sflag [#allocation5], %s2446_s15 }
 0x314   : > { %p2897_p13 = pnand %p5221_p10, %p5220_p7 }
 0x316   : > { %3378 = dma.done.wait (!%p2897_p13), %s2447_s11, 2048  }
 0x317   : > { %3380 = vsyncadd (!%p2897_p13), %s2447_s11, 4294965248  ;;  %s2456_s9 = scalar_lea.sflag [#allocation11], %s2446_s15 }
 0x318   : > { %3382 = dma.done.wait (!%p2897_p13), %s2456_s9, 16  }
 0x319   : > { %3384 = vsyncadd (!%p2897_p13), %s2456_s9, 4294967280  ;;  %p26_p4 = scmp.ge.s32.totalorder %s3559_s16, 4   ;;  %s5222_s27 = smov %s3391_s28 }
 0x31a   : > { %s5223_s28 = smov %s3395_s29  ;;  %s5224_s29 = smov %s3575_s22 }
 0x31b   : > { %s5225_s30 = smov %s3559_s16  ;;  %28 = sbr.rel (!%p26_p4) target bundleno = 8 (0x8), region = 124 }
 0x322   :  { %2460 = vsyncpa [#allocation4], 1 }
 0x323   :  { %2462 = vsyncpa [#allocation4 + $0x1], 1 }
 0x324   :  { %2463 = vsyncpa [#allocation7], 1 }
 0x325   :  { %2464 = vsyncpa [#allocation5], 1 }
 0x326   :  { %2466 = vsyncpa [#allocation5 + $0x1], 1 }
 0x327   :  { %2467 = vsyncpa [#allocation11], 1 }
 0x328   :  { %2469 = vsyncpa [#allocation11 + $0x1], 1 }

</bundles_post_ra>
